<compile_context>
chip_gen: v6e
topology: v6e:2x2x1
jax: 0.10.0
libtpu: 0.0.40
codegen_flags: <defaults>
</compile_context>

<pallas_src>
import math

import jax
import jax.numpy as jnp
from jax.experimental import pallas as pl
from jax.experimental.pallas import tpu as pltpu

PI = 3.141592  # matches the truncated constant in the PyTorch module


def _round_up(a, m):
    return (a + m - 1) // m * m


# ----------------------------------------------------------------------------
# Parameter / buffer construction (mirrors SphMask.__init__)
# ----------------------------------------------------------------------------
def build_sph_params(num_features,
                     radius=1.0,
                     scaling=1.0,
                     delta=1e-3,
                     lowerbound=True,
                     eps=1e-6):
    if lowerbound:
        L = 0.01
        upper_bound = PI / 2.0 * (1.0 - L)
        phi_L = math.asin(delta ** (1.0 / num_features))
        phi_L = phi_L if phi_L < upper_bound else upper_bound
    else:
        phi_L = 0.0

    F = num_features
    # Full buffers kept for the pure-JAX reference; the kernel only consumes
    # the strictly-upper-triangular (F, F) block of W_phi.
    W_theta = jnp.concatenate(
        [jnp.eye(F, dtype=jnp.float32),
         jnp.eye(F, dtype=jnp.float32)[-1:, :]], axis=0)          # (F+1, F)
    W_phi = jnp.triu(jnp.ones((F + 1, F + 1), dtype=jnp.float32), k=1)
    W_phi = W_phi.at[-2, -1].set(0.0)                              # (F+1, F+1)
    b_phi = jnp.zeros((F + 1,), dtype=jnp.float32).at[-1].set(-PI / 2.0)

    return {
        "W_theta_T": W_theta.T,             # (F, F+1)   reference only
        "W_phi": W_phi,                     # (F+1, F+1) reference only
        "b_phi": b_phi.reshape(1, F + 1),   # reference only
        "W_phi_FF": W_phi[:F, :F],          # (F, F) kernel weight (strict upper-tri ones)
        "phi_L": float(phi_L),
        "scaling": float(scaling),
        "radius": float(radius),
        "eps": float(eps),
    }


# ----------------------------------------------------------------------------
# Pallas kernel
# ----------------------------------------------------------------------------
def sph_mask_pallas(x, params, *, angle_type="half", tb_max=512):
    """x: (B, F) float32.  Returns (B, F+1) float32."""
    B, F = x.shape
    Fp1 = F + 1

    scaling = params["scaling"]
    radius = params["radius"]
    phi_L = params["phi_L"]
    eps = params["eps"]
    angle_scale = (PI - 2.0 * phi_L) if angle_type == "half" else (PI / 2.0 - phi_L)

    # ---- batch tiling: big tiles amortize pipeline overhead and fill the MXU
    n_steps = -(-B // tb_max)                 # cdiv
    if n_steps == 1 and B >= 256:
        n_steps = 2                           # keep both v7x TensorCores busy
    tb = _round_up(-(-B // n_steps), 8)       # sublane-aligned tile rows
    Bp = n_steps * tb
    x_pad = x if Bp == B else jnp.pad(x, ((0, Bp - B), (0, 0)))

    def kernel(x_ref, wp_ref, o_ref):
        xv = x_ref[...].astype(jnp.float32)
        # scaling + angularize (VPU/EUP elementwise)
        xv = angle_scale * jax.nn.sigmoid(scaling * xv) + phi_L
        # TODO(synk): feat_mask / pi_mask path (forward default None) not wired.
        s = jnp.sin(xv)                                   # (tb, F)
        c = jnp.cos(xv)                                   # (tb, F)
        log_sin = jnp.log(jnp.abs(s) + eps)               # (tb, F)
        log_cos = jnp.log(jnp.abs(c) + eps)               # (tb, F)
        # exclusive prefix-sum of log_sin via strictly-upper-triangular ones
        # (tb, F) @ (F, F) on the MXU, f32 accumulate
        cum = jnp.dot(log_sin, wp_ref[...], preferred_element_type=jnp.float32)
        y_main = radius * jnp.exp(cum + log_cos)          # first F spherical coords
        sign = jnp.where(c < 0.0, -1.0, 1.0)              # cos-sign flip
        # lane-dense store of the first F columns (unmasked vst) ...
        o_ref[:, :F] = (sign * y_main).astype(o_ref.dtype)
        # ... then the extra (F+1)-th coordinate: radius * prod_i (|sin|+eps),
        # sign forced positive (matches get_sign_only_cos / b_phi = -pi/2).
        y_last = radius * jnp.exp(jnp.sum(log_sin, axis=1, keepdims=True))
        o_ref[:, F:] = y_last.astype(o_ref.dtype)

    out = pl.pallas_call(
        kernel,
        out_shape=jax.ShapeDtypeStruct((Bp, Fp1), jnp.float32),
        grid_spec=pltpu.PrefetchScalarGridSpec(
            num_scalar_prefetch=0,
            grid=(Bp // tb,),
            in_specs=[
                pl.BlockSpec((tb, F), lambda i: (i, 0)),    # x tile
                pl.BlockSpec((F, F), lambda i: (0, 0)),     # W_phi[:F,:F], resident
            ],
            out_specs=pl.BlockSpec((tb, Fp1), lambda i: (i, 0)),
        ),
        compiler_params=pltpu.CompilerParams(
            dimension_semantics=("parallel",),
            vmem_limit_bytes=32 * 1024 * 1024,
        ),
    )(x_pad, params["W_phi_FF"])

    return out if Bp == B else out[:B]


def sph_mask_forward(x, params, *, angle_type="half", tb_max=512):
    """Full forward: flatten >2D input, then spherize via the Pallas kernel."""
    if x.ndim > 2:
        x = x.reshape(x.shape[0], -1)
    return sph_mask_pallas(x.astype(jnp.float32), params,
                           angle_type=angle_type, tb_max=tb_max)


# ----------------------------------------------------------------------------
# Pure-JAX reference (faithful to the original formulation, for correctness)
# ----------------------------------------------------------------------------
def sph_mask_reference(x, params, *, angle_type="half"):
    if x.ndim > 2:
        x = x.reshape(x.shape[0], -1)
    x = x.astype(jnp.float32)
    scaling = params["scaling"]
    radius = params["radius"]
    phi_L = params["phi_L"]
    eps = params["eps"]
    angle_scale = (PI - 2.0 * phi_L) if angle_type == "half" else (PI / 2.0 - phi_L)

    x = scaling * x
    x = angle_scale * jax.nn.sigmoid(x) + phi_L
    x = x @ params["W_theta_T"]
    v_sin = jnp.sin(x)
    v_cos = jnp.cos(x + params["b_phi"])
    y = jnp.log(jnp.abs(v_sin) + eps) @ params["W_phi"] + jnp.log(jnp.abs(v_cos) + eps)
    y = radius * jnp.exp(y)
    col = jax.lax.broadcasted_iota(jnp.int32, y.shape, dimension=1)
    neg = jnp.logical_and(v_cos < 0.0, col < (y.shape[1] - 1))
    sign = jnp.where(neg, -1.0, 1.0)
    return sign * y


# ----------------------------------------------------------------------------
if __name__ == "__main__":
    # Small NCHW-like input; the module flattens it to (B, C*H*W).
    B, C, H, W = 2, 4, 16, 16
    num_features = C * H * W  # 1024

    key = jax.random.PRNGKey(0)
    x = jax.random.normal(key, (B, C, H, W), dtype=jnp.float32)

    params = build_sph_params(
        num_features,
        radius=1.0,
        scaling=1.0,
        delta=1e-3,
        lowerbound=True,
        eps=1e-6,
    )

    out = sph_mask_forward(x, params, angle_type="half")
    out = jax.block_until_ready(out)

    ref = jax.block_until_ready(sph_mask_reference(x, params, angle_type="half"))
    assert out.shape == (B, num_features + 1), out.shape
    assert jnp.allclose(out, ref, atol=1e-4, rtol=1e-4), (
        float(jnp.max(jnp.abs(out - ref))))

    print("KERNEL_OK")
</pallas_src>

<mosaic_0001>
module attributes {stable_mosaic.version = 11 : i64} {
  func.func @kernel(%arg0: i32, %arg1: memref<8x1024xf32, #tpu.memory_space<vmem>>, %arg2: memref<1024x1024xf32, #tpu.memory_space<vmem>>, %arg3: memref<8x1025xf32, #tpu.memory_space<vmem>>) attributes {dimension_semantics = [#tpu.dimension_semantics<parallel>], iteration_bounds = array<i64: 1>, scalar_prefetch = 0 : i64, scratch_operands = 0 : i64, tpu.core_type = #tpu.core_type<tc>, window_params = [{transform_indices = @transform_0, window_bounds = array<i64: 8, 1024>}, {pipeline_mode = #tpu.pipeline_mode<synchronous>, transform_indices = @transform_1, window_bounds = array<i64: 1024, 1024>}, {transform_indices = @transform_2, window_bounds = array<i64: 8, 1025>}]} {
    %c0 = arith.constant 0 : index
    %c0_0 = arith.constant 0 : index
    %0 = vector.load %arg1[%c0, %c0_0] : memref<8x1024xf32, #tpu.memory_space<vmem>>, vector<8x1024xf32>
    %cst = arith.constant 1.000000e+00 : f32
    %1 = vector.broadcast %cst : f32 to vector<8x1024xf32>
    %2 = arith.mulf %1, %0 : vector<8x1024xf32>
    %3 = arith.negf %2 : vector<8x1024xf32>
    %4 = math.exp %3 : vector<8x1024xf32>
    %cst_1 = arith.constant 1.000000e+00 : f32
    %5 = vector.broadcast %cst_1 : f32 to vector<8x1024xf32>
    %6 = arith.addf %5, %4 : vector<8x1024xf32>
    %7 = arith.divf %5, %6 : vector<8x1024xf32>
    %cst_2 = arith.constant 0.232045889 : f32
    %8 = vector.broadcast %cst_2 : f32 to vector<8x1024xf32>
    %9 = arith.mulf %8, %7 : vector<8x1024xf32>
    %cst_3 = arith.constant 1.45477307 : f32
    %10 = vector.broadcast %cst_3 : f32 to vector<8x1024xf32>
    %11 = arith.addf %9, %10 : vector<8x1024xf32>
    %12 = math.sin %11 : vector<8x1024xf32>
    %13 = math.cos %11 : vector<8x1024xf32>
    %14 = math.absf %12 : vector<8x1024xf32>
    %cst_4 = arith.constant 9.99999997E-7 : f32
    %15 = vector.broadcast %cst_4 : f32 to vector<8x1024xf32>
    %16 = arith.addf %14, %15 : vector<8x1024xf32>
    %17 = math.log %16 : vector<8x1024xf32>
    %18 = math.absf %13 : vector<8x1024xf32>
    %cst_5 = arith.constant 9.99999997E-7 : f32
    %19 = vector.broadcast %cst_5 : f32 to vector<8x1024xf32>
    %20 = arith.addf %18, %19 : vector<8x1024xf32>
    %21 = math.log %20 : vector<8x1024xf32>
    %c0_6 = arith.constant 0 : index
    %c0_7 = arith.constant 0 : index
    %22 = vector.load %arg2[%c0_6, %c0_7] : memref<1024x1024xf32, #tpu.memory_space<vmem>>, vector<1024x1024xf32>
    %cst_8 = arith.constant dense<0.000000e+00> : vector<8x1024xf32>
    %23 = tpu.matmul %17, %22, %cst_8 {dimension_numbers = #tpu.dot_dimension_numbers<[1], [0], [0], [1], [0, 0, 1, 1], [], []>} : vector<8x1024xf32>, vector<1024x1024xf32>, vector<8x1024xf32> -> vector<8x1024xf32>
    %24 = arith.addf %23, %21 : vector<8x1024xf32>
    %25 = math.exp %24 : vector<8x1024xf32>
    %cst_9 = arith.constant 1.000000e+00 : f32
    %26 = vector.broadcast %cst_9 : f32 to vector<8x1024xf32>
    %27 = arith.mulf %26, %25 : vector<8x1024xf32>
    %cst_10 = arith.constant 0.000000e+00 : f32
    %28 = vector.broadcast %cst_10 : f32 to vector<8x1024xf32>
    %29 = arith.cmpf olt, %13, %28 : vector<8x1024xf32>
    %cst_11 = arith.constant -1.000000e+00 : f32
    %cst_12 = arith.constant 1.000000e+00 : f32
    %30 = vector.broadcast %cst_11 : f32 to vector<8x1024xf32>
    %31 = vector.broadcast %cst_12 : f32 to vector<8x1024xf32>
    %32 = arith.select %29, %30, %31 : vector<8x1024xi1>, vector<8x1024xf32>
    %33 = arith.mulf %32, %27 : vector<8x1024xf32>
    %c0_13 = arith.constant 0 : index
    %c0_14 = arith.constant 0 : index
    %34 = vector.load %arg3[%c0_13, %c0_14] : memref<8x1025xf32, #tpu.memory_space<vmem>>, vector<8x1024xf32>
    tpu.vector_store %arg3[%c0_13, %c0_14], %33 {strides = array<i32>} : memref<8x1025xf32, #tpu.memory_space<vmem>>, vector<8x1024xf32>,
    %cst_15 = arith.constant dense<0.000000e+00> : vector<8xf32>
    %35 = vector.multi_reduction <add>, %17, %cst_15 [1] : vector<8x1024xf32> to vector<8xf32>
    %36 = vector.shape_cast %35 : vector<8xf32> to vector<8x1xf32>
    %37 = math.exp %36 : vector<8x1xf32>
    %cst_16 = arith.constant 1.000000e+00 : f32
    %38 = vector.broadcast %cst_16 : f32 to vector<8x1xf32>
    %39 = arith.mulf %38, %37 : vector<8x1xf32>
    %c0_17 = arith.constant 0 : index
    %c1024 = arith.constant 1024 : index
    %40 = vector.load %arg3[%c0_17, %c1024] : memref<8x1025xf32, #tpu.memory_space<vmem>>, vector<8x1xf32>
    tpu.vector_store %arg3[%c0_17, %c1024], %39 {strides = array<i32>} : memref<8x1025xf32, #tpu.memory_space<vmem>>, vector<8x1xf32>,
    return
  }
  func.func @transform_0(%arg0: i32) -> (i32, i32) {
    %c0_i32 = arith.constant 0 : i32
    %c0_i32_0 = arith.constant 0 : i32
    return %arg0, %c0_i32 : i32, i32
  }
  func.func @transform_1(%arg0: i32) -> (i32, i32) {
    %c0_i32 = arith.constant 0 : i32
    %c0_i32_0 = arith.constant 0 : i32
    %c0_i32_1 = arith.constant 0 : i32
    return %c0_i32, %c0_i32_0 : i32, i32
  }
  func.func @transform_2(%arg0: i32) -> (i32, i32) {
    %c0_i32 = arith.constant 0 : i32
    %c0_i32_0 = arith.constant 0 : i32
    return %arg0, %c0_i32 : i32, i32
  }
}

</mosaic_0001>

<bundles_post_ra>
// kernel: tpu_custom_call.1
= control target key start
LH: loop header
LB: loop body
LE: loop exit
PB: predicated region body
PF: predicated region fallthrough
CT: control target
= control target key end

     0   :  { %7 = vsyncpa [#allocation3], 0  ;;  %s5461_s0 = inlined_call_operand.hbm [shape: f32[8,1024], index: 0, kind: input, shape index: {}]   ;;  %s5462_s1 = inlined_call_operand.hbm [shape: f32[1024,1024], index: 1, kind: input, shape index: {}]   ;;  %s5463_s2 = inlined_call_operand.hbm [shape: f32[8,1025], index: 2, kind: output, shape index: {}]  }
   0x1   :  { %8 = vsyncpa [#allocation6], 0 }
   0x2   :  { %9 = vsyncpa [#allocation4], 0  ;;  %s4363_s9 = smov [#allocation2]   ;;  %s4364_s11 = smov [#allocation5]  }
   0x3   :  { %s16_s10 = sshll.u32 %s4363_s9, 4  ;;  %s25_s12 = sshll.u32 %s4364_s11, 4  ;;  %s17_s10 = int_to_ptr.vmem [resolvable:$true] %s16_s10  ;;  %s26_s12 = int_to_ptr.vmem [resolvable:$true] %s25_s12 }
   0x4   :  { %s4305_s13 = scalar_lea.vmem %s17_s10, 1024  ;;  %p4310_p1 = scmp.lt.s32.totalorder %s17_s10, %s17_s10 }
   0x5   :  { %p4306_p0 = scmp.ne.s32.totalorder %s17_s10, %s4305_s13  ;;  %p4311_p2 = scmp.lt.s32.totalorder %s4305_s13, %s4305_s13 }
   0x7   :  { %p4312_p3 = por %p4311_p2, %p4310_p1 }
   0x9   :  { %p4313_p4 = pnand %p4312_p3, %p4306_p0 }
   0xb   :  { %4316 = shalt.err (!%p4313_p4)
}
   0xc   :  { %19 = dma.hbm_to_vmem [thread:$0]  %s5461_s0, 1024, %s17_s10, [#allocation3]  }
   0xd   :  { %s4325_s16 = scalar_lea.vmem %s26_s12, 131072  ;;  %p4330_p6 = scmp.lt.s32.totalorder %s26_s12, %s26_s12 }
   0xe   :  { %p4326_p5 = scmp.ne.s32.totalorder %s26_s12, %s4325_s16  ;;  %p4331_p7 = scmp.lt.s32.totalorder %s4325_s16, %s4325_s16 }
  0x10   :  { %p4332_p8 = por %p4331_p7, %p4330_p6 }
  0x12   :  { %p4333_p9 = pnand %p4332_p8, %p4326_p5 }
  0x14   :  { %4336 = shalt.err (!%p4333_p9)
}
  0x15   :  { %s4365_s17 = smov 1024   ;;  %s4366_s18 = smov 64  }
  0x16   :  { %31 = dma.hbm_to_vmem [thread:$0]  %s5462_s1, 131072, %s26_s12, [#allocation6], %s4365_s17, %s4365_s17, %s4366_s18  }
  0x17   :  { %4357 = dma.done.wait [#allocation3], 1024  }
  0x18   :  { %4358 = vsyncadd [#allocation3], 4294966272 }
  0x19   :  { %4359 = dma.done.wait [#allocation6], 131072  }
  0x1a   :  { %4360 = vsyncadd [#allocation6], 4294836224  ;;  %v1951_v0 = vld [vmem:[#allocation5 + $0x3c8] sm:$0xff]  ;;  %v1950_v2 = vld [vmem:[#allocation5 + $0x3c0] sm:$0xff]  ;;  %s4374_s0 = smov [#allocation7]  }
  0x1b   :  { %v2207_v1 = vld [vmem:[#allocation5 + $0xbc8] sm:$0xff]  ;;  %2854 = vmatprep.subr.mxu0 %v1951_v0  ;;  %v2206_v3 = vld [vmem:[#allocation5 + $0xbc0] sm:$0xff]  ;;  %s4057_s1 = sshll.u32 %s4374_s0, 4  ;;  %s4058_s1 = int_to_ptr.vmem [resolvable:$true] %s4057_s1 }
  0x1c   :  { %2925 = vmatprep.subr.mxu1 %v2207_v1  ;;  %v1943_v4 = vld [vmem:[#allocation5 + $0x388] sm:$0xff]  ;;  %2855 = vmatpush1.msra.mxu0 %v1950_v2  ;;  %v1942_v6 = vld [vmem:[#allocation5 + $0x380] sm:$0xff]  ;;  %s4337_s21 = scalar_lea.vmem %s4058_s1, 1152  ;;  %p4342_p11 = scmp.lt.s32.totalorder %s4058_s1, %s4058_s1 }
  0x1d   :  { %v2199_v5 = vld [vmem:[#allocation5 + $0xb88] sm:$0xff]  ;;  %2926 = vmatpush1.msra.mxu1 %v2206_v3  ;;  %v2198_v7 = vld [vmem:[#allocation5 + $0xb80] sm:$0xff]  ;;  %2856 = vmatprep.subr.mxu0 %v1943_v4  ;;  %p4338_p10 = scmp.ne.s32.totalorder %s4058_s1, %s4337_s21  ;;  %p4343_p12 = scmp.lt.s32.totalorder %s4337_s21, %s4337_s21 }
  0x1e   :  { %v1935_v8 = vld [vmem:[#allocation5 + $0x348] sm:$0xff]  ;;  %2927 = vmatprep.subr.mxu1 %v2199_v5  ;;  %v1934_v10 = vld [vmem:[#allocation5 + $0x340] sm:$0xff]  ;;  %2857 = vmatpush1.msra.mxu0 %v1942_v6 }
  0x1f   :  { %v2191_v9 = vld [vmem:[#allocation5 + $0xb48] sm:$0xff]  ;;  %v2190_v11 = vld [vmem:[#allocation5 + $0xb40] sm:$0xff]  ;;  %2928 = vmatpush1.msra.mxu1 %v2198_v7  ;;  %2858 = vmatprep.subr.mxu0 %v1935_v8  ;;  %p4344_p13 = por %p4343_p12, %p4342_p11 }
  0x20   :  { %v1927_v12 = vld [vmem:[#allocation5 + $0x308] sm:$0xff]  ;;  %2929 = vmatprep.subr.mxu1 %v2191_v9  ;;  %v1926_v14 = vld [vmem:[#allocation5 + $0x300] sm:$0xff]  ;;  %2859 = vmatpush1.msra.mxu0 %v1934_v10 }
  0x21   :  { %v2183_v13 = vld [vmem:[#allocation5 + $0xb08] sm:$0xff]  ;;  %v2182_v15 = vld [vmem:[#allocation5 + $0xb00] sm:$0xff]  ;;  %2930 = vmatpush1.msra.mxu1 %v2190_v11  ;;  %2860 = vmatprep.subr.mxu0 %v1927_v12  ;;  %p4345_p0 = pnand %p4344_p13, %p4338_p10 }
  0x22   :  { %v1919_v16 = vld [vmem:[#allocation5 + $0x2c8] sm:$0xff]  ;;  %2931 = vmatprep.subr.mxu1 %v2183_v13  ;;  %v1918_v18 = vld [vmem:[#allocation5 + $0x2c0] sm:$0xff]  ;;  %2861 = vmatpush1.msra.mxu0 %v1926_v14 }
  0x23   :  { %v2175_v17 = vld [vmem:[#allocation5 + $0xac8] sm:$0xff]  ;;  %v2174_v19 = vld [vmem:[#allocation5 + $0xac0] sm:$0xff]  ;;  %2932 = vmatpush1.msra.mxu1 %v2182_v15  ;;  %2862 = vmatprep.subr.mxu0 %v1919_v16 }
  0x24   :  { %v1911_v20 = vld [vmem:[#allocation5 + $0x288] sm:$0xff]  ;;  %2933 = vmatprep.subr.mxu1 %v2175_v17  ;;  %v1910_v22 = vld [vmem:[#allocation5 + $0x280] sm:$0xff]  ;;  %2863 = vmatpush1.msra.mxu0 %v1918_v18 }
  0x25   :  { %v2167_v21 = vld [vmem:[#allocation5 + $0xa88] sm:$0xff]  ;;  %v2166_v23 = vld [vmem:[#allocation5 + $0xa80] sm:$0xff]  ;;  %2934 = vmatpush1.msra.mxu1 %v2174_v19  ;;  %2864 = vmatprep.subr.mxu0 %v1911_v20 }
  0x26   :  { %v1903_v24 = vld [vmem:[#allocation5 + $0x248] sm:$0xff]  ;;  %2935 = vmatprep.subr.mxu1 %v2167_v21  ;;  %v1902_v26 = vld [vmem:[#allocation5 + $0x240] sm:$0xff]  ;;  %2865 = vmatpush1.msra.mxu0 %v1910_v22 }
  0x27   :  { %v2159_v25 = vld [vmem:[#allocation5 + $0xa48] sm:$0xff]  ;;  %v2158_v27 = vld [vmem:[#allocation5 + $0xa40] sm:$0xff]  ;;  %2936 = vmatpush1.msra.mxu1 %v2166_v23  ;;  %2866 = vmatprep.subr.mxu0 %v1903_v24 }
  0x28   :  { %v1895_v28 = vld [vmem:[#allocation5 + $0x208] sm:$0xff]  ;;  %2937 = vmatprep.subr.mxu1 %v2159_v25  ;;  %v1894_v30 = vld [vmem:[#allocation5 + $0x200] sm:$0xff]  ;;  %2867 = vmatpush1.msra.mxu0 %v1902_v26 }
  0x29   :  { %v2151_v29 = vld [vmem:[#allocation5 + $0xa08] sm:$0xff]  ;;  %v2150_v31 = vld [vmem:[#allocation5 + $0xa00] sm:$0xff]  ;;  %2938 = vmatpush1.msra.mxu1 %v2158_v27  ;;  %2868 = vmatprep.subr.mxu0 %v1895_v28 }
  0x2a   :  { %v1887_v32 = vld [vmem:[#allocation5 + $0x1c8] sm:$0xff]  ;;  %2939 = vmatprep.subr.mxu1 %v2151_v29  ;;  %v1886_v34 = vld [vmem:[#allocation5 + $0x1c0] sm:$0xff]  ;;  %2869 = vmatpush1.msra.mxu0 %v1894_v30  ;;  %v41_v30 = vld [vmem:[#allocation2 + $0x18] sm:$0xff] }
  0x2b   :  { %v2143_v33 = vld [vmem:[#allocation5 + $0x9c8] sm:$0xff]  ;;  %v2142_v35 = vld [vmem:[#allocation5 + $0x9c0] sm:$0xff]  ;;  %2940 = vmatpush1.msra.mxu1 %v2150_v31  ;;  %2870 = vmatprep.subr.mxu0 %v1887_v32 }
  0x2c   :  { %v1879_v36 = vld [vmem:[#allocation5 + $0x188] sm:$0xff]  ;;  %2941 = vmatprep.subr.mxu1 %v2143_v33  ;;  %v1878_v38 = vld [vmem:[#allocation5 + $0x180] sm:$0xff]  ;;  %2871 = vmatpush1.msra.mxu0 %v1886_v34  ;;  %v4070_v34 = vmul.f32 -1.442695, %v41_v30  ;;  %v45_v30 = vld [vmem:[#allocation2 + $0x38] sm:$0xff] }
  0x2d   :  { %v2135_v37 = vld [vmem:[#allocation5 + $0x988] sm:$0xff]  ;;  %v2134_v39 = vld [vmem:[#allocation5 + $0x980] sm:$0xff]  ;;  %2942 = vmatpush1.msra.mxu1 %v2142_v35  ;;  %2872 = vmatprep.subr.mxu0 %v1879_v36 }
  0x2e   :  { %v1871_v40 = vld [vmem:[#allocation5 + $0x148] sm:$0xff]  ;;  %2943 = vmatprep.subr.mxu1 %v2135_v37  ;;  %v1870_v42 = vld [vmem:[#allocation5 + $0x140] sm:$0xff]  ;;  %2873 = vmatpush1.msra.mxu0 %v1878_v38 }
  0x2f   :  { %v2127_v41 = vld [vmem:[#allocation5 + $0x948] sm:$0xff]  ;;  %v2126_v43 = vld [vmem:[#allocation5 + $0x940] sm:$0xff]  ;;  %2944 = vmatpush1.msra.mxu1 %v2134_v39  ;;  %2874 = vmatprep.subr.mxu0 %v1871_v40 }
  0x30   :  { %v1863_v44 = vld [vmem:[#allocation5 + $0x108] sm:$0xff]  ;;  %2945 = vmatprep.subr.mxu1 %v2127_v41  ;;  %v1862_v46 = vld [vmem:[#allocation5 + $0x100] sm:$0xff]  ;;  %2875 = vmatpush1.msra.mxu0 %v1870_v42 }
  0x31   :  { %v2119_v45 = vld [vmem:[#allocation5 + $0x908] sm:$0xff]  ;;  %v2118_v47 = vld [vmem:[#allocation5 + $0x900] sm:$0xff]  ;;  %2946 = vmatpush1.msra.mxu1 %v2126_v43  ;;  %2876 = vmatprep.subr.mxu0 %v1863_v44 }
  0x32   :  { %v1855_v48 = vld [vmem:[#allocation5 + $0xc8] sm:$0xff]  ;;  %2947 = vmatprep.subr.mxu1 %v2119_v45  ;;  %v1854_v50 = vld [vmem:[#allocation5 + $0xc0] sm:$0xff]  ;;  %2877 = vmatpush1.msra.mxu0 %v1862_v46 }
  0x33   :  { %v2111_v49 = vld [vmem:[#allocation5 + $0x8c8] sm:$0xff]  ;;  %v2110_v51 = vld [vmem:[#allocation5 + $0x8c0] sm:$0xff]  ;;  %2948 = vmatpush1.msra.mxu1 %v2118_v47  ;;  %2878 = vmatprep.subr.mxu0 %v1855_v48 }
  0x34   :  { %v1847_v52 = vld [vmem:[#allocation5 + $0x88] sm:$0xff]  ;;  %2949 = vmatprep.subr.mxu1 %v2111_v49  ;;  %v1846_v54 = vld [vmem:[#allocation5 + $0x80] sm:$0xff]  ;;  %2879 = vmatpush1.msra.mxu0 %v1854_v50 }
  0x35   :  { %v2103_v53 = vld [vmem:[#allocation5 + $0x888] sm:$0xff]  ;;  %v2102_v55 = vld [vmem:[#allocation5 + $0x880] sm:$0xff]  ;;  %2950 = vmatpush1.msra.mxu1 %v2110_v51  ;;  %2880 = vmatprep.subr.mxu0 %v1847_v52 }
  0x36   :  { %v1839_v56 = vld [vmem:[#allocation5 + $0x48] sm:$0xff]  ;;  %2951 = vmatprep.subr.mxu1 %v2103_v53  ;;  %v1838_v58 = vld [vmem:[#allocation5 + $0x40] sm:$0xff]  ;;  %2881 = vmatpush1.msra.mxu0 %v1846_v54 }
  0x37   :  { %v2095_v57 = vld [vmem:[#allocation5 + $0x848] sm:$0xff]  ;;  %v2094_v59 = vld [vmem:[#allocation5 + $0x840] sm:$0xff]  ;;  %2952 = vmatpush1.msra.mxu1 %v2102_v55  ;;  %2882 = vmatprep.subr.mxu0 %v1839_v56 }
  0x38   :  { %v1831_v60 = vld [vmem:[#allocation5 + $0x8] sm:$0xff]  ;;  %2953 = vmatprep.subr.mxu1 %v2095_v57  ;;  %v1830_v62 = vld [vmem:[#allocation5] sm:$0xff]  ;;  %2883 = vmatpush1.msra.mxu0 %v1838_v58 }
  0x39   :  { %v2087_v61 = vld [vmem:[#allocation5 + $0x808] sm:$0xff]  ;;  %v2086_v63 = vld [vmem:[#allocation5 + $0x800] sm:$0xff]  ;;  %2954 = vmatpush1.msra.mxu1 %v2094_v59  ;;  %2884 = vmatprep.subr.mxu0 %v1831_v60 }
  0x3a   :  { %v2079_v0 = vld [vmem:[#allocation5 + $0x7c8] sm:$0xff]  ;;  %2955 = vmatprep.subr.mxu1 %v2087_v61  ;;  %v2078_v2 = vld [vmem:[#allocation5 + $0x7c0] sm:$0xff]  ;;  %2885 = vmatpush1.msra.mxu0 %v1830_v62 }
  0x3b   :  { %v2335_v1 = vld [vmem:[#allocation5 + $0xfc8] sm:$0xff]  ;;  %v2334_v3 = vld [vmem:[#allocation5 + $0xfc0] sm:$0xff]  ;;  %2956 = vmatpush1.msra.mxu1 %v2086_v63  ;;  %2886 = vmatprep.subr.mxu0 %v2079_v0 }
  0x3c   :  { %v2071_v4 = vld [vmem:[#allocation5 + $0x788] sm:$0xff]  ;;  %2957 = vmatprep.subr.mxu1 %v2335_v1  ;;  %v2070_v6 = vld [vmem:[#allocation5 + $0x780] sm:$0xff]  ;;  %2887 = vmatpush2.msra.mxu0 %v2078_v2 }
  0x3d   :  { %v2327_v5 = vld [vmem:[#allocation5 + $0xf88] sm:$0xff]  ;;  %v2326_v7 = vld [vmem:[#allocation5 + $0xf80] sm:$0xff]  ;;  %2958 = vmatpush2.msra.mxu1 %v2334_v3  ;;  %2888 = vmatprep.subr.mxu0 %v2071_v4 }
  0x3e   :  { %v2063_v8 = vld [vmem:[#allocation5 + $0x748] sm:$0xff]  ;;  %2959 = vmatprep.subr.mxu1 %v2327_v5  ;;  %v2062_v10 = vld [vmem:[#allocation5 + $0x740] sm:$0xff]  ;;  %2889 = vmatpush2.msra.mxu0 %v2070_v6 }
  0x3f   :  { %v2319_v9 = vld [vmem:[#allocation5 + $0xf48] sm:$0xff]  ;;  %v2318_v11 = vld [vmem:[#allocation5 + $0xf40] sm:$0xff]  ;;  %2960 = vmatpush2.msra.mxu1 %v2326_v7  ;;  %2890 = vmatprep.subr.mxu0 %v2063_v8 }
  0x40   :  { %v2055_v12 = vld [vmem:[#allocation5 + $0x708] sm:$0xff]  ;;  %2961 = vmatprep.subr.mxu1 %v2319_v9  ;;  %v2054_v14 = vld [vmem:[#allocation5 + $0x700] sm:$0xff]  ;;  %2891 = vmatpush2.msra.mxu0 %v2062_v10 }
  0x41   :  { %v2311_v13 = vld [vmem:[#allocation5 + $0xf08] sm:$0xff]  ;;  %v2310_v15 = vld [vmem:[#allocation5 + $0xf00] sm:$0xff]  ;;  %2962 = vmatpush2.msra.mxu1 %v2318_v11  ;;  %2892 = vmatprep.subr.mxu0 %v2055_v12  ;;  %v40_v12 = vld [vmem:[#allocation2 + $0x10] sm:$0xff] }
  0x42   :  { %v2047_v16 = vld [vmem:[#allocation5 + $0x6c8] sm:$0xff]  ;;  %2963 = vmatprep.subr.mxu1 %v2311_v13  ;;  %v2046_v18 = vld [vmem:[#allocation5 + $0x6c0] sm:$0xff]  ;;  %2893 = vmatpush2.msra.mxu0 %v2054_v14 }
  0x43   :  { %v2303_v17 = vld [vmem:[#allocation5 + $0xec8] sm:$0xff]  ;;  %v2302_v19 = vld [vmem:[#allocation5 + $0xec0] sm:$0xff]  ;;  %2964 = vmatpush2.msra.mxu1 %v2310_v15  ;;  %2894 = vmatprep.subr.mxu0 %v2047_v16  ;;  %v4069_v15 = vmul.f32 -1.442695, %v40_v12 }
  0x44   :  { %v2039_v20 = vld [vmem:[#allocation5 + $0x688] sm:$0xff]  ;;  %2965 = vmatprep.subr.mxu1 %v2303_v17  ;;  %v2038_v22 = vld [vmem:[#allocation5 + $0x680] sm:$0xff]  ;;  %2895 = vmatpush2.msra.mxu0 %v2046_v18 }
  0x45   :  { %v2295_v21 = vld [vmem:[#allocation5 + $0xe88] sm:$0xff]  ;;  %v2294_v23 = vld [vmem:[#allocation5 + $0xe80] sm:$0xff]  ;;  %2966 = vmatpush2.msra.mxu1 %v2302_v19  ;;  %2896 = vmatprep.subr.mxu0 %v2039_v20 }
  0x46   :  { %v2031_v24 = vld [vmem:[#allocation5 + $0x648] sm:$0xff]  ;;  %v2030_v26 = vld [vmem:[#allocation5 + $0x640] sm:$0xff]  ;;  %2967 = vmatprep.subr.mxu1 %v2295_v21  ;;  %2897 = vmatpush2.msra.mxu0 %v2038_v22 }
  0x47   :  { %v2287_v25 = vld [vmem:[#allocation5 + $0xe48] sm:$0xff]  ;;  %v2286_v28 = vld [vmem:[#allocation5 + $0xe40] sm:$0xff]  ;;  %2968 = vmatpush2.msra.mxu1 %v2294_v23  ;;  %2898 = vmatprep.subr.mxu0 %v2031_v24 }
  0x48   :  { %v39_v27 = vld [vmem:[#allocation2 + $0x8] sm:$0xff]  ;;  %v38_v31 = vld [vmem:[#allocation2] sm:$0xff]  ;;  %2969 = vmatprep.subr.mxu1 %v2287_v25  ;;  %2899 = vmatpush2.msra.mxu0 %v2030_v26 }
  0x49   :  { %v4068_v29 = vmul.f32 -1.442695, %v39_v27  ;;  %v2023_v32 = vld [vmem:[#allocation5 + $0x608] sm:$0xff]  ;;  %v4067_v35 = vmul.f32 -1.442695, %v38_v31  ;;  %v2022_v36 = vld [vmem:[#allocation5 + $0x600] sm:$0xff]  ;;  %2970 = vmatpush2.msra.mxu1 %v2286_v28 }
  0x4a   :  { %v2279_v33 = vld [vmem:[#allocation5 + $0xe08] sm:$0xff]  ;;  %v2278_v37 = vld [vmem:[#allocation5 + $0xe00] sm:$0xff]  ;;  %2900 = vmatprep.subr.mxu0 %v2023_v32 }
  0x4b   :  { %4183 = vpow2.f32 %v4068_v29  ;;  %v2015_v38 = vld [vmem:[#allocation5 + $0x5c8] sm:$0xff]  ;;  %2971 = vmatprep.subr.mxu1 %v2279_v33  ;;  %v2014_v40 = vld [vmem:[#allocation5 + $0x5c0] sm:$0xff]  ;;  %2901 = vmatpush2.msra.mxu0 %v2022_v36 }
  0x4c   :  { %v2271_v39 = vld [vmem:[#allocation5 + $0xdc8] sm:$0xff]  ;;  %4185 = vpow2.f32 %v4070_v34  ;;  %v2270_v41 = vld [vmem:[#allocation5 + $0xdc0] sm:$0xff]  ;;  %2972 = vmatpush2.msra.mxu1 %v2278_v37  ;;  %2902 = vmatprep.subr.mxu0 %v2015_v38 }
  0x4d   :  { %4187 = vpow2.f32 %v4067_v35  ;;  %v2007_v42 = vld [vmem:[#allocation5 + $0x588] sm:$0xff]  ;;  %2973 = vmatprep.subr.mxu1 %v2271_v39  ;;  %v2006_v44 = vld [vmem:[#allocation5 + $0x580] sm:$0xff]  ;;  %2903 = vmatpush2.msra.mxu0 %v2014_v40  ;;  %v4074_v40 = vmul.f32 -1.442695, %v45_v30 }
  0x4e   :  { %v2263_v43 = vld [vmem:[#allocation5 + $0xd88] sm:$0xff]  ;;  %v2262_v45 = vld [vmem:[#allocation5 + $0xd80] sm:$0xff]  ;;  %2974 = vmatpush2.msra.mxu1 %v2270_v41  ;;  %2904 = vmatprep.subr.mxu0 %v2007_v42 }
  0x4f   :  { %v1999_v46 = vld [vmem:[#allocation5 + $0x548] sm:$0xff]  ;;  %2975 = vmatprep.subr.mxu1 %v2263_v43  ;;  %v1998_v48 = vld [vmem:[#allocation5 + $0x540] sm:$0xff]  ;;  %2905 = vmatpush2.msra.mxu0 %v2006_v44  ;;  %v44_v43 = vld [vmem:[#allocation2 + $0x30] sm:$0xff] }
  0x50   :  { %v2255_v47 = vld [vmem:[#allocation5 + $0xd48] sm:$0xff]  ;;  %v2254_v49 = vld [vmem:[#allocation5 + $0xd40] sm:$0xff]  ;;  %2976 = vmatpush2.msra.mxu1 %v2262_v45  ;;  %2906 = vmatprep.subr.mxu0 %v1999_v46 }
  0x51   :  { %v1991_v50 = vld [vmem:[#allocation5 + $0x508] sm:$0xff]  ;;  %2977 = vmatprep.subr.mxu1 %v2255_v47  ;;  %v1990_v52 = vld [vmem:[#allocation5 + $0x500] sm:$0xff]  ;;  %2907 = vmatpush2.msra.mxu0 %v1998_v48 }
  0x52   :  { %v2247_v51 = vld [vmem:[#allocation5 + $0xd08] sm:$0xff]  ;;  %v2246_v53 = vld [vmem:[#allocation5 + $0xd00] sm:$0xff]  ;;  %2978 = vmatpush2.msra.mxu1 %v2254_v49  ;;  %2908 = vmatprep.subr.mxu0 %v1991_v50  ;;  %v4411_v49 = vmul.f32 -1.442695, %v44_v43 }
  0x53   :  { %v1983_v54 = vld [vmem:[#allocation5 + $0x4c8] sm:$0xff]  ;;  %2979 = vmatprep.subr.mxu1 %v2247_v51  ;;  %v1982_v56 = vld [vmem:[#allocation5 + $0x4c0] sm:$0xff]  ;;  %2909 = vmatpush2.msra.mxu0 %v1990_v52 }
  0x54   :  { %v2239_v55 = vld [vmem:[#allocation5 + $0xcc8] sm:$0xff]  ;;  %v2238_v57 = vld [vmem:[#allocation5 + $0xcc0] sm:$0xff]  ;;  %2980 = vmatpush2.msra.mxu1 %v2246_v53  ;;  %2910 = vmatprep.subr.mxu0 %v1983_v54 }
  0x55   :  { %v1975_v58 = vld [vmem:[#allocation5 + $0x488] sm:$0xff]  ;;  %2981 = vmatprep.subr.mxu1 %v2239_v55  ;;  %v1974_v60 = vld [vmem:[#allocation5 + $0x480] sm:$0xff]  ;;  %2911 = vmatpush2.msra.mxu0 %v1982_v56 }
  0x56   :  { %v2231_v59 = vld [vmem:[#allocation5 + $0xc88] sm:$0xff]  ;;  %v2230_v61 = vld [vmem:[#allocation5 + $0xc80] sm:$0xff]  ;;  %2982 = vmatpush2.msra.mxu1 %v2238_v57  ;;  %2912 = vmatprep.subr.mxu0 %v1975_v58 }
  0x57   :  { %v1967_v63 = vld [vmem:[#allocation5 + $0x448] sm:$0xff]  ;;  %2983 = vmatprep.subr.mxu1 %v2231_v59  ;;  %v1966_v2 = vld [vmem:[#allocation5 + $0x440] sm:$0xff]  ;;  %2913 = vmatpush2.msra.mxu0 %v1974_v60 }
  0x58   :  { %v4184_v62 = vpop.eup %4183  ;;  %v2223_v0 = vld [vmem:[#allocation5 + $0xc48] sm:$0xff]  ;;  %v2222_v3 = vld [vmem:[#allocation5 + $0xc40] sm:$0xff]  ;;  %2984 = vmatpush2.msra.mxu1 %v2230_v61  ;;  %2914 = vmatprep.subr.mxu0 %v1967_v63  ;;  %v4367_v61 = vmov 683565275   ;;  %v4368_v63 = vmov 2475754826  }
  0x59   :  { %v4186_v1 = vpop.eup %4185  ;;  %v71_v4 = vadd.f32 1.0, %v4184_v62  ;;  %v1959_v6 = vld [vmem:[#allocation5 + $0x408] sm:$0xff]  ;;  %2985 = vmatprep.subr.mxu1 %v2223_v0  ;;  %v1958_v9 = vld [vmem:[#allocation5 + $0x400] sm:$0xff]  ;;  %2915 = vmatpush2.msra.mxu0 %v1966_v2 }
  0x5a   :  { %v4188_v5 = vpop.eup %4187  ;;  %v2215_v7 = vld [vmem:[#allocation5 + $0xc08] sm:$0xff]  ;;  %v73_v8 = vadd.f32 1.0, %v4186_v1  ;;  %v2214_v10 = vld [vmem:[#allocation5 + $0xc00] sm:$0xff]  ;;  %2986 = vmatpush2.msra.mxu1 %v2222_v3  ;;  %2916 = vmatprep.subr.mxu0 %v1959_v6  ;;  %v4369_v1 = vmov 2131351028  }
  0x5b   :  { %4189 = vrcp.f32 %v71_v4  ;;  %v70_v11 = vadd.f32 1.0, %v4188_v5  ;;  %2987 = vmatprep.subr.mxu1 %v2215_v7  ;;  %2917 = vmatpush2.msra.mxu0 %v1958_v9  ;;  %v2463_v13 = vld [vmem:[#allocation5 + $0x13c8] sm:$0xff]  ;;  %v42_v27 = vld [vmem:[#allocation2 + $0x20] sm:$0xff]  ;;  %v4370_v3 = vmov 2102212464  }
  0x5c   :  { %4191 = vrcp.f32 %v73_v8  ;;  %2988 = vmatpush2.msra.mxu1 %v2214_v10  ;;  %v2719_v14 = vld [vmem:[#allocation5 + $0x1bc8] sm:$0xff]  ;;  %2996 = vmatprep.subr.mxu0 %v2463_v13  ;;  %v4071_v37 = vmul.f32 -1.442695, %v42_v27  ;;  %v4371_v5 = vmov 920167782  }
  0x5d   :  { %4193 = vrcp.f32 %v70_v11  ;;  %3067 = vmatprep.subr.mxu1 %v2719_v14  ;;  %v43_v23 = vld [vmem:[#allocation2 + $0x28] sm:$0xff]  ;;  %v4372_v13 = vmov 1326507024  }
  0x5e   :  { %4195 = vpow2.f32 %v4069_v15  ;;  %v4072_v34 = vmul.f32 -1.442695, %v43_v23 }
  0x60   :  { %4197 = vpow2.f32 %v4072_v34 }
  0x61   :  { %4199 = vpow2.f32 %v4071_v37 }
  0x62   :  { %4201 = vpow2.f32 %v4074_v40 }
  0x68   :  { %v4190_v16 = vpop.eup %4189 }
  0x69   :  { %v4192_v17 = vpop.eup %4191  ;;  %v95_v18 = vmul.f32 0.23204589, %v4190_v16 }
  0x6a   :  { %v4194_v19 = vpop.eup %4193  ;;  %v97_v20 = vmul.f32 0.23204589, %v4192_v17 }
  0x6b   :  { %v4396_v21 = vadd.f32 1.4547731, %v95_v18  ;;  %v94_v26 = vmul.f32 0.23204589, %v4194_v19  ;;  %v4196_v31 = vpop.eup %4195 }
  0x6c   :  { %v4398_v22 = vadd.f32 1.4547731, %v97_v20  ;;  %v72_v42 = vadd.f32 1.0, %v4196_v31 }
  0x6d   :  { %v214_v24 = vand.u32 2147483647, %v4396_v21  ;;  %v217_v25 = vand.u32 2139095040, %v4396_v21  ;;  %v4408_v39 = vadd.f32 1.4547731, %v94_v26  ;;  %v4198_v30 = vpop.eup %4197  ;;  %vm216_vm13 = vcmp.lt.s32.totalorder %v4396_v21, 0 }
  0x6e   :  { %v422_v28 = vand.u32 2147483647, %v4398_v22  ;;  %v425_v29 = vand.u32 2139095040, %v4398_v22  ;;  %4203 = vrcp.f32 %v72_v42 }
  0x6f   :  { %v218_v32 = vshrl.u32 %v217_v25, 23  ;;  %v221_v33 = vand.u32 8388607, %v214_v24  ;;  %v113_v48 = vand.u32 2139095040, %v4408_v39  ;;  %v110_v59 = vand.u32 2147483647, %v4408_v39 }
  0x70   :  { %v426_v35 = vshrl.u32 %v425_v29, 23  ;;  %v429_v36 = vand.u32 8388607, %v422_v28  ;;  %4205 = vpow2.f32 %v4411_v49 }
  0x71   :  { %v4079_v38 = vadd.s32 4294967169, %v218_v32  ;;  %v222_v44 = vor.u32 8388608, %v221_v33  ;;  %v114_v51 = vshrl.u32 %v113_v48, 23 }
  0x72   :  { %v4087_v41 = vadd.s32 4294967169, %v426_v35  ;;  %v430_v46 = vor.u32 8388608, %v429_v36  ;;  %v4200_v35 = vpop.eup %4199 }
  0x73   :  { %v224_v45 = vadd.s32 1, %v4079_v38  ;;  %v4413_v54 = vshll.u32 %v222_v44, 8  ;;  %v4427_v7 = vadd.s32 4294967169, %v114_v51 }
  0x74   :  { %v432_v47 = vadd.s32 1, %v4087_v41  ;;  %v4419_v58 = vshll.u32 %v430_v46, 8  ;;  %v4202_v41 = vpop.eup %4201 }
  0x75   :  { %vm225_vm0 = vcmp.gt.s32.totalorder %v224_v45, 0 }
  0x76   :  { %v226_v50 = vsel %vm225_vm0, %v224_v45, 0  ;;  %vm433_vm1 = vcmp.gt.s32.totalorder %v432_v47, 0 }
  0x77   :  { %v227_v52 = vshrl.u32 %v226_v50, 5  ;;  %v228_v53 = vand.u32 31, %v226_v50  ;;  %v434_v55 = vsel %vm433_vm1, %v432_v47, 0 }
  0x78   :  { %v4415_v56 = vshrl.u32 %v434_v55, 5  ;;  %v4417_v57 = vand.u32 31, %v434_v55 }
  0x79   :  { %v229_v60 = vsub.s32 32, %v228_v53  ;;  %v231_v62 = vshll.u32 %v4367_v61, %v228_v53  ;;  %v234_v0 = vshll.u32 %v4368_v63, %v228_v53  ;;  %v237_v2 = vshll.u32 %v4369_v1, %v228_v53 }
  0x7a   :  { %v240_v4 = vshll.u32 %v4370_v3, %v228_v53  ;;  %v243_v6 = vshll.u32 %v4371_v5, %v228_v53  ;;  %vm246_vm2 = vcmp.lt.s32.totalorder %v227_v52, 1  ;;  %vm247_vm3 = vcmp.lt.s32.totalorder %v227_v52, 2 }
  0x7b   :  { %v230_v8 = vshrl.u32 %v4367_v61, %v229_v60  ;;  %v232_v9 = vshrl.u32 %v4368_v63, %v229_v60  ;;  %v235_v10 = vshrl.u32 %v4369_v1, %v229_v60  ;;  %v238_v11 = vshrl.u32 %v4370_v3, %v229_v60  ;;  %v4204_v46 = vpop.eup %4203 }
  0x7c   :  { %v241_v12 = vshrl.u32 %v4371_v5, %v229_v60  ;;  %v244_v14 = vshrl.u32 %v4372_v13, %v229_v60  ;;  %vm249_vm4 = vcmp.lt.s32.totalorder %v227_v52, 4  ;;  %v437_v18 = vsub.s32 32, %v4417_v57 }
  0x7d   :  { %v233_v15 = vor.u32 %v232_v9, %v231_v62  ;;  %v236_v16 = vor.u32 %v235_v10, %v234_v0  ;;  %v239_v17 = vor.u32 %v238_v11, %v237_v2  ;;  %vm248_vm5 = vcmp.lt.s32.totalorder %v227_v52, 3 }
  0x7e   :  { %v242_v19 = vor.u32 %v241_v12, %v240_v4  ;;  %v245_v20 = vor.u32 %v244_v14, %v243_v6  ;;  %v439_v23 = vshll.u32 %v4367_v61, %v4417_v57  ;;  %v442_v34 = vshll.u32 %v4368_v63, %v4417_v57 }
  0x7f   :  { %v250_v25 = vsel %vm246_vm2, %v230_v8, %v233_v15  ;;  %v251_v26 = vsel %vm249_vm4, %v239_v17, 2102212464  ;;  %v254_v27 = vsel %vm246_vm2, %v233_v15, %v236_v16  ;;  %v258_v29 = vsel %vm246_vm2, %v236_v16, %v239_v17 }
  0x80   :  { %v252_v31 = vsel %vm248_vm5, %v236_v16, %v251_v26  ;;  %v255_v32 = vsel %vm249_vm4, %v242_v19, 920167782  ;;  %v259_v33 = vsel %vm249_vm4, %v245_v20, 1326507024  ;;  %v438_v38 = vshrl.u32 %v4367_v61, %v437_v18 }
  0x81   :  { %v256_v36 = vsel %vm248_vm5, %v239_v17, %v255_v32  ;;  %v260_v37 = vsel %vm248_vm5, %v242_v19, %v259_v33  ;;  %v440_v40 = vshrl.u32 %v4368_v63, %v437_v18  ;;  %v253_v42 = vsel %vm247_vm3, %v250_v25, %v252_v31 }
  0x82   :  { %v257_v43 = vsel %vm247_vm3, %v254_v27, %v256_v36  ;;  %v261_v44 = vsel %vm247_vm3, %v258_v29, %v260_v37  ;;  %v443_v45 = vshrl.u32 %v4369_v1, %v437_v18  ;;  %v445_v60 = vshll.u32 %v4369_v1, %v4417_v57 }
  0x83   :  { %v4453_v47 = vmul.u32.u64.low %v4413_v54, %v261_v44  ;;  %v4454_v48 = vmul.u32.u64.high %v4413_v54, %v261_v44, %v4453_v47  ;;  %v4457_v50 = vmul.u32.u64.low %v4413_v54, %v257_v43  ;;  %v4458_v51 = vmul.u32.u64.high %v4413_v54, %v257_v43, %v4457_v50 }
  0x84   :  { %v441_v53 = vor.u32 %v440_v40, %v439_v23  ;;  %v444_v55 = vor.u32 %v443_v45, %v442_v34  ;;  %v446_v52 = vshrl.u32 %v4370_v3, %v437_v18  ;;  %v448_v62 = vshll.u32 %v4370_v3, %v4417_v57 }
  0x85   :  { %v449_v0 = vshrl.u32 %v4371_v5, %v437_v18  ;;  %v451_v2 = vshll.u32 %v4371_v5, %v4417_v57  ;;  %v452_v4 = vshrl.u32 %v4372_v13, %v437_v18  ;;  %v269_v6 = vmul.u32 %v4413_v54, %v253_v42 }
  0x86   :  { %v447_v8 = vor.u32 %v446_v52, %v445_v60  ;;  %vm454_vm6 = vcmp.lt.s32.totalorder %v4415_v56, 1  ;;  %vm455_vm7 = vcmp.lt.s32.totalorder %v4415_v56, 2  ;;  %vm271_vm8 = vc.u32 %v4454_v48, %v4457_v50 }
  0x87   :  { %v272_v9 = vadd.s32 1, %v4458_v51  ;;  %v450_v10 = vor.u32 %v449_v0, %v448_v62  ;;  %vm456_vm9 = vcmp.lt.s32.totalorder %v4415_v56, 3  ;;  %v453_v11 = vor.u32 %v452_v4, %v451_v2 }
  0x88   :  { %vm457_vm10 = vcmp.lt.s32.totalorder %v4415_v56, 4  ;;  %v458_v57 = vsel %vm454_vm6, %v438_v38, %v441_v53  ;;  %v462_v12 = vsel %vm454_vm6, %v441_v53, %v444_v55  ;;  %v466_v16 = vsel %vm454_vm6, %v444_v55, %v447_v8 }
  0x89   :  { %v273_v54 = vsel %vm271_vm8, %v272_v9, %v4458_v51  ;;  %v459_v14 = vsel %vm457_vm10, %v447_v8, 2102212464  ;;  %v463_v15 = vsel %vm457_vm10, %v450_v10, 920167782  ;;  %v467_v20 = vsel %vm457_vm10, %v453_v11, 1326507024 }
  0x8a   :  { %v274_v17 = vadd.s32 %v273_v54, %v269_v6  ;;  %v460_v18 = vsel %vm456_vm9, %v444_v55, %v459_v14  ;;  %v464_v19 = vsel %vm456_vm9, %v447_v8, %v463_v15  ;;  %v468_v26 = vsel %vm456_vm9, %v450_v10, %v467_v20 }
  0x8b   :  { %v461_v23 = vsel %vm455_vm7, %v458_v57, %v460_v18  ;;  %v465_v25 = vsel %vm455_vm7, %v462_v12, %v464_v19  ;;  %v120_v27 = vadd.s32 1, %v4427_v7  ;;  %v469_v31 = vsel %vm455_vm7, %v466_v16, %v468_v26 }
  0x8c   :  { %v275_v29 = vadd.s32 536870912, %v274_v17  ;;  %v4487_v32 = vmul.u32.u64.low %v4419_v58, %v465_v25  ;;  %v4488_v33 = vmul.u32.u64.high %v4419_v58, %v465_v25, %v4487_v32  ;;  %v75_v37 = vadd.f32 1.0, %v4198_v30 }
  0x8d   :  { %v4492_v34 = vmul.u32.u64.low %v4419_v58, %v469_v31  ;;  %v4493_v36 = vmul.u32.u64.high %v4419_v58, %v469_v31, %v4492_v34  ;;  %vm121_vm11 = vcmp.gt.s32.totalorder %v120_v27, 0  ;;  %v74_v42 = vadd.f32 1.0, %v4200_v35 }
  0x8e   :  { %v4495_v38 = vshrl.u32 %v275_v29, 30  ;;  %v122_v40 = vsel %vm121_vm11, %v120_v27, 0  ;;  %v477_v7 = vmul.u32 %v4419_v58, %v461_v23  ;;  %v96_v56 = vmul.f32 0.23204589, %v4204_v46 }
  0x8f   :  { %v124_v43 = vand.u32 31, %v122_v40  ;;  %v77_v44 = vadd.f32 1.0, %v4202_v41  ;;  %v480_v47 = vadd.s32 1, %v4488_v33  ;;  %v117_v51 = vand.u32 8388607, %v110_v59 }
  0x90   :  { %v277_v45 = vshll.u32 %v4495_v38, 30  ;;  %vm479_vm12 = vc.u32 %v4493_v36, %v4487_v32  ;;  %4207 = vrcp.f32 %v75_v37  ;;  %v4508_v46 = vadd.f32 1.4547731, %v96_v56 }
  0x91   :  { %v125_v30 = vsub.s32 32, %v124_v43  ;;  %v481_v58 = vsel %vm479_vm12, %v480_v47, %v4488_v33  ;;  %4209 = vrcp.f32 %v74_v42  ;;  %v118_v55 = vor.u32 8388608, %v117_v51 }
  0x92   :  { %v4505_v35 = vsub.s32 %v274_v17, %v277_v45  ;;  %v482_v41 = vadd.s32 %v481_v58, %v477_v7  ;;  %4211 = vrcp.f32 %v77_v44  ;;  %v4511_v60 = vshrl.u32 %v122_v40, 5 }
  0x93   :  { %v127_v49 = vshll.u32 %v4367_v61, %v124_v43  ;;  %v128_v62 = vshrl.u32 %v4368_v63, %v125_v30  ;;  %v130_v0 = vshll.u32 %v4368_v63, %v124_v43  ;;  %v131_v2 = vshrl.u32 %v4369_v1, %v125_v30 }
  0x94   :  { %v280_v53 = vsub.s32 0, %v4505_v35  ;;  %v483_v52 = vadd.s32 536870912, %v482_v41  ;;  %v133_v6 = vshll.u32 %v4369_v1, %v124_v43  ;;  %v134_v8 = vshrl.u32 %v4370_v3, %v125_v30 }
  0x95   :  { %v136_v9 = vshll.u32 %v4370_v3, %v124_v43  ;;  %v137_v11 = vshrl.u32 %v4371_v5, %v125_v30  ;;  %v139_v57 = vshll.u32 %v4371_v5, %v124_v43  ;;  %v140_v12 = vshrl.u32 %v4372_v13, %v125_v30 }
  0x96   :  { %v4080_v4 = vmin.u32 %v280_v53, %v4505_v35  ;;  %v4521_v10 = vshrl.u32 %v483_v52, 30  ;;  %v270_v54 = vadd.s32 %v4457_v50, %v4454_v48  ;;  %v4529_v15 = vshll.u32 %v118_v55, 8  ;;  %v4542_v50 = vpop.eup %4205 }
  0x97   :  { %v300_v16 = vsub.s32 4, %v4495_v38  ;;  %v126_v18 = vshrl.u32 %v4367_v61, %v125_v30  ;;  %v321_v19 = vand.u32 2139095040, %v4508_v46  ;;  %v129_v23 = vor.u32 %v128_v62, %v127_v49 }
  0x98   :  { %v282_v14 = vclz %v4080_v4  ;;  %v485_v17 = vshll.u32 %v4521_v10, 30  ;;  %v132_v25 = vor.u32 %v131_v2, %v130_v0  ;;  %v135_v26 = vor.u32 %v134_v8, %v133_v6 }
  0x99   :  { %v138_v29 = vor.u32 %v137_v11, %v136_v9  ;;  %v141_v31 = vor.u32 %v140_v12, %v139_v57  ;;  %vm145_vm14 = vcmp.lt.s32.totalorder %v4511_v60, 4  ;;  %vm142_vm0 = vcmp.lt.s32.totalorder %v4511_v60, 1 }
  0x9a   :  { %v4081_v20 = vadd.s32 4294967294, %v282_v14  ;;  %v4535_v27 = vsub.s32 %v482_v41, %v485_v17  ;;  %vm143_vm1 = vcmp.lt.s32.totalorder %v4511_v60, 2  ;;  %v147_v48 = vsel %vm145_vm14, %v135_v26, 2102212464 }
  0x9b   :  { %vm144_vm2 = vcmp.lt.s32.totalorder %v4511_v60, 3  ;;  %v146_v37 = vsel %vm142_vm0, %v126_v18, %v129_v23  ;;  %v150_v47 = vsel %vm142_vm0, %v129_v23, %v132_v25  ;;  %v151_v51 = vsel %vm145_vm14, %v138_v29, 920167782 }
  0x9c   :  { %vm4082_vm15 = vcmp.lt.s32.totalorder %v4081_v20, 0  ;;  %v488_v34 = vsub.s32 0, %v4535_v27  ;;  %v148_v56 = vsel %vm144_vm2, %v132_v25, %v147_v48  ;;  %v154_v30 = vsel %vm142_vm0, %v132_v25, %v135_v26 }
  0x9d   :  { %v285_v33 = vsel %vm4082_vm15, 0, %v4081_v20  ;;  %v4208_v40 = vpop.eup %4207  ;;  %v152_v53 = vsel %vm144_vm2, %v135_v26, %v151_v51  ;;  %v155_v55 = vsel %vm145_vm14, %v141_v31, 1326507024  ;;  %v301_v49 = vsel %vm216_vm13, %v300_v16, %v4495_v38 }
  0x9e   :  { %v286_v42 = vsub.s32 32, %v285_v33  ;;  %v287_v7 = vshll.u32 %v4505_v35, %v285_v33  ;;  %v290_v43 = vsub.s32 4294967266, %v285_v33  ;;  %v4210_v44 = vpop.eup %4209  ;;  %v4088_v45 = vmin.u32 %v488_v34, %v4535_v27 }
  0x9f   :  { %v4558_v58 = vpop.eup %4211  ;;  %v149_v62 = vsel %vm143_vm1, %v146_v37, %v148_v56  ;;  %v322_v0 = vshrl.u32 %v321_v19, 23  ;;  %v153_v6 = vsel %vm143_vm1, %v150_v47, %v152_v53  ;;  %v156_v8 = vsel %vm144_vm2, %v138_v29, %v155_v55 }
  0xa0   :  { %v288_v41 = vshrl.u32 %v270_v54, %v286_v42  ;;  %v291_v35 = vadd.s32 127, %v290_v43  ;;  %v490_v52 = vclz %v4088_v45  ;;  %vm424_vm3 = vcmp.lt.s32.totalorder %v4398_v22, 0 }
  0xa1   :  { %v157_v11 = vsel %vm143_vm1, %v154_v30, %v156_v8  ;;  %v4577_v38 = vmul.u32.u64.low %v4529_v15, %v153_v6  ;;  %v4578_v57 = vmul.u32.u64.high %v4529_v15, %v153_v6, %v4577_v38  ;;  %vm4587_vm4 = vcmp.le.f32.partialorder %v214_v24, 0.7853982 }
  0xa2   :  { %v289_v2 = vor.u32 %v288_v41, %v287_v7  ;;  %v292_v4 = vshll.u32 %v291_v35, 23  ;;  %v4089_v9 = vadd.s32 4294967294, %v490_v52  ;;  %v478_v60 = vadd.s32 %v4487_v32, %v4493_v36 }
  0xa3   :  { %v4582_v14 = vmul.u32.u64.low %v4529_v15, %v157_v11  ;;  %v4583_v16 = vmul.u32.u64.high %v4529_v15, %v157_v11, %v4582_v14  ;;  %v4083_v18 = vadd.s32 4294967169, %v322_v0  ;;  %v4595_v20 = vsel %vm4587_vm4, 0, %v301_v49 }
  0xa4   :  { %v293_v12 = vor.u32 4788187, %v292_v4  ;;  %v296_v54 = vcvt.s32.f32 %v289_v2  ;;  %vm4090_vm5 = vcmp.lt.s32.totalorder %v4089_v9, 0  ;;  %vm4599_vm6 = vcmp.le.f32.partialorder %v422_v28, 0.7853982 }
  0xa5   :  { %v493_v24 = vsel %vm4090_vm5, 0, %v4089_v9  ;;  %v165_v25 = vmul.u32 %v4529_v15, %v149_v62  ;;  %v168_v36 = vadd.s32 1, %v4578_v57  ;;  %v508_v48 = vsub.s32 4, %v4521_v10 }
  0xa6   :  { %v294_v19 = vand.u32 2147483647, %v293_v12  ;;  %v494_v26 = vsub.s32 32, %v493_v24  ;;  %v495_v29 = vshll.u32 %v4535_v27, %v493_v24  ;;  %v498_v32 = vsub.s32 4294967266, %v493_v24 }
  0xa7   :  { %vm167_vm7 = vc.u32 %v4583_v16, %v4577_v38  ;;  %v328_v33 = vadd.s32 1, %v4083_v18  ;;  %v4610_v42 = vmul.f32 0.23204589, %v4208_v40  ;;  %v318_v27 = vand.u32 2147483647, %v4508_v46 }
  0xa8   :  { %v297_v31 = vmul.f32 %v296_v54, %v294_v19  ;;  %v496_v28 = vshrl.u32 %v478_v60, %v494_v26  ;;  %v499_v34 = vadd.s32 127, %v498_v32  ;;  %v169_v37 = vsel %vm167_vm7, %v168_v36, %v4578_v57 }
  0xa9   :  { %v170_v7 = vadd.s32 %v169_v37, %v165_v25  ;;  %vm329_vm8 = vcmp.gt.s32.totalorder %v328_v33, 0  ;;  %v307_v43 = vadd.s32 3, %v4595_v20  ;;  %v509_v30 = vsel %vm424_vm3, %v508_v48, %v4521_v10 }
  0xaa   :  { %v298_v15 = vxor.u32 2147483648, %v297_v31  ;;  %v497_v56 = vor.u32 %v496_v28, %v495_v29  ;;  %v500_v45 = vshll.u32 %v499_v34, 23  ;;  %v330_v47 = vsel %vm329_vm8, %v328_v33, 0 }
  0xab   :  { %v171_v41 = vadd.s32 536870912, %v170_v7  ;;  %v332_v40 = vand.u32 31, %v330_v47  ;;  %v4622_v49 = vmul.f32 0.23204589, %v4210_v44  ;;  %v325_v62 = vand.u32 8388607, %v318_v27 }
  0xac   :  { %v299_v51 = vsel %vm216_vm13, %v298_v15, %v297_v31  ;;  %v501_v53 = vor.u32 4788187, %v500_v45  ;;  %v504_v55 = vcvt.s32.f32 %v497_v56  ;;  %v4628_v2 = vand.u32 3, %v307_v43 }
  0xad   :  { %v302_v35 = vsel %vm4587_vm4, %v4396_v21, %v299_v51  ;;  %v4624_v52 = vshrl.u32 %v171_v41, 30  ;;  %v333_v0 = vsub.s32 32, %v332_v40  ;;  %v4632_v4 = vsel %vm4599_vm6, 0, %v509_v30 }
  0xae   :  { %4213 = vcosq.f32 %v302_v35  ;;  %v502_v10 = vand.u32 2147483647, %v501_v53  ;;  %v4635_v8 = vshrl.u32 %v330_v47, 5  ;;  %v335_v44 = vshll.u32 %v4367_v61, %v332_v40 }
  0xaf   :  { %4215 = vsinq.f32 %v302_v35  ;;  %v173_v6 = vshll.u32 %v4624_v52, 30  ;;  %v336_v9 = vshrl.u32 %v4368_v63, %v333_v0  ;;  %v338_v57 = vshll.u32 %v4368_v63, %v332_v40 }
  0xb0   :  { %v505_v11 = vmul.f32 %v504_v55, %v502_v10  ;;  %v339_v12 = vshrl.u32 %v4369_v1, %v333_v0  ;;  %v344_v54 = vshll.u32 %v4370_v3, %v332_v40  ;;  %v341_v17 = vshll.u32 %v4369_v1, %v332_v40 }
  0xb1   :  { %v4642_v14 = vsub.s32 %v170_v7, %v173_v6  ;;  %v342_v60 = vshrl.u32 %v4370_v3, %v333_v0  ;;  %v345_v18 = vshrl.u32 %v4371_v5, %v333_v0  ;;  %vm313_vm9 = vcmp.eq.s32.totalorder %v4628_v2, 2 }
  0xb2   :  { %v506_v19 = vxor.u32 2147483648, %v505_v11  ;;  %v515_v24 = vadd.s32 3, %v4632_v4  ;;  %v326_v25 = vor.u32 8388608, %v325_v62  ;;  %vm310_vm10 = vcmp.eq.s32.totalorder %v4628_v2, 0 }
  0xb3   :  { %v176_v26 = vsub.s32 0, %v4642_v14  ;;  %v334_v29 = vshrl.u32 %v4367_v61, %v333_v0  ;;  %v337_v32 = vor.u32 %v336_v9, %v335_v44  ;;  %v347_v36 = vshll.u32 %v4371_v5, %v332_v40 }
  0xb4   :  { %vm309_vm11 = vcmp.lt.s32.totalorder %v4628_v2, 2  ;;  %v507_v31 = vsel %vm424_vm3, %v506_v19, %v505_v11  ;;  %v340_v48 = vor.u32 %v339_v12, %v338_v57  ;;  %v346_v33 = vor.u32 %v345_v18, %v344_v54 }
  0xb5   :  { %v348_v28 = vshrl.u32 %v4372_v13, %v333_v0  ;;  %vm306_vm12 = vweird.f32 %v4396_v21  ;;  %v510_v34 = vsel %vm4599_vm6, %v4398_v22, %v507_v31  ;;  %v4076_v37 = vmin.u32 %v176_v26, %v4642_v14  ;;  %v2339_v21 = vld [vmem:[#allocation5 + $0xfe8] sm:$0xff] }
  0xb6   :  { %v343_v15 = vor.u32 %v342_v60, %v341_v17  ;;  %vm350_vm13 = vcmp.lt.s32.totalorder %v4635_v8, 1  ;;  %4217 = vcosq.f32 %v510_v34  ;;  %vm352_vm14 = vcmp.lt.s32.totalorder %v4635_v8, 3 }
  0xb7   :  { %v349_v7 = vor.u32 %v348_v28, %v347_v36  ;;  %vm353_vm15 = vcmp.lt.s32.totalorder %v4635_v8, 4  ;;  %4219 = vsinq.f32 %v510_v34  ;;  %v4665_v43 = vand.u32 3, %v515_v24 }
  0xb8   :  { %v166_v56 = vadd.s32 %v4577_v38, %v4583_v16  ;;  %v178_v45 = vclz %v4076_v37  ;;  %vm351_vm0 = vcmp.lt.s32.totalorder %v4635_v8, 2  ;;  %v355_v23 = vsel %vm353_vm15, %v343_v15, 2102212464 }
  0xb9   :  { %v359_v47 = vsel %vm353_vm15, %v346_v33, 920167782  ;;  %v4674_v51 = vshll.u32 %v326_v25, 8  ;;  %vm112_vm1 = vcmp.lt.s32.totalorder %v4408_v39, 0  ;;  %v358_v41 = vsel %vm350_vm13, %v337_v32, %v340_v48 }
  0xba   :  { %v4077_v30 = vadd.s32 4294967294, %v178_v45  ;;  %v360_v38 = vsel %vm352_vm14, %v343_v15, %v359_v47  ;;  %v362_v16 = vsel %vm350_vm13, %v340_v48, %v343_v15  ;;  %v196_v35 = vsub.s32 4, %v4624_v52 }
  0xbb   :  { %v4683_v40 = vpop.eup %4213  ;;  %v354_v53 = vsel %vm350_vm13, %v334_v29, %v337_v32  ;;  %v363_v55 = vsel %vm353_vm15, %v349_v7, 1326507024  ;;  %v4691_v62 = vadd.f32 1.4547731, %v4610_v42  ;;  %v356_v6 = vsel %vm352_vm14, %v340_v48, %v355_v23 }
  0xbc   :  { %v4693_v0 = vpop.eup %4215  ;;  %v5468_v10 = vxor.u32 2147483648, %v4683_v40  ;;  %vm4078_vm2 = vcmp.lt.s32.totalorder %v4077_v30, 0  ;;  %v364_v44 = vsel %vm352_vm14, %v346_v33, %v363_v55  ;;  %v361_v57 = vsel %vm351_vm0, %v358_v41, %v360_v38 }
  0xbd   :  { %v5469_v9 = vxor.u32 2147483648, %v4693_v0  ;;  %v181_v11 = vsel %vm4078_vm2, 0, %v4077_v30  ;;  %v365_v42 = vsel %vm351_vm0, %v362_v16, %v364_v44  ;;  %vm4712_vm3 = vcmp.le.f32.partialorder %v110_v59, 0.7853982 }
  0xbe   :  { %v315_v12 = vsel %vm313_vm9, %v5468_v10, %v4693_v0  ;;  %v182_v17 = vsub.s32 32, %v181_v11  ;;  %v183_v60 = vshll.u32 %v4642_v14, %v181_v11  ;;  %v186_v18 = vsub.s32 4294967266, %v181_v11 }
  0xbf   :  { %v312_v19 = vsel %vm310_vm10, %v4683_v40, %v5469_v9  ;;  %vm514_vm4 = vweird.f32 %v4398_v22  ;;  %v4724_v24 = vmul.u32.u64.low %v4674_v51, %v365_v42  ;;  %v4725_v25 = vmul.u32.u64.high %v4674_v51, %v365_v42, %v4724_v24  ;;  %v2341_v22 = vld [vmem:[#allocation5 + $0xff8] sm:$0xff] }
  0xc0   :  { %v633_v59 = vand.u32 2139095040, %v4691_v62  ;;  %v316_v26 = vsel %vm309_vm11, %v312_v19, %v315_v12  ;;  %v184_v29 = vshrl.u32 %v166_v56, %v182_v17  ;;  %v187_v14 = vadd.s32 127, %v186_v18 }
  0xc1   :  { %v357_v32 = vsel %vm351_vm0, %v354_v53, %v356_v6  ;;  %v317_v36 = vsel %vm306_vm12, nan, %v316_v26  ;;  %v4735_v31 = vmul.u32.u64.low %v4674_v51, %v361_v57  ;;  %v4736_v48 = vmul.u32.u64.high %v4674_v51, %v361_v57, %v4735_v31 }
  0xc2   :  { %v634_v33 = vshrl.u32 %v633_v59, 23  ;;  %v1767_v28 = vand.u32 2147483647, %v317_v36  ;;  %vm517_vm5 = vcmp.lt.s32.totalorder %v4665_v43, 2  ;;  %v185_v34 = vor.u32 %v184_v29, %v183_v60 }
  0xc3   :  { %v188_v2 = vshll.u32 %v187_v14, 23  ;;  %vm521_vm6 = vcmp.eq.s32.totalorder %v4665_v43, 2  ;;  %v197_v8 = vsel %vm112_vm1, %v196_v35, %v4624_v52  ;;  %v373_v37 = vmul.u32 %v4674_v51, %v357_v32  ;;  %v4745_v7 = vpop.eup %4217 }
  0xc4   :  { %v4095_v15 = vadd.s32 4294967169, %v634_v33  ;;  %v1775_v56 = vadd.f32 1e-06, %v1767_v28  ;;  %v192_v23 = vcvt.s32.f32 %v185_v34  ;;  %vm375_vm7 = vc.u32 %v4725_v25, %v4735_v31  ;;  %v4749_v47 = vpop.eup %4219 }
  0xc5   :  { %v189_v45 = vor.u32 4788187, %v188_v2  ;;  %vm518_vm8 = vcmp.eq.s32.totalorder %v4665_v43, 0  ;;  %v5464_v30 = vxor.u32 2147483648, %v4745_v7  ;;  %v376_v41 = vadd.s32 1, %v4736_v48 }
  0xc6   :  { %v640_v52 = vadd.s32 1, %v4095_v15  ;;  %4221 = vlog2.f32 %v1775_v56  ;;  %v5465_v51 = vxor.u32 2147483648, %v4749_v47  ;;  %v630_v16 = vand.u32 2147483647, %v4691_v62 }
  0xc7   :  { %v190_v38 = vand.u32 2147483647, %v189_v45  ;;  %v523_v35 = vsel %vm521_vm6, %v5464_v30, %v4749_v47  ;;  %v4763_v53 = vsel %vm4712_vm3, 0, %v197_v8  ;;  %v377_v55 = vsel %vm375_vm7, %v376_v41, %v4736_v48  ;;  %v2422_v30 = vld [vmem:[#allocation5 + $0x1280] sm:$0xff] }
  0xc8   :  { %vm641_vm9 = vcmp.gt.s32.totalorder %v640_v52, 0  ;;  %v520_v6 = vsel %vm518_vm8, %v4745_v7, %v5465_v51  ;;  %v378_v11 = vadd.s32 %v377_v55, %v373_v37  ;;  %v4772_v17 = vadd.f32 1.4547731, %v4622_v49 }
  0xc9   :  { %v193_v44 = vmul.f32 %v192_v23, %v190_v38  ;;  %v642_v57 = vsel %vm641_vm9, %v640_v52, 0  ;;  %v524_v42 = vsel %vm517_vm5, %v520_v6, %v523_v35  ;;  %v4775_v60 = vadd.f32 1.0, %v4542_v50 }
  0xca   :  { %v644_v12 = vand.u32 31, %v642_v57  ;;  %v525_v18 = vsel %vm514_vm4, nan, %v524_v42  ;;  %v203_v24 = vadd.s32 3, %v4763_v53  ;;  %v379_v59 = vadd.s32 536870912, %v378_v11 }
  0xcb   :  { %v194_v19 = vxor.u32 2147483648, %v193_v44  ;;  %v1769_v26 = vand.u32 2147483647, %v525_v18  ;;  %v637_v29 = vand.u32 8388607, %v630_v16  ;;  %v643_v43 = vshrl.u32 %v642_v57, 5 }
  0xcc   :  { %v645_v14 = vsub.s32 32, %v644_v12  ;;  %v4784_v32 = vshrl.u32 %v379_v59, 30  ;;  %v647_v50 = vshll.u32 %v4367_v61, %v644_v12  ;;  %v650_v36 = vshll.u32 %v4368_v63, %v644_v12 }
  0xcd   :  { %v195_v49 = vsel %vm112_vm1, %v194_v19, %v193_v44  ;;  %v1777_v48 = vadd.f32 1e-06, %v1769_v26  ;;  %v656_v34 = vshll.u32 %v4370_v3, %v644_v12  ;;  %v653_v37 = vshll.u32 %v4369_v1, %v644_v12 }
  0xce   :  { %v198_v33 = vsel %vm4712_vm3, %v4408_v39, %v195_v49  ;;  %v648_v28 = vshrl.u32 %v4368_v63, %v645_v14  ;;  %v381_v2 = vshll.u32 %v4784_v32, 30  ;;  %v651_v8 = vshrl.u32 %v4369_v1, %v645_v14 }
  0xcf   :  { %4223 = vcosq.f32 %v198_v33  ;;  %v638_v15 = vor.u32 8388608, %v637_v29  ;;  %v654_v56 = vshrl.u32 %v4370_v3, %v645_v14  ;;  %v657_v45 = vshrl.u32 %v4371_v5, %v645_v14 }
  0xd0   :  { %4225 = vlog2.f32 %v1777_v48  ;;  %v4798_v54 = vand.u32 3, %v203_v24  ;;  %v4800_v23 = vsub.s32 %v378_v11, %v381_v2  ;;  %v646_v41 = vshrl.u32 %v4367_v61, %v645_v14 }
  0xd1   :  { %4227 = vsinq.f32 %v198_v33  ;;  %v649_v52 = vor.u32 %v648_v28, %v647_v50  ;;  %v652_v38 = vor.u32 %v651_v8, %v650_v36  ;;  %v658_v35 = vor.u32 %v657_v45, %v656_v34 }
  0xd2   :  { %v659_v55 = vshll.u32 %v4371_v5, %v644_v12  ;;  %v384_v6 = vsub.s32 0, %v4800_v23  ;;  %v655_v44 = vor.u32 %v654_v56, %v653_v37  ;;  %v660_v57 = vshrl.u32 %v4372_v13, %v645_v14 }
  0xd3   :  { %vm662_vm10 = vcmp.lt.s32.totalorder %v643_v43, 1  ;;  %v4222_v42 = vpop.eup %4221  ;;  %vm663_vm11 = vcmp.lt.s32.totalorder %v643_v43, 2  ;;  %vm665_vm13 = vcmp.lt.s32.totalorder %v643_v43, 4  ;;  %v4806_v18 = vshll.u32 %v638_v15, 8 }
  0xd4   :  { %v529_v11 = vand.u32 2139095040, %v4772_v17  ;;  %v4809_v19 = vmul.f32 0.6931472, %v4222_v42  ;;  %v4084_v24 = vmin.u32 %v384_v6, %v4800_v23  ;;  %v661_v59 = vor.u32 %v660_v57, %v659_v55 }
  0xd5   :  { %vm664_vm14 = vcmp.lt.s32.totalorder %v643_v43, 3  ;;  %v666_v12 = vsel %vm662_vm10, %v646_v41, %v649_v52  ;;  %v667_v26 = vsel %vm665_vm13, %v655_v44, 2102212464  ;;  %v670_v29 = vsel %vm662_vm10, %v649_v52, %v652_v38 }
  0xd6   :  { %v671_v14 = vsel %vm665_vm13, %v658_v35, 920167782  ;;  %2918 = vmatprep.mubr.f32.mxu0 %v4809_v19  ;;  %vm205_vm15 = vcmp.lt.s32.totalorder %v4798_v54, 2  ;;  %vm206_vm0 = vcmp.eq.s32.totalorder %v4798_v54, 0  ;;  %v374_v49 = vadd.s32 %v4735_v31, %v4725_v25 }
  0xd7   :  { %v386_v50 = vclz %v4084_v24  ;;  %v674_v36 = vsel %vm662_vm10, %v652_v38, %v655_v44  ;;  %v668_v48 = vsel %vm664_vm14, %v652_v38, %v667_v26  ;;  %v672_v33 = vsel %vm664_vm14, %v655_v44, %v671_v14 }
  0xd8   :  { %v675_v28 = vsel %vm665_vm13, %v661_v59, 1326507024  ;;  %v530_v34 = vshrl.u32 %v529_v11, 23  ;;  %v669_v8 = vsel %vm663_vm11, %v666_v12, %v668_v48  ;;  %v673_v37 = vsel %vm663_vm11, %v670_v29, %v672_v33 }
  0xd9   :  { %v4085_v2 = vadd.s32 4294967294, %v386_v50  ;;  %v676_v15 = vsel %vm664_vm14, %v658_v35, %v675_v28  ;;  %v4830_v25 = vmul.u32.u64.low %v4806_v18, %v673_v37  ;;  %v4831_v31 = vmul.u32.u64.high %v4806_v18, %v673_v37, %v4830_v25 }
  0xda   :  { %v677_v56 = vsel %vm663_vm11, %v674_v36, %v676_v15  ;;  %v526_v45 = vand.u32 2147483647, %v4772_v17  ;;  %v4091_v38 = vadd.s32 4294967169, %v530_v34  ;;  %vm209_vm2 = vcmp.eq.s32.totalorder %v4798_v54, 2 }
  0xdb   :  { %vm4086_vm1 = vcmp.lt.s32.totalorder %v4085_v2, 0  ;;  %v4836_v41 = vmul.u32.u64.low %v4806_v18, %v677_v56  ;;  %v4837_v52 = vmul.u32.u64.high %v4806_v18, %v677_v56, %v4836_v41  ;;  %v404_v43 = vsub.s32 4, %v4784_v32 }
  0xdc   :  { %v4839_v55 = vpop.eup %4223  ;;  %v389_v35 = vsel %vm4086_vm1, 0, %v4085_v2  ;;  %v685_v6 = vmul.u32 %v4806_v18, %v669_v8  ;;  %v688_v26 = vadd.s32 1, %v4831_v31  ;;  %v533_v29 = vand.u32 8388607, %v526_v45 }
  0xdd   :  { %v4226_v44 = vpop.eup %4225  ;;  %v5470_v57 = vxor.u32 2147483648, %v4839_v55  ;;  %v390_v42 = vsub.s32 32, %v389_v35  ;;  %v391_v11 = vshll.u32 %v4800_v23, %v389_v35  ;;  %v394_v24 = vsub.s32 4294967266, %v389_v35 }
  0xde   :  { %v4846_v59 = vpop.eup %4227  ;;  %v4848_v12 = vmul.f32 0.6931472, %v4226_v44  ;;  %v536_v14 = vadd.s32 1, %v4091_v38  ;;  %vm202_vm3 = vweird.f32 %v4408_v39  ;;  %vm320_vm5 = vcmp.lt.s32.totalorder %v4508_v46, 0 }
  0xdf   :  { %v5473_v50 = vxor.u32 2147483648, %v4846_v59  ;;  %v211_v18 = vsel %vm209_vm2, %v5470_v57, %v4846_v59  ;;  %v392_v23 = vshrl.u32 %v374_v49, %v390_v42  ;;  %v395_v36 = vadd.s32 127, %v394_v24 }
  0xe0   :  { %2989 = vmatprep.mubr.f32.mxu1 %v4848_v12  ;;  %vm687_vm6 = vc.u32 %v4837_v52, %v4830_v25  ;;  %vm537_vm7 = vcmp.gt.s32.totalorder %v536_v14, 0  ;;  %v405_v2 = vsel %vm320_vm5, %v404_v43, %v4784_v32  ;;  %v534_v38 = vor.u32 8388608, %v533_v29 }
  0xe1   :  { %v208_v48 = vsel %vm206_vm0, %v4839_v55, %v5473_v50  ;;  %v393_v33 = vor.u32 %v392_v23, %v391_v11  ;;  %v396_v28 = vshll.u32 %v395_v36, 23  ;;  %v689_v49 = vsel %vm687_vm6, %v688_v26, %v4831_v31  ;;  %v2670_v50 = vld [vmem:[#allocation5 + $0x1a40] sm:$0xff] }
  0xe2   :  { %v212_v34 = vsel %vm205_vm15, %v208_v48, %v211_v18  ;;  %v690_v8 = vadd.s32 %v689_v49, %v685_v6  ;;  %v538_v37 = vsel %vm537_vm7, %v536_v14, 0  ;;  %vm4879_vm8 = vcmp.le.f32.partialorder %v318_v27, 0.7853982 }
  0xe3   :  { %v213_v15 = vsel %vm202_vm3, nan, %v212_v34  ;;  %v397_v56 = vor.u32 4788187, %v396_v28  ;;  %v400_v41 = vcvt.s32.f32 %v393_v33  ;;  %v540_v44 = vand.u32 31, %v538_v37 }
  0xe4   :  { %v1766_v35 = vand.u32 2147483647, %v213_v15  ;;  %v691_v54 = vadd.s32 536870912, %v690_v8  ;;  %v4885_v32 = vsel %vm4879_vm8, 0, %v405_v2  ;;  %v101_v43 = vmul.f32 0.23204589, %v4558_v58 }
  0xe5   :  { %v398_v42 = vand.u32 2147483647, %v397_v56  ;;  %4229 = vrcp.f32 %v4775_v60  ;;  %v539_v24 = vshrl.u32 %v538_v37, 5  ;;  %v541_v26 = vsub.s32 32, %v540_v44 }
  0xe6   :  { %v1774_v6 = vadd.f32 1e-06, %v1766_v35  ;;  %v4889_v11 = vshrl.u32 %v691_v54, 30  ;;  %v543_v29 = vshll.u32 %v4367_v61, %v540_v44  ;;  %v546_v14 = vshll.u32 %v4368_v63, %v540_v44 }
  0xe7   :  { %v401_v27 = vmul.f32 %v400_v41, %v398_v42  ;;  %v4893_v18 = vshll.u32 %v534_v38, 8  ;;  %v549_v36 = vshll.u32 %v4369_v1, %v540_v44  ;;  %v552_v58 = vshll.u32 %v4370_v3, %v540_v44 }
  0xe8   :  { %4231 = vlog2.f32 %v1774_v6  ;;  %v693_v23 = vshll.u32 %v4889_v11, 30  ;;  %v544_v48 = vshrl.u32 %v4368_v63, %v541_v26  ;;  %v547_v33 = vshrl.u32 %v4369_v1, %v541_v26 }
  0xe9   :  { %v402_v60 = vxor.u32 2147483648, %v401_v27  ;;  %v550_v28 = vshrl.u32 %v4370_v3, %v541_v26  ;;  %v542_v34 = vshrl.u32 %v4367_v61, %v541_v26  ;;  %v553_v2 = vshrl.u32 %v4371_v5, %v541_v26 }
  0xea   :  { %v4901_v49 = vsub.s32 %v690_v8, %v693_v23  ;;  %vm558_vm9 = vcmp.lt.s32.totalorder %v539_v24, 1  ;;  %v545_v15 = vor.u32 %v544_v48, %v543_v29  ;;  %v548_v56 = vor.u32 %v547_v33, %v546_v14 }
  0xeb   :  { %v403_v37 = vsel %vm320_vm5, %v402_v60, %v401_v27  ;;  %v555_v41 = vshll.u32 %v4371_v5, %v540_v44  ;;  %v551_v8 = vor.u32 %v550_v28, %v549_v36  ;;  %vm559_vm10 = vcmp.lt.s32.totalorder %v539_v24, 2 }
  0xec   :  { %v406_v38 = vsel %vm4879_vm8, %v4508_v46, %v403_v37  ;;  %v696_v35 = vsub.s32 0, %v4901_v49  ;;  %v554_v54 = vor.u32 %v553_v2, %v552_v58  ;;  %v556_v42 = vshrl.u32 %v4372_v13, %v541_v26 }
  0xed   :  { %4233 = vcosq.f32 %v406_v38  ;;  %vm561_vm11 = vcmp.lt.s32.totalorder %v539_v24, 4  ;;  %vm560_vm13 = vcmp.lt.s32.totalorder %v539_v24, 3  ;;  %v562_v27 = vsel %vm558_vm9, %v542_v34, %v545_v15 }
  0xee   :  { %4235 = vsinq.f32 %v406_v38  ;;  %v4096_v6 = vmin.u32 %v696_v35, %v4901_v49  ;;  %v557_v44 = vor.u32 %v556_v42, %v555_v41  ;;  %v563_v29 = vsel %vm561_vm11, %v551_v8, 2102212464 }
  0xef   :  { %v566_v31 = vsel %vm558_vm9, %v545_v15, %v548_v56  ;;  %v567_v14 = vsel %vm561_vm11, %v554_v54, 920167782  ;;  %v411_v23 = vadd.s32 3, %v4885_v32  ;;  %vm632_vm14 = vcmp.lt.s32.totalorder %v4691_v62, 0 }
  0xf0   :  { %v698_v36 = vclz %v4096_v6  ;;  %v4920_v26 = vadd.f32 1.4547731, %v101_v43  ;;  %v564_v58 = vsel %vm560_vm13, %v548_v56, %v563_v29  ;;  %v568_v60 = vsel %vm560_vm13, %v551_v8, %v567_v14 }
  0xf1   :  { %v570_v48 = vsel %vm558_vm9, %v548_v56, %v551_v8  ;;  %v571_v33 = vsel %vm561_vm11, %v557_v44, 1326507024  ;;  %v565_v2 = vsel %vm559_vm10, %v562_v27, %v564_v58  ;;  %v569_v37 = vsel %vm559_vm10, %v566_v31, %v568_v60  ;;  %v2462_v31 = vld [vmem:[#allocation5 + $0x13c0] sm:$0xff] }
  0xf2   :  { %v4926_v28 = vpop.eup %4229  ;;  %v4097_v34 = vadd.s32 4294967294, %v698_v36  ;;  %v572_v15 = vsel %vm560_vm13, %v554_v54, %v571_v33  ;;  %v716_v43 = vsub.s32 4, %v4889_v11  ;;  %v686_v56 = vadd.s32 %v4830_v25, %v4837_v52  ;;  %v2455_v25 = vld [vmem:[#allocation5 + $0x1388] sm:$0xff] }
  0xf3   :  { %v573_v41 = vsel %vm559_vm10, %v570_v48, %v572_v15  ;;  %v4934_v38 = vmul.u32.u64.low %v4893_v18, %v569_v37  ;;  %v4935_v35 = vmul.u32.u64.high %v4893_v18, %v569_v37, %v4934_v38  ;;  %v412_v27 = vand.u32 3, %v411_v23 }
  0xf4   :  { %vm4098_vm15 = vcmp.lt.s32.totalorder %v4097_v34, 0  ;;  %v4941_v8 = vmul.u32.u64.low %v4893_v18, %v573_v41  ;;  %v4942_v42 = vmul.u32.u64.high %v4893_v18, %v573_v41, %v4941_v8  ;;  %v581_v44 = vmul.u32 %v4893_v18, %v565_v2  ;;  %v2454_v18 = vld [vmem:[#allocation5 + $0x1380] sm:$0xff] }
  0xf5   :  { %v4232_v6 = vpop.eup %4231  ;;  %v701_v54 = vsel %vm4098_vm15, 0, %v4097_v34  ;;  %v841_v24 = vand.u32 2139095040, %v4920_v26  ;;  %vm410_vm0 = vweird.f32 %v4508_v46  ;;  %v717_v52 = vsel %vm632_vm14, %v716_v43, %v4889_v11  ;;  %v2447_v11 = vld [vmem:[#allocation5 + $0x1348] sm:$0xff]  ;;  %v2461_v46 = vld [vmem:[#allocation5 + $0x13b8] sm:$0xff] }
  0xf6   :  { %v4946_v29 = vmul.f32 0.6931472, %v4232_v6  ;;  %v702_v14 = vsub.s32 32, %v701_v54  ;;  %v703_v36 = vshll.u32 %v4901_v49, %v701_v54  ;;  %v706_v58 = vsub.s32 4294967266, %v701_v54  ;;  %v2439_v54 = vld [vmem:[#allocation5 + $0x1308] sm:$0xff] }
  0xf7   :  { %v584_v23 = vadd.s32 1, %v4935_v35  ;;  %v842_v60 = vshrl.u32 %v841_v24, 23  ;;  %vm4957_vm1 = vcmp.le.f32.partialorder %v630_v16, 0.7853982  ;;  %vm583_vm2 = vc.u32 %v4942_v42, %v4934_v38  ;;  %v2446_v16 = vld [vmem:[#allocation5 + $0x1340] sm:$0xff] }
  0xf8   :  { %2919 = vmatmul.mubr.f32.vlgmr.msra.gmra.mxu0 %v4946_v29  ;;  %v704_v49 = vshrl.u32 %v686_v56, %v702_v14  ;;  %v707_v33 = vadd.s32 127, %v706_v58  ;;  %vm417_vm5 = vcmp.eq.s32.totalorder %v412_v27, 2  ;;  %v5475_v2 = vand.u32 2147483647, %v4920_v26  ;;  %v2438_v14 = vld [vmem:[#allocation5 + $0x1300] sm:$0xff] }
  0xf9   :  { %2997 = vmatpush1.msra.mxu0 %v2462_v31  ;;  %v585_v34 = vsel %vm583_vm2, %v584_v23, %v4935_v35  ;;  %v4103_v37 = vadd.s32 4294967169, %v842_v60  ;;  %v4969_v56 = vsel %vm4957_vm1, 0, %v717_v52  ;;  %vm413_vm6 = vcmp.lt.s32.totalorder %v412_v27, 2  ;;  %v2431_v52 = vld [vmem:[#allocation5 + $0x12c8] sm:$0xff] }
  0xfa   :  { %v4965_v15 = vpop.eup %4233  ;;  %2998 = vmatprep.subr.mxu0 %v2455_v25  ;;  %v705_v43 = vor.u32 %v704_v49, %v703_v36  ;;  %v708_v41 = vshll.u32 %v707_v33, 23  ;;  %v586_v8 = vadd.s32 %v585_v34, %v581_v44  ;;  %vm414_vm7 = vcmp.eq.s32.totalorder %v412_v27, 0  ;;  %v2430_v49 = vld [vmem:[#allocation5 + $0x12c0] sm:$0xff] }
  0xfb   :  { %v4971_v6 = vpop.eup %4235  ;;  %v5466_v35 = vxor.u32 2147483648, %v4965_v15  ;;  %2999 = vmatpush1.msra.mxu0 %v2454_v18  ;;  %v848_v24 = vadd.s32 1, %v4103_v37  ;;  %v723_v23 = vadd.s32 3, %v4969_v56  ;;  %v4982_v60 = vand.u32 8388607, %v5475_v2  ;;  %v2414_v27 = vld [vmem:[#allocation5 + $0x1240] sm:$0xff] }
  0xfc   :  { %v5467_v31 = vxor.u32 2147483648, %v4971_v6  ;;  %3000 = vmatprep.subr.mxu0 %v2447_v11  ;;  %v709_v36 = vor.u32 4788187, %v708_v41  ;;  %v712_v58 = vcvt.s32.f32 %v705_v43  ;;  %v587_v25 = vadd.s32 536870912, %v586_v8  ;;  %v2543_v2 = vld [vmem:[#allocation5 + $0x1648] sm:$0xff] }
  0xfd   :  { %v419_v44 = vsel %vm417_vm5, %v5466_v35, %v4971_v6  ;;  %3001 = vmatpush1.msra.mxu0 %v2446_v16  ;;  %vm849_vm8 = vcmp.gt.s32.totalorder %v848_v24, 0  ;;  %v2423_v16 = vld [vmem:[#allocation5 + $0x1288] sm:$0xff]  ;;  %vm722_vm15 = vweird.f32 %v4691_v62 }
  0xfe   :  { %v416_v18 = vsel %vm414_vm7, %v4965_v15, %v5467_v31  ;;  %3002 = vmatprep.subr.mxu0 %v2439_v54  ;;  %v710_v33 = vand.u32 2147483647, %v709_v36  ;;  %v4988_v11 = vshrl.u32 %v587_v25, 30  ;;  %v850_v34 = vsel %vm849_vm8, %v848_v24, 0  ;;  %v2415_v54 = vld [vmem:[#allocation5 + $0x1248] sm:$0xff] }
  0xff   :  { %v420_v37 = vsel %vm413_vm6, %v416_v18, %v419_v44  ;;  %3003 = vmatpush1.msra.mxu0 %v2438_v14  ;;  %v852_v43 = vand.u32 31, %v850_v34  ;;  %v4994_v36 = vand.u32 3, %v723_v23  ;;  %v846_v44 = vor.u32 8388608, %v4982_v60 }
 0x100   :  { %v421_v41 = vsel %vm410_vm0, nan, %v420_v37  ;;  %3004 = vmatprep.subr.mxu0 %v2431_v52  ;;  %v713_v51 = vmul.f32 %v712_v58, %v710_v33  ;;  %v589_v35 = vshll.u32 %v4988_v11, 30  ;;  %v2407_v58 = vld [vmem:[#allocation5 + $0x1208] sm:$0xff]  ;;  %v5002_v33 = vadd.s32 %v4934_v38, %v4942_v42  ;;  %v2406_v37 = vld [vmem:[#allocation5 + $0x1200] sm:$0xff] }
 0x101   :  { %v1768_v31 = vand.u32 2147483647, %v421_v41  ;;  %3005 = vmatpush1.msra.mxu0 %v2430_v49  ;;  %v853_v25 = vsub.s32 32, %v852_v43  ;;  %v855_v18 = vshll.u32 %v4367_v61, %v852_v43  ;;  %v858_v49 = vshll.u32 %v4368_v63, %v852_v43  ;;  %v2398_v41 = vld [vmem:[#allocation5 + $0x11c0] sm:$0xff] }
 0x102   :  { %3006 = vmatprep.subr.mxu0 %v2423_v16  ;;  %v714_v24 = vxor.u32 2147483648, %v713_v51  ;;  %v4996_v14 = vsub.s32 %v586_v8, %v589_v35  ;;  %v5014_v42 = vshrl.u32 %v850_v34, 5  ;;  %v864_v10 = vshll.u32 %v4370_v3, %v852_v43  ;;  %v2390_v34 = vld [vmem:[#allocation5 + $0x1180] sm:$0xff] }
 0x103   :  { %v1776_v52 = vadd.f32 1e-06, %v1768_v31  ;;  %3007 = vmatpush1.msra.mxu0 %v2422_v30  ;;  %v856_v23 = vshrl.u32 %v4368_v63, %v853_v25  ;;  %v859_v60 = vshrl.u32 %v4369_v1, %v853_v25  ;;  %v861_v30 = vshll.u32 %v4369_v1, %v852_v43  ;;  %v2399_v31 = vld [vmem:[#allocation5 + $0x11c8] sm:$0xff] }
 0x104   :  { %3008 = vmatprep.subr.mxu0 %v2415_v54  ;;  %v715_v8 = vsel %vm632_vm14, %v714_v24, %v713_v51  ;;  %v592_v35 = vsub.s32 0, %v4996_v14  ;;  %v862_v16 = vshrl.u32 %v4370_v3, %v853_v25  ;;  %v100_v24 = vmul.f32 0.23204589, %v4926_v28 }
 0x105   :  { %4237 = vlog2.f32 %v1776_v52  ;;  %3009 = vmatpush1.msra.mxu0 %v2414_v27  ;;  %v718_v38 = vsel %vm4957_vm1, %v4691_v62, %v715_v8  ;;  %v857_v54 = vor.u32 %v856_v23, %v855_v18  ;;  %v2391_v52 = vld [vmem:[#allocation5 + $0x1188] sm:$0xff]  ;;  %v860_v27 = vor.u32 %v859_v60, %v858_v49  ;;  %v2382_v49 = vld [vmem:[#allocation5 + $0x1140] sm:$0xff] }
 0x106   :  { %3010 = vmatprep.subr.mxu0 %v2407_v58  ;;  %4239 = vcosq.f32 %v718_v38  ;;  %v4092_v51 = vmin.u32 %v592_v35, %v4996_v14  ;;  %v865_v48 = vshrl.u32 %v4371_v5, %v853_v25  ;;  %v854_v58 = vshrl.u32 %v4367_v61, %v853_v25  ;;  %v2383_v18 = vld [vmem:[#allocation5 + $0x1148] sm:$0xff] }
 0x107   :  { %3011 = vmatpush1.msra.mxu0 %v2406_v37  ;;  %4241 = vsinq.f32 %v718_v38  ;;  %v863_v9 = vor.u32 %v862_v16, %v861_v30  ;;  %v5022_v57 = vshll.u32 %v846_v44, 8  ;;  %v867_v28 = vshll.u32 %v4371_v5, %v852_v43  ;;  %v2375_v44 = vld [vmem:[#allocation5 + $0x1108] sm:$0xff] }
 0x108   :  { %3012 = vmatprep.subr.mxu0 %v2399_v31  ;;  %v594_v8 = vclz %v4092_v51  ;;  %v866_v23 = vor.u32 %v865_v48, %v864_v10  ;;  %v868_v37 = vshrl.u32 %v4372_v13, %v853_v25  ;;  %vm870_vm9 = vcmp.lt.s32.totalorder %v5014_v42, 1  ;;  %v2374_v25 = vld [vmem:[#allocation5 + $0x1100] sm:$0xff] }
 0x109   :  { %3013 = vmatpush1.msra.mxu0 %v2398_v41  ;;  %vm872_vm10 = vcmp.lt.s32.totalorder %v5014_v42, 3  ;;  %vm873_vm11 = vcmp.lt.s32.totalorder %v5014_v42, 4  ;;  %v5029_v60 = vadd.f32 1.4547731, %v100_v24  ;;  %vm871_vm13 = vcmp.lt.s32.totalorder %v5014_v42, 2  ;;  %v2367_v41 = vld [vmem:[#allocation5 + $0x10c8] sm:$0xff] }
 0x10a   :  { %3014 = vmatprep.subr.mxu0 %v2391_v52  ;;  %v4093_v35 = vadd.s32 4294967294, %v594_v8  ;;  %v869_v30 = vor.u32 %v868_v37, %v867_v28  ;;  %v875_v10 = vsel %vm873_vm11, %v863_v9, 2102212464  ;;  %v878_v43 = vsel %vm870_vm9, %v857_v54, %v860_v27  ;;  %v2359_v28 = vld [vmem:[#allocation5 + $0x1088] sm:$0xff] }
 0x10b   :  { %3015 = vmatpush1.msra.mxu0 %v2390_v34  ;;  %v874_v31 = vsel %vm870_vm9, %v854_v58, %v857_v54  ;;  %v876_v38 = vsel %vm872_vm10, %v860_v27, %v875_v10  ;;  %v879_v16 = vsel %vm873_vm11, %v866_v23, 920167782  ;;  %v882_v52 = vsel %vm870_vm9, %v860_v27, %v863_v9  ;;  %v2366_v54 = vld [vmem:[#allocation5 + $0x10c0] sm:$0xff] }
 0x10c   :  { %3016 = vmatprep.subr.mxu0 %v2383_v18  ;;  %vm4094_vm14 = vcmp.lt.s32.totalorder %v4093_v35, 0  ;;  %v880_v24 = vsel %vm872_vm10, %v863_v9, %v879_v16  ;;  %v883_v48 = vsel %vm873_vm11, %v869_v30, 1326507024  ;;  %v877_v37 = vsel %vm871_vm13, %v874_v31, %v876_v38  ;;  %v2350_v38 = vld [vmem:[#allocation5 + $0x1040] sm:$0xff] }
 0x10d   :  { %3017 = vmatpush1.msra.mxu0 %v2382_v49  ;;  %v597_v51 = vsel %vm4094_vm14, 0, %v4093_v35  ;;  %v881_v18 = vsel %vm871_vm13, %v878_v43, %v880_v24  ;;  %v884_v9 = vsel %vm872_vm10, %v866_v23, %v883_v48  ;;  %v2358_v35 = vld [vmem:[#allocation5 + $0x1080] sm:$0xff]  ;;  %v737_v10 = vand.u32 2139095040, %v5029_v60  ;;  %v2351_v43 = vld [vmem:[#allocation5 + $0x1048] sm:$0xff] }
 0x10e   :  { %3018 = vmatprep.subr.mxu0 %v2375_v44  ;;  %v598_v34 = vsub.s32 32, %v597_v51  ;;  %v599_v8 = vshll.u32 %v4996_v14, %v597_v51  ;;  %v602_v58 = vsub.s32 4294967266, %v597_v51  ;;  %v885_v30 = vsel %vm871_vm13, %v882_v52, %v884_v9  ;;  %v2718_v24 = vld [vmem:[#allocation5 + $0x1bc0] sm:$0xff]  ;;  %v2343_v52 = vld [vmem:[#allocation5 + $0x1008] sm:$0xff] }
 0x10f   :  { %3019 = vmatpush1.msra.mxu0 %v2374_v25  ;;  %v5056_v27 = vmul.u32.u64.low %v5022_v57, %v881_v18  ;;  %v5057_v49 = vmul.u32.u64.high %v5022_v57, %v881_v18, %v5056_v27  ;;  %v5066_v23 = vmul.u32.u64.low %v5022_v57, %v885_v30  ;;  %v5067_v25 = vmul.u32.u64.high %v5022_v57, %v885_v30, %v5066_v23  ;;  %v2703_v30 = vld [vmem:[#allocation5 + $0x1b48] sm:$0xff] }
 0x110   :  { %3020 = vmatprep.subr.mxu0 %v2367_v41  ;;  %v600_v14 = vshrl.u32 %v5002_v33, %v598_v34  ;;  %v603_v44 = vadd.s32 127, %v602_v58  ;;  %vm726_vm1 = vcmp.eq.s32.totalorder %v4994_v36, 0  ;;  %v738_v41 = vshrl.u32 %v737_v10, 23  ;;  %v2711_v58 = vld [vmem:[#allocation5 + $0x1b88] sm:$0xff]  ;;  %v2590_v10 = vld [vmem:[#allocation5 + $0x17c0] sm:$0xff] }
 0x111   :  { %3021 = vmatpush1.msra.mxu0 %v2366_v54  ;;  %vm729_vm2 = vcmp.eq.s32.totalorder %v4994_v36, 2  ;;  %v893_v48 = vmul.u32 %v5022_v57, %v877_v37  ;;  %v896_v54 = vadd.s32 1, %v5057_v49  ;;  %vm725_vm5 = vcmp.lt.s32.totalorder %v4994_v36, 2  ;;  %v2687_v36 = vld [vmem:[#allocation5 + $0x1ac8] sm:$0xff] }
 0x112   :  { %v4238_v31 = vpop.eup %4237  ;;  %3022 = vmatprep.subr.mxu0 %v2359_v28  ;;  %v601_v33 = vor.u32 %v600_v14, %v599_v8  ;;  %v604_v16 = vshll.u32 %v603_v44, 23  ;;  %v2342_v8 = vld [vmem:[#allocation5 + $0x1000] sm:$0xff]  ;;  %v4099_v14 = vadd.s32 4294967169, %v738_v41  ;;  %v2591_v44 = vld [vmem:[#allocation5 + $0x17c8] sm:$0xff]  ;;  %v612_v37 = vsub.s32 4, %v4988_v11 }
 0x113   :  { %v5070_v42 = vpop.eup %4239  ;;  %v5072_v51 = vmul.f32 0.6931472, %v4238_v31  ;;  %3023 = vmatpush1.msra.mxu0 %v2358_v35  ;;  %v2710_v35 = vld [vmem:[#allocation5 + $0x1b80] sm:$0xff]  ;;  %vm895_vm6 = vc.u32 %v5067_v25, %v5056_v27  ;;  %vm528_vm7 = vcmp.lt.s32.totalorder %v4772_v17, 0  ;;  %vm5105_vm9 = vcmp.le.f32.partialorder %v526_v45, 0.7853982 }
 0x114   :  { %v5077_v34 = vpop.eup %4241  ;;  %3024 = vmatprep.subr.mxu0 %v2351_v43  ;;  %v5471_v18 = vxor.u32 2147483648, %v5070_v42  ;;  %v605_v28 = vor.u32 4788187, %v604_v16  ;;  %v608_v9 = vcvt.s32.f32 %v601_v33  ;;  %v897_v31 = vsel %vm895_vm6, %v896_v54, %v5057_v49  ;;  %v2702_v33 = vld [vmem:[#allocation5 + $0x1b40] sm:$0xff]  ;;  %v2583_v16 = vld [vmem:[#allocation5 + $0x1788] sm:$0xff] }
 0x115   :  { %2990 = vmatmul.mubr.f32.vlgmr.msra.gmra.mxu1 %v5072_v51  ;;  %3025 = vmatpush1.msra.mxu0 %v2350_v38  ;;  %v5472_v57 = vxor.u32 2147483648, %v5077_v34  ;;  %v744_v38 = vadd.s32 1, %v4099_v14  ;;  %v2567_v45 = vld [vmem:[#allocation5 + $0x1708] sm:$0xff] }
 0x116   :  { %3068 = vmatpush1.msra.mxu1 %v2718_v24  ;;  %3026 = vmatprep.subr.mxu0 %v2343_v52  ;;  %v731_v43 = vsel %vm729_vm2, %v5471_v18, %v5077_v34  ;;  %v606_v23 = vand.u32 2147483647, %v605_v28  ;;  %v898_v24 = vadd.s32 %v897_v31, %v893_v48  ;;  %v2695_v52 = vld [vmem:[#allocation5 + $0x1b08] sm:$0xff]  ;;  %v2694_v18 = vld [vmem:[#allocation5 + $0x1b00] sm:$0xff] }
 0x117   :  { %3069 = vmatprep.subr.mxu1 %v2711_v58  ;;  %3027 = vmatpush1.msra.mxu0 %v2342_v8  ;;  %v728_v41 = vsel %vm726_vm1, %v5070_v42, %v5472_v57  ;;  %v2582_v28 = vld [vmem:[#allocation5 + $0x1780] sm:$0xff]  ;;  %v5474_v58 = vand.u32 2147483647, %v5029_v60  ;;  %vm745_vm8 = vcmp.gt.s32.totalorder %v744_v38, 0  ;;  %v2575_v8 = vld [vmem:[#allocation5 + $0x1748] sm:$0xff] }
 0x118   :  { %3070 = vmatpush1.msra.mxu1 %v2710_v35  ;;  %3028 = vmatprep.subr.mxu0 %v2591_v44  ;;  %v732_v49 = vsel %vm725_vm5, %v728_v41, %v731_v43  ;;  %v609_v54 = vmul.f32 %v608_v9, %v606_v23  ;;  %v899_v35 = vadd.s32 536870912, %v898_v24  ;;  %v746_v44 = vsel %vm745_vm8, %v744_v38, 0  ;;  %v2574_v9 = vld [vmem:[#allocation5 + $0x1740] sm:$0xff] }
 0x119   :  { %3071 = vmatprep.subr.mxu1 %v2703_v30  ;;  %3029 = vmatpush2.msra.mxu0 %v2590_v10  ;;  %v733_v14 = vsel %vm722_vm15, nan, %v732_v49  ;;  %v613_v30 = vsel %vm528_vm7, %v612_v37, %v4988_v11  ;;  %v748_v10 = vand.u32 31, %v746_v44  ;;  %v2686_v31 = vld [vmem:[#allocation5 + $0x1ac0] sm:$0xff]  ;;  %v2679_v49 = vld [vmem:[#allocation5 + $0x1a88] sm:$0xff] }
 0x11a   :  { %3072 = vmatpush1.msra.mxu1 %v2702_v33  ;;  %3030 = vmatprep.subr.mxu0 %v2583_v16  ;;  %v1771_v43 = vand.u32 2147483647, %v733_v14  ;;  %v610_v23 = vxor.u32 2147483648, %v609_v54  ;;  %v5112_v41 = vshrl.u32 %v899_v35, 30  ;;  %v2566_v38 = vld [vmem:[#allocation5 + $0x1700] sm:$0xff]  ;;  %v2671_v35 = vld [vmem:[#allocation5 + $0x1a48] sm:$0xff] }
 0x11b   :  { %3073 = vmatprep.subr.mxu1 %v2695_v52  ;;  %3031 = vmatpush2.msra.mxu0 %v2582_v28  ;;  %v5118_v16 = vand.u32 8388607, %v5474_v58  ;;  %v749_v14 = vsub.s32 32, %v748_v10  ;;  %v751_v11 = vshll.u32 %v4367_v61, %v748_v10  ;;  %v2678_v37 = vld [vmem:[#allocation5 + $0x1a80] sm:$0xff]  ;;  %v2559_v52 = vld [vmem:[#allocation5 + $0x16c8] sm:$0xff]  ;;  %v5126_v28 = vsel %vm5105_vm9, 0, %v613_v30 }
 0x11c   :  { %3074 = vmatpush1.msra.mxu1 %v2694_v18  ;;  %3032 = vmatprep.subr.mxu0 %v2575_v8  ;;  %v611_v33 = vsel %vm528_vm7, %v610_v23, %v609_v54  ;;  %v901_v54 = vshll.u32 %v5112_v41, 30  ;;  %v754_v8 = vshll.u32 %v4368_v63, %v748_v10  ;;  %v2558_v23 = vld [vmem:[#allocation5 + $0x16c0] sm:$0xff]  ;;  %v5134_v30 = vshrl.u32 %v746_v44, 5 }
 0x11d   :  { %3075 = vmatprep.subr.mxu1 %v2687_v36  ;;  %3033 = vmatpush2.msra.mxu0 %v2574_v9  ;;  %v614_v18 = vsel %vm5105_vm9, %v4772_v17, %v611_v33  ;;  %v1779_v36 = vadd.f32 1e-06, %v1771_v43  ;;  %v752_v9 = vshrl.u32 %v4368_v63, %v749_v14  ;;  %v755_v57 = vshrl.u32 %v4369_v1, %v749_v14  ;;  %v2551_v33 = vld [vmem:[#allocation5 + $0x1688] sm:$0xff] }
 0x11e   :  { %3076 = vmatpush1.msra.mxu1 %v2686_v31  ;;  %3034 = vmatprep.subr.mxu0 %v2567_v45  ;;  %4243 = vcosq.f32 %v614_v18  ;;  %v5132_v48 = vsub.s32 %v898_v24, %v901_v54  ;;  %v757_v58 = vshll.u32 %v4369_v1, %v748_v10  ;;  %v2663_v31 = vld [vmem:[#allocation5 + $0x1a08] sm:$0xff]  ;;  %v2550_v45 = vld [vmem:[#allocation5 + $0x1680] sm:$0xff]  ;;  %v619_v63 = vadd.s32 3, %v5126_v28 }
 0x11f   :  { %3077 = vmatprep.subr.mxu1 %v2679_v49  ;;  %3035 = vmatpush2.msra.mxu0 %v2566_v38  ;;  %4245 = vsinq.f32 %v614_v18  ;;  %v742_v43 = vor.u32 8388608, %v5118_v16  ;;  %v753_v49 = vor.u32 %v752_v9, %v751_v11  ;;  %v2662_v38 = vld [vmem:[#allocation5 + $0x1a00] sm:$0xff]  ;;  %v756_v44 = vor.u32 %v755_v57, %v754_v8 }
 0x120   :  { %3078 = vmatpush1.msra.mxu1 %v2678_v37  ;;  %3036 = vmatprep.subr.mxu0 %v2559_v52  ;;  %v904_v24 = vsub.s32 0, %v5132_v48  ;;  %v758_v54 = vshrl.u32 %v4370_v3, %v749_v14  ;;  %v760_v1 = vshll.u32 %v4370_v3, %v748_v10  ;;  %v2655_v37 = vld [vmem:[#allocation5 + $0x19c8] sm:$0xff]  ;;  %v2542_v52 = vld [vmem:[#allocation5 + $0x1640] sm:$0xff]  ;;  %4247 = vlog2.f32 %v1779_v36 }
 0x121   :  { %3079 = vmatprep.subr.mxu1 %v2671_v35  ;;  %3037 = vmatpush2.msra.mxu0 %v2558_v23  ;;  %v761_v18 = vshrl.u32 %v4371_v5, %v749_v14  ;;  %v763_v16 = vshll.u32 %v4371_v5, %v748_v10  ;;  %v764_v11 = vshrl.u32 %v4372_v13, %v749_v14  ;;  %v2654_v35 = vld [vmem:[#allocation5 + $0x19c0] sm:$0xff]  ;;  %v2535_v23 = vld [vmem:[#allocation5 + $0x1608] sm:$0xff]  ;;  %vm766_vm10 = vcmp.lt.s32.totalorder %v5134_v30, 1 }
 0x122   :  { %3080 = vmatpush1.msra.mxu1 %v2670_v50  ;;  %3038 = vmatprep.subr.mxu0 %v2551_v33  ;;  %v4104_v57 = vmin.u32 %v904_v24, %v5132_v48  ;;  %v750_v8 = vshrl.u32 %v4367_v61, %v749_v14  ;;  %v759_v3 = vor.u32 %v758_v54, %v757_v58  ;;  %v2647_v50 = vld [vmem:[#allocation5 + $0x1988] sm:$0xff]  ;;  %v2534_v36 = vld [vmem:[#allocation5 + $0x1600] sm:$0xff]  ;;  %vm768_vm11 = vcmp.lt.s32.totalorder %v5134_v30, 3 }
 0x123   :  { %3081 = vmatprep.subr.mxu1 %v2663_v31  ;;  %3039 = vmatpush2.msra.mxu0 %v2550_v45  ;;  %v762_v9 = vor.u32 %v761_v18, %v760_v1  ;;  %v765_v33 = vor.u32 %v764_v11, %v763_v16  ;;  %vm769_vm13 = vcmp.lt.s32.totalorder %v5134_v30, 4  ;;  %v2646_v5 = vld [vmem:[#allocation5 + $0x1980] sm:$0xff]  ;;  %v2639_v13 = vld [vmem:[#allocation5 + $0x1948] sm:$0xff]  ;;  %vm767_vm14 = vcmp.lt.s32.totalorder %v5134_v30, 2 }
 0x124   :  { %3082 = vmatpush1.msra.mxu1 %v2662_v38  ;;  %3040 = vmatprep.subr.mxu0 %v2543_v2  ;;  %v2527_v10 = vld [vmem:[#allocation5 + $0x15c8] sm:$0xff]  ;;  %v906_v31 = vclz %v4104_v57  ;;  %v5151_v61 = vshll.u32 %v742_v43, 8  ;;  %v2526_v2 = vld [vmem:[#allocation5 + $0x15c0] sm:$0xff]  ;;  %v5153_v58 = vand.u32 3, %v619_v63  ;;  %v771_v14 = vsel %vm769_vm13, %v759_v3, 2102212464 }
 0x125   :  { %3083 = vmatprep.subr.mxu1 %v2655_v37  ;;  %3041 = vmatpush2.msra.mxu0 %v2542_v52  ;;  %v774_v45 = vsel %vm766_vm10, %v753_v49, %v756_v44  ;;  %v775_v38 = vsel %vm769_vm13, %v762_v9, 920167782  ;;  %v2638_v24 = vld [vmem:[#allocation5 + $0x1940] sm:$0xff]  ;;  %v2519_v54 = vld [vmem:[#allocation5 + $0x1588] sm:$0xff]  ;;  %v894_v43 = vadd.s32 %v5056_v27, %v5067_v25  ;;  %v778_v37 = vsel %vm766_vm10, %v756_v44, %v759_v3 }
 0x126   :  { %3084 = vmatpush1.msra.mxu1 %v2654_v35  ;;  %3042 = vmatprep.subr.mxu0 %v2535_v23  ;;  %v4105_v1 = vadd.s32 4294967294, %v906_v31  ;;  %v776_v63 = vsel %vm768_vm11, %v759_v3, %v775_v38  ;;  %v2631_v52 = vld [vmem:[#allocation5 + $0x1908] sm:$0xff]  ;;  %v2518_v18 = vld [vmem:[#allocation5 + $0x1580] sm:$0xff]  ;;  %v770_v16 = vsel %vm766_vm10, %v750_v8, %v753_v49  ;;  %v772_v11 = vsel %vm768_vm11, %v756_v44, %v771_v14 }
 0x127   :  { %3085 = vmatprep.subr.mxu1 %v2647_v50  ;;  %3043 = vmatpush2.msra.mxu0 %v2534_v36  ;;  %v777_v27 = vsel %vm767_vm14, %v774_v45, %v776_v63  ;;  %v779_v25 = vsel %vm769_vm13, %v765_v33, 1326507024  ;;  %v2630_v35 = vld [vmem:[#allocation5 + $0x1900] sm:$0xff]  ;;  %v2511_v23 = vld [vmem:[#allocation5 + $0x1548] sm:$0xff]  ;;  %v773_v31 = vsel %vm767_vm14, %v770_v16, %v772_v11  ;;  %vm622_vm2 = vcmp.eq.s32.totalorder %v5153_v58, 0 }
 0x128   :  { %3086 = vmatpush1.msra.mxu1 %v2646_v5  ;;  %3044 = vmatprep.subr.mxu0 %v2527_v10  ;;  %vm4106_vm1 = vcmp.lt.s32.totalorder %v4105_v1, 0  ;;  %v780_v57 = vsel %vm768_vm11, %v762_v9, %v779_v25  ;;  %v5178_v3 = vmul.u32.u64.low %v5151_v61, %v777_v27  ;;  %v5179_v49 = vmul.u32.u64.high %v5151_v61, %v777_v27, %v5178_v3  ;;  %v2623_v44 = vld [vmem:[#allocation5 + $0x18c8] sm:$0xff]  ;;  %v2510_v8 = vld [vmem:[#allocation5 + $0x1540] sm:$0xff] }
 0x129   :  { %3087 = vmatprep.subr.mxu1 %v2639_v13  ;;  %3045 = vmatpush2.msra.mxu0 %v2526_v2  ;;  %v909_v50 = vsel %vm4106_vm1, 0, %v4105_v1  ;;  %v781_v36 = vsel %vm767_vm14, %v778_v37, %v780_v57  ;;  %v2622_v33 = vld [vmem:[#allocation5 + $0x18c0] sm:$0xff]  ;;  %v2503_v5 = vld [vmem:[#allocation5 + $0x1508] sm:$0xff]  ;;  %vm625_vm5 = vcmp.eq.s32.totalorder %v5153_v58, 2  ;;  %vm621_vm6 = vcmp.lt.s32.totalorder %v5153_v58, 2 }
 0x12a   :  { %3088 = vmatpush1.msra.mxu1 %v2638_v24  ;;  %3046 = vmatprep.subr.mxu0 %v2519_v54  ;;  %v910_v13 = vsub.s32 32, %v909_v50  ;;  %v911_v9 = vshll.u32 %v5132_v48, %v909_v50  ;;  %v914_v10 = vsub.s32 4294967266, %v909_v50  ;;  %v2615_v14 = vld [vmem:[#allocation5 + $0x1888] sm:$0xff]  ;;  %v2502_v45 = vld [vmem:[#allocation5 + $0x1500] sm:$0xff]  ;;  %v789_v27 = vmul.u32 %v5151_v61, %v773_v31 }
 0x12b   :  { %3089 = vmatprep.subr.mxu1 %v2631_v52  ;;  %3047 = vmatpush2.msra.mxu0 %v2518_v18  ;;  %v5187_v2 = vpop.eup %4243  ;;  %v5192_v38 = vmul.u32.u64.low %v5151_v61, %v781_v36  ;;  %v5193_v24 = vmul.u32.u64.high %v5151_v61, %v781_v36, %v5192_v38  ;;  %v2614_v48 = vld [vmem:[#allocation5 + $0x1880] sm:$0xff]  ;;  %v2495_v30 = vld [vmem:[#allocation5 + $0x14c8] sm:$0xff]  ;;  %v792_v52 = vadd.s32 1, %v5179_v49  ;;  %vm618_vm7 = vweird.f32 %v4772_v17 }
 0x12c   :  { %3090 = vmatpush1.msra.mxu1 %v2630_v35  ;;  %3048 = vmatprep.subr.mxu0 %v2511_v23  ;;  %v5195_v54 = vpop.eup %4245  ;;  %v626_v1 = vxor.u32 2147483648, %v5187_v2  ;;  %v912_v63 = vshrl.u32 %v894_v43, %v910_v13  ;;  %v915_v37 = vadd.s32 127, %v914_v10  ;;  %v2607_v18 = vld [vmem:[#allocation5 + $0x1848] sm:$0xff]  ;;  %v2494_v16 = vld [vmem:[#allocation5 + $0x14c0] sm:$0xff]  ;;  %vm840_vm9 = vcmp.lt.s32.totalorder %v4920_v26, 0 }
 0x12d   :  { %3091 = vmatprep.subr.mxu1 %v2623_v44  ;;  %3049 = vmatpush2.msra.mxu0 %v2510_v8  ;;  %v623_v11 = vxor.u32 2147483648, %v5195_v54  ;;  %v4248_v25 = vpop.eup %4247  ;;  %v2606_v35 = vld [vmem:[#allocation5 + $0x1840] sm:$0xff]  ;;  %v2487_v23 = vld [vmem:[#allocation5 + $0x1488] sm:$0xff]  ;;  %vm791_vm8 = vc.u32 %v5193_v24, %v5178_v3 }
 0x12e   :  { %3092 = vmatpush1.msra.mxu1 %v2622_v33  ;;  %3050 = vmatprep.subr.mxu0 %v2503_v5  ;;  %v627_v43 = vsel %vm625_vm5, %v626_v1, %v5195_v54  ;;  %v913_v57 = vor.u32 %v912_v63, %v911_v9  ;;  %v916_v44 = vshll.u32 %v915_v37, 23  ;;  %v2599_v8 = vld [vmem:[#allocation5 + $0x1808] sm:$0xff]  ;;  %v2486_v50 = vld [vmem:[#allocation5 + $0x1480] sm:$0xff]  ;;  %v793_v10 = vsel %vm791_vm8, %v792_v52, %v5179_v49 }
 0x12f   :  { %3093 = vmatprep.subr.mxu1 %v2615_v14  ;;  %3051 = vmatpush2.msra.mxu0 %v2502_v45  ;;  %v624_v61 = vsel %vm622_vm2, %v5187_v2, %v623_v11  ;;  %v2598_v36 = vld [vmem:[#allocation5 + $0x1800] sm:$0xff]  ;;  %v2479_v33 = vld [vmem:[#allocation5 + $0x1448] sm:$0xff]  ;;  %v794_v38 = vadd.s32 %v793_v10, %v789_v27  ;;  %vm930_vm2 = vweird.f32 %v4920_v26  ;;  %vm736_vm5 = vcmp.lt.s32.totalorder %v5029_v60, 0 }
 0x130   :  { %3094 = vmatpush1.msra.mxu1 %v2614_v48  ;;  %3052 = vmatprep.subr.mxu0 %v2495_v30  ;;  %v628_v5 = vsel %vm621_vm6, %v624_v61, %v627_v43  ;;  %v917_v13 = vor.u32 4788187, %v916_v44  ;;  %v920_v9 = vcvt.s32.f32 %v913_v57  ;;  %v2847_v31 = vld [vmem:[#allocation5 + $0x1fc8] sm:$0xff]  ;;  %v2478_v14 = vld [vmem:[#allocation5 + $0x1440] sm:$0xff]  ;;  %v924_v43 = vsub.s32 4, %v5112_v41  ;;  %v1953_v57 = vld [vmem:[#allocation5 + $0x3d8] sm:$0xff] }
 0x131   :  { %3095 = vmatprep.subr.mxu1 %v2607_v18  ;;  %3053 = vmatpush2.msra.mxu0 %v2494_v16  ;;  %v629_v45 = vsel %vm618_vm7, nan, %v628_v5  ;;  %v2846_v48 = vld [vmem:[#allocation5 + $0x1fc0] sm:$0xff]  ;;  %v2471_v30 = vld [vmem:[#allocation5 + $0x1408] sm:$0xff]  ;;  %v5220_v16 = vmul.f32 0.6931472, %v4248_v25  ;;  %v795_v49 = vadd.s32 536870912, %v794_v38 }
 0x132   :  { %3096 = vmatpush1.msra.mxu1 %v2606_v35  ;;  %3054 = vmatprep.subr.mxu0 %v2487_v23  ;;  %v1770_v63 = vand.u32 2147483647, %v629_v45  ;;  %v918_v37 = vand.u32 2147483647, %v917_v13  ;;  %v2839_v58 = vld [vmem:[#allocation5 + $0x1f88] sm:$0xff]  ;;  %v2470_v18 = vld [vmem:[#allocation5 + $0x1400] sm:$0xff]  ;;  %v925_v10 = vsel %vm840_vm9, %v924_v43, %v5112_v41 }
 0x133   :  { %3097 = vmatprep.subr.mxu1 %v2599_v8  ;;  %3055 = vmatpush2.msra.mxu0 %v2486_v50  ;;  %v2838_v52 = vld [vmem:[#allocation5 + $0x1f80] sm:$0xff]  ;;  %v2831_v27 = vld [vmem:[#allocation5 + $0x1f48] sm:$0xff]  ;;  %v5224_v44 = vshrl.u32 %v795_v49, 30  ;;  %v5488_v25 = vand.u32 2147483647, %v4920_v26  ;;  %v790_v50 = vadd.s32 %v5178_v3, %v5193_v24 }
 0x134   :  { %3098 = vmatpush1.msra.mxu1 %v2598_v36  ;;  %3056 = vmatprep.subr.mxu0 %v2479_v33  ;;  %v1778_v35 = vadd.f32 1e-06, %v1770_v63  ;;  %v921_v23 = vmul.f32 %v920_v9, %v918_v37  ;;  %v2830_v8 = vld [vmem:[#allocation5 + $0x1f40] sm:$0xff]  ;;  %v2823_v36 = vld [vmem:[#allocation5 + $0x1f08] sm:$0xff] }
 0x135   :  { %3099 = vmatprep.subr.mxu1 %v2847_v31  ;;  %3057 = vmatpush2.msra.mxu0 %v2478_v14  ;;  %vm5228_vm10 = vcmp.le.f32.partialorder %v5488_v25, 0.7853982  ;;  %v797_v33 = vshll.u32 %v5224_v44, 30  ;;  %v2822_v5 = vld [vmem:[#allocation5 + $0x1f00] sm:$0xff]  ;;  %v2815_v9 = vld [vmem:[#allocation5 + $0x1ec8] sm:$0xff] }
 0x136   :  { %3100 = vmatpush2.msra.mxu1 %v2846_v48  ;;  %3058 = vmatprep.subr.mxu0 %v2471_v30  ;;  %4249 = vlog2.f32 %v1778_v35  ;;  %v922_v61 = vxor.u32 2147483648, %v921_v23  ;;  %v2814_v45 = vld [vmem:[#allocation5 + $0x1ec0] sm:$0xff]  ;;  %v2807_v48 = vld [vmem:[#allocation5 + $0x1e88] sm:$0xff]  ;;  %v5247_v37 = vsel %vm5228_vm10, 0, %v925_v10 }
 0x137   :  { %3101 = vmatprep.subr.mxu1 %v2839_v58  ;;  %3059 = vmatpush2.msra.mxu0 %v2470_v18  ;;  %v5242_v14 = vsub.s32 %v794_v38, %v797_v33  ;;  %v2806_v63 = vld [vmem:[#allocation5 + $0x1e80] sm:$0xff]  ;;  %v2799_v41 = vld [vmem:[#allocation5 + $0x1e48] sm:$0xff]  ;;  %v931_v49 = vadd.s32 3, %v5247_v37 }
 0x138   :  { %3102 = vmatpush2.msra.mxu1 %v2838_v52  ;;  %3060 = vmatprep.mubr.f32.mxu0 %v5220_v16  ;;  %v923_v13 = vsel %vm840_vm9, %v922_v61, %v921_v23  ;;  %v2798_v38 = vld [vmem:[#allocation5 + $0x1e40] sm:$0xff]  ;;  %v2791_v18 = vld [vmem:[#allocation5 + $0x1e08] sm:$0xff] }
 0x139   :  { %3103 = vmatprep.subr.mxu1 %v2831_v27  ;;  %3138 = vmatprep.subr.mxu0 %v1953_v57  ;;  %v926_v31 = vsel %vm5228_vm10, %v4920_v26, %v923_v13  ;;  %v800_v30 = vsub.s32 0, %v5242_v14  ;;  %v2790_v35 = vld [vmem:[#allocation5 + $0x1e00] sm:$0xff]  ;;  %v2783_v23 = vld [vmem:[#allocation5 + $0x1dc8] sm:$0xff]  ;;  %v932_v25 = vand.u32 3, %v931_v49  ;;  %v1936_v49 = vld [vmem:[#allocation5 + $0x350] sm:$0xff] }
 0x13a   :  { %3104 = vmatpush2.msra.mxu1 %v2830_v8  ;;  %4251 = vcosq.f32 %v926_v31  ;;  %v2782_v43 = vld [vmem:[#allocation5 + $0x1dc0] sm:$0xff]  ;;  %v2775_v8 = vld [vmem:[#allocation5 + $0x1d88] sm:$0xff] }
 0x13b   :  { %3105 = vmatprep.subr.mxu1 %v2823_v36  ;;  %4253 = vsinq.f32 %v926_v31  ;;  %v4100_v58 = vmin.u32 %v800_v30, %v5242_v14  ;;  %v2774_v61 = vld [vmem:[#allocation5 + $0x1d80] sm:$0xff]  ;;  %v2767_v13 = vld [vmem:[#allocation5 + $0x1d48] sm:$0xff]  ;;  %v1944_v30 = vld [vmem:[#allocation5 + $0x390] sm:$0xff]  ;;  %vm937_vm13 = vcmp.eq.s32.totalorder %v932_v25, 2  ;;  %vm934_vm14 = vcmp.eq.s32.totalorder %v932_v25, 0 }
 0x13c   :  { %3106 = vmatpush2.msra.mxu1 %v2822_v5  ;;  %v1952_v5 = vld [vmem:[#allocation5 + $0x3d0] sm:$0xff]  ;;  %v2759_v24 = vld [vmem:[#allocation5 + $0x1d08] sm:$0xff]  ;;  %vm933_vm1 = vcmp.lt.s32.totalorder %v932_v25, 2  ;;  %v1905_v25 = vld [vmem:[#allocation5 + $0x258] sm:$0xff] }
 0x13d   :  { %3107 = vmatprep.subr.mxu1 %v2815_v9  ;;  %v802_v52 = vclz %v4100_v58  ;;  %v1937_v58 = vld [vmem:[#allocation5 + $0x358] sm:$0xff] }
 0x13e   :  { %3108 = vmatpush2.msra.mxu1 %v2814_v45  ;;  %v1945_v45 = vld [vmem:[#allocation5 + $0x398] sm:$0xff] }
 0x13f   :  { %3109 = vmatprep.subr.mxu1 %v2807_v48  ;;  %v4101_v27 = vadd.s32 4294967294, %v802_v52  ;;  %v2766_v48 = vld [vmem:[#allocation5 + $0x1d40] sm:$0xff]  ;;  %v2751_v52 = vld [vmem:[#allocation5 + $0x1cc8] sm:$0xff] }
 0x140   :  { %3110 = vmatpush2.msra.mxu1 %v2806_v63 }
 0x141   :  { %3111 = vmatprep.subr.mxu1 %v2799_v41  ;;  %vm4102_vm11 = vcmp.lt.s32.totalorder %v4101_v27, 0 }
 0x142   :  { %3112 = vmatpush2.msra.mxu1 %v2798_v38  ;;  %v805_v33 = vsel %vm4102_vm11, 0, %v4101_v27  ;;  %vm826_vm11 = vweird.f32 %v5029_v60 }
 0x143   :  { %3113 = vmatprep.subr.mxu1 %v2791_v18  ;;  %v4250_v57 = vpop.eup %4249  ;;  %v806_v9 = vsub.s32 32, %v805_v33  ;;  %v807_v10 = vshll.u32 %v5242_v14, %v805_v33  ;;  %v810_v31 = vsub.s32 4294967266, %v805_v33  ;;  %v2758_v14 = vld [vmem:[#allocation5 + $0x1d00] sm:$0xff] }
 0x144   :  { %3114 = vmatpush2.msra.mxu1 %v2790_v35  ;;  %v5253_v36 = vmul.f32 0.6931472, %v4250_v57  ;;  %v2750_v57 = vld [vmem:[#allocation5 + $0x1cc0] sm:$0xff] }
 0x145   :  { %3115 = vmatprep.subr.mxu1 %v2783_v23  ;;  %v808_v63 = vshrl.u32 %v790_v50, %v806_v9  ;;  %v811_v41 = vadd.s32 127, %v810_v31  ;;  %v1928_v50 = vld [vmem:[#allocation5 + $0x310] sm:$0xff]  ;;  %v1921_v9 = vld [vmem:[#allocation5 + $0x2d8] sm:$0xff] }
 0x146   :  { %3116 = vmatpush2.msra.mxu1 %v2782_v43  ;;  %3061 = vmatmul.mubr.f32.vlgmr.msra.gmra.mxu0 %v5253_v36  ;;  %v1929_v43 = vld [vmem:[#allocation5 + $0x318] sm:$0xff] }
 0x147   :  { %3117 = vmatprep.subr.mxu1 %v2775_v8  ;;  %v5257_v3 = vpop.eup %4251  ;;  %3139 = vmatpush1.msra.mxu0 %v1952_v5  ;;  %v809_v23 = vor.u32 %v808_v63, %v807_v10  ;;  %v812_v27 = vshll.u32 %v811_v41, 23  ;;  %v2742_v10 = vld [vmem:[#allocation5 + $0x1c80] sm:$0xff]  ;;  %v1913_v63 = vld [vmem:[#allocation5 + $0x298] sm:$0xff] }
 0x148   :  { %3118 = vmatpush2.msra.mxu1 %v2774_v61  ;;  %v5259_v38 = vpop.eup %4253  ;;  %v938_v18 = vxor.u32 2147483648, %v5257_v3  ;;  %3140 = vmatprep.subr.mxu0 %v1945_v45  ;;  %v2743_v61 = vld [vmem:[#allocation5 + $0x1c88] sm:$0xff]  ;;  %v1920_v45 = vld [vmem:[#allocation5 + $0x2d0] sm:$0xff]  ;;  %v2734_v41 = vld [vmem:[#allocation5 + $0x1c40] sm:$0xff] }
 0x149   :  { %3119 = vmatprep.subr.mxu1 %v2767_v13  ;;  %v935_v35 = vxor.u32 2147483648, %v5259_v38  ;;  %3141 = vmatpush1.msra.mxu0 %v1944_v30  ;;  %v813_v5 = vor.u32 4788187, %v812_v27  ;;  %v816_v13 = vcvt.s32.f32 %v809_v23  ;;  %v2726_v23 = vld [vmem:[#allocation5 + $0x1c00] sm:$0xff] }
 0x14a   :  { %3120 = vmatpush2.msra.mxu1 %v2766_v48  ;;  %v939_v8 = vsel %vm937_vm13, %v938_v18, %v5259_v38  ;;  %3142 = vmatprep.subr.mxu0 %v1937_v58  ;;  %v2735_v48 = vld [vmem:[#allocation5 + $0x1c48] sm:$0xff] }
 0x14b   :  { %3121 = vmatprep.subr.mxu1 %v2759_v24  ;;  %v936_v33 = vsel %vm934_vm14, %v5257_v3, %v935_v35  ;;  %3143 = vmatpush1.msra.mxu0 %v1936_v49  ;;  %v814_v24 = vand.u32 2147483647, %v813_v5  ;;  %v2727_v49 = vld [vmem:[#allocation5 + $0x1c08] sm:$0xff]  ;;  %v1897_v5 = vld [vmem:[#allocation5 + $0x218] sm:$0xff] }
 0x14c   :  { %3122 = vmatpush2.msra.mxu1 %v2758_v14  ;;  %v940_v31 = vsel %vm933_vm1, %v936_v33, %v939_v8  ;;  %3144 = vmatprep.subr.mxu0 %v1929_v43  ;;  %v1912_v14 = vld [vmem:[#allocation5 + $0x290] sm:$0xff]  ;;  %v820_v43 = vsub.s32 4, %v5224_v44  ;;  %v2209_v8 = vld [vmem:[#allocation5 + $0xbd8] sm:$0xff] }
 0x14d   :  { %3123 = vmatprep.subr.mxu1 %v2751_v52  ;;  %v941_v30 = vsel %vm930_vm2, nan, %v940_v31  ;;  %3145 = vmatpush1.msra.mxu0 %v1928_v50  ;;  %v817_v52 = vmul.f32 %v816_v13, %v814_v24  ;;  %v5491_v50 = vand.u32 2147483647, %v5029_v60  ;;  %v1896_v13 = vld [vmem:[#allocation5 + $0x210] sm:$0xff] }
 0x14e   :  { %3124 = vmatpush2.msra.mxu1 %v2750_v57  ;;  %v1773_v58 = vand.u32 2147483647, %v941_v30  ;;  %3146 = vmatprep.subr.mxu0 %v1921_v9  ;;  %v1904_v57 = vld [vmem:[#allocation5 + $0x250] sm:$0xff]  ;;  %v821_v31 = vsel %vm736_vm5, %v820_v43, %v5224_v44  ;;  %v1881_v30 = vld [vmem:[#allocation5 + $0x198] sm:$0xff] }
 0x14f   :  { %3125 = vmatprep.subr.mxu1 %v2743_v61  ;;  %3147 = vmatpush1.msra.mxu0 %v1920_v45  ;;  %vm5279_vm6 = vcmp.le.f32.partialorder %v5491_v50, 0.7853982  ;;  %v818_v33 = vxor.u32 2147483648, %v817_v52  ;;  %v1880_v24 = vld [vmem:[#allocation5 + $0x190] sm:$0xff]  ;;  %v1873_v44 = vld [vmem:[#allocation5 + $0x158] sm:$0xff] }
 0x150   :  { %3126 = vmatpush2.msra.mxu1 %v2742_v10  ;;  %v1781_v27 = vadd.f32 1e-06, %v1773_v58  ;;  %3148 = vmatprep.subr.mxu0 %v1913_v63  ;;  %v1889_v10 = vld [vmem:[#allocation5 + $0x1d8] sm:$0xff]  ;;  %v5294_v63 = vsel %vm5279_vm6, 0, %v821_v31  ;;  %v1848_v43 = vld [vmem:[#allocation5 + $0x90] sm:$0xff] }
 0x151   :  { %3127 = vmatprep.subr.mxu1 %v2735_v48  ;;  %3149 = vmatpush1.msra.mxu0 %v1912_v14  ;;  %v819_v9 = vsel %vm736_vm5, %v818_v33, %v817_v52  ;;  %v1888_v48 = vld [vmem:[#allocation5 + $0x1d0] sm:$0xff]  ;;  %v1865_v58 = vld [vmem:[#allocation5 + $0x118] sm:$0xff]  ;;  %v827_v14 = vadd.s32 3, %v5294_v63 }
 0x152   :  { %3128 = vmatpush2.msra.mxu1 %v2734_v41  ;;  %4255 = vlog2.f32 %v1781_v27  ;;  %3150 = vmatprep.subr.mxu0 %v1905_v25  ;;  %v822_v45 = vsel %vm5279_vm6, %v5029_v60, %v819_v9  ;;  %v1872_v41 = vld [vmem:[#allocation5 + $0x150] sm:$0xff]  ;;  %v1857_v52 = vld [vmem:[#allocation5 + $0xd8] sm:$0xff] }
 0x153   :  { %3129 = vmatprep.subr.mxu1 %v2727_v49  ;;  %3151 = vmatpush1.msra.mxu0 %v1904_v57  ;;  %4257 = vcosq.f32 %v822_v45  ;;  %v1864_v49 = vld [vmem:[#allocation5 + $0x110] sm:$0xff]  ;;  %v828_v27 = vand.u32 3, %v827_v14  ;;  %v1833_v33 = vld [vmem:[#allocation5 + $0x18] sm:$0xff] }
 0x154   :  { %3130 = vmatpush2.msra.mxu1 %v2726_v23  ;;  %3152 = vmatprep.subr.mxu0 %v1897_v5  ;;  %4259 = vsinq.f32 %v822_v45  ;;  %v1856_v25 = vld [vmem:[#allocation5 + $0xd0] sm:$0xff]  ;;  %v1849_v23 = vld [vmem:[#allocation5 + $0x98] sm:$0xff] }
 0x155   :  { %3209 = vmatprep.subr.mxu1 %v2209_v8  ;;  %3153 = vmatpush1.msra.mxu0 %v1896_v13  ;;  %v1841_v8 = vld [vmem:[#allocation5 + $0x58] sm:$0xff]  ;;  %v1840_v61 = vld [vmem:[#allocation5 + $0x50] sm:$0xff]  ;;  %vm833_vm8 = vcmp.eq.s32.totalorder %v828_v27, 2  ;;  %vm830_vm9 = vcmp.eq.s32.totalorder %v828_v27, 0  ;;  %vm829_vm10 = vcmp.lt.s32.totalorder %v828_v27, 2 }
 0x156   :  { %3202 = vmatprep.mubr.f32.mxu0 %v4809_v19  ;;  %3154 = vmatprep.subr.mxu0 %v1889_v10  ;;  %v1832_v13 = vld [vmem:[#allocation5 + $0x10] sm:$0xff]  ;;  %v2081_v31 = vld [vmem:[#allocation5 + $0x7d8] sm:$0xff] }
 0x157   :  { %3155 = vmatpush1.msra.mxu0 %v1888_v48  ;;  %v2080_v48 = vld [vmem:[#allocation5 + $0x7d0] sm:$0xff]  ;;  %v2065_v14 = vld [vmem:[#allocation5 + $0x758] sm:$0xff] }
 0x158   :  { %3156 = vmatprep.subr.mxu0 %v1881_v30  ;;  %v2056_v27 = vld [vmem:[#allocation5 + $0x710] sm:$0xff] }
 0x159   :  { %3157 = vmatpush1.msra.mxu0 %v1880_v24  ;;  %v2073_v24 = vld [vmem:[#allocation5 + $0x798] sm:$0xff] }
 0x15a   :  { %3158 = vmatprep.subr.mxu0 %v1873_v44 }
 0x15b   :  { %3159 = vmatpush1.msra.mxu0 %v1872_v41  ;;  %v2072_v41 = vld [vmem:[#allocation5 + $0x790] sm:$0xff] }
 0x15c   :  { %3160 = vmatprep.subr.mxu0 %v1865_v58 }
 0x15d   :  { %3161 = vmatpush1.msra.mxu0 %v1864_v49 }
 0x15e   :  { %3162 = vmatprep.subr.mxu0 %v1857_v52  ;;  %v2064_v52 = vld [vmem:[#allocation5 + $0x750] sm:$0xff] }
 0x15f   :  { %v4256_v57 = vpop.eup %4255  ;;  %3163 = vmatpush1.msra.mxu0 %v1856_v25 }
 0x160   :  { %v5297_v50 = vmul.f32 0.6931472, %v4256_v57  ;;  %3164 = vmatprep.subr.mxu0 %v1849_v23  ;;  %v5299_v5 = vpop.eup %4257  ;;  %v2057_v23 = vld [vmem:[#allocation5 + $0x718] sm:$0xff] }
 0x161   :  { %3165 = vmatpush1.msra.mxu0 %v1848_v43  ;;  %v5302_v9 = vpop.eup %4259  ;;  %v834_v10 = vxor.u32 2147483648, %v5299_v5  ;;  %v2049_v57 = vld [vmem:[#allocation5 + $0x6d8] sm:$0xff] }
 0x162   :  { %3131 = vmatprep.mubr.f32.mxu1 %v5297_v50  ;;  %3166 = vmatprep.subr.mxu0 %v1841_v8  ;;  %v831_v45 = vxor.u32 2147483648, %v5302_v9  ;;  %v2048_v8 = vld [vmem:[#allocation5 + $0x6d0] sm:$0xff] }
 0x163   :  { %3167 = vmatpush1.msra.mxu0 %v1840_v61  ;;  %v835_v30 = vsel %vm833_vm8, %v834_v10, %v5302_v9  ;;  %v2041_v61 = vld [vmem:[#allocation5 + $0x698] sm:$0xff] }
 0x164   :  { %3168 = vmatprep.subr.mxu0 %v1833_v33  ;;  %v832_v44 = vsel %vm830_vm9, %v5299_v5, %v831_v45  ;;  %v2040_v33 = vld [vmem:[#allocation5 + $0x690] sm:$0xff] }
 0x165   :  { %3169 = vmatpush1.msra.mxu0 %v1832_v13  ;;  %v836_v58 = vsel %vm829_vm10, %v832_v44, %v835_v30  ;;  %v2033_v13 = vld [vmem:[#allocation5 + $0x658] sm:$0xff]  ;;  %v2024_v30 = vld [vmem:[#allocation5 + $0x610] sm:$0xff] }
 0x166   :  { %3170 = vmatprep.subr.mxu0 %v2081_v31  ;;  %v837_v49 = vsel %vm826_vm11, nan, %v836_v58  ;;  %v2032_v31 = vld [vmem:[#allocation5 + $0x650] sm:$0xff] }
 0x167   :  { %3171 = vmatpush2.msra.mxu0 %v2080_v48  ;;  %v1772_v25 = vand.u32 2147483647, %v837_v49  ;;  %v2025_v48 = vld [vmem:[#allocation5 + $0x618] sm:$0xff]  ;;  %v2016_v44 = vld [vmem:[#allocation5 + $0x5d0] sm:$0xff] }
 0x168   :  { %3172 = vmatprep.subr.mxu0 %v2073_v24  ;;  %v2017_v24 = vld [vmem:[#allocation5 + $0x5d8] sm:$0xff]  ;;  %v2008_v58 = vld [vmem:[#allocation5 + $0x590] sm:$0xff] }
 0x169   :  { %3173 = vmatpush2.msra.mxu0 %v2072_v41  ;;  %v1780_v43 = vadd.f32 1e-06, %v1772_v25  ;;  %v2009_v41 = vld [vmem:[#allocation5 + $0x598] sm:$0xff]  ;;  %v2000_v49 = vld [vmem:[#allocation5 + $0x550] sm:$0xff] }
 0x16a   :  { %3174 = vmatprep.subr.mxu0 %v2065_v14  ;;  %v2001_v14 = vld [vmem:[#allocation5 + $0x558] sm:$0xff] }
 0x16b   :  { %3175 = vmatpush2.msra.mxu0 %v2064_v52  ;;  %4261 = vlog2.f32 %v1780_v43  ;;  %v1993_v52 = vld [vmem:[#allocation5 + $0x518] sm:$0xff]  ;;  %v2208_v43 = vld [vmem:[#allocation5 + $0xbd0] sm:$0xff] }
 0x16c   :  { %3176 = vmatprep.subr.mxu0 %v2057_v23  ;;  %v1992_v23 = vld [vmem:[#allocation5 + $0x510] sm:$0xff] }
 0x16d   :  { %3177 = vmatpush2.msra.mxu0 %v2056_v27 }
 0x16e   :  { %3178 = vmatprep.subr.mxu0 %v2049_v57  ;;  %v1985_v57 = vld [vmem:[#allocation5 + $0x4d8] sm:$0xff] }
 0x16f   :  { %3179 = vmatpush2.msra.mxu0 %v2048_v8  ;;  %v2201_v8 = vld [vmem:[#allocation5 + $0xb98] sm:$0xff] }
 0x170   :  { %3180 = vmatprep.subr.mxu0 %v2041_v61  ;;  %v1984_v61 = vld [vmem:[#allocation5 + $0x4d0] sm:$0xff] }
 0x171   :  { %3181 = vmatpush2.msra.mxu0 %v2040_v33  ;;  %v2200_v33 = vld [vmem:[#allocation5 + $0xb90] sm:$0xff] }
 0x172   :  { %3182 = vmatprep.subr.mxu0 %v2033_v13  ;;  %v1977_v13 = vld [vmem:[#allocation5 + $0x498] sm:$0xff] }
 0x173   :  { %3183 = vmatpush2.msra.mxu0 %v2032_v31  ;;  %v2193_v31 = vld [vmem:[#allocation5 + $0xb58] sm:$0xff] }
 0x174   :  { %3184 = vmatprep.subr.mxu0 %v2025_v48  ;;  %v1976_v48 = vld [vmem:[#allocation5 + $0x490] sm:$0xff] }
 0x175   :  { %3185 = vmatpush2.msra.mxu0 %v2024_v30  ;;  %v2192_v30 = vld [vmem:[#allocation5 + $0xb50] sm:$0xff] }
 0x176   :  { %3186 = vmatprep.subr.mxu0 %v2017_v24  ;;  %v1969_v24 = vld [vmem:[#allocation5 + $0x458] sm:$0xff] }
 0x177   :  { %3187 = vmatpush2.msra.mxu0 %v2016_v44  ;;  %v2185_v44 = vld [vmem:[#allocation5 + $0xb18] sm:$0xff] }
 0x178   :  { %3188 = vmatprep.subr.mxu0 %v2009_v41  ;;  %v4262_v25 = vpop.eup %4261  ;;  %v1968_v41 = vld [vmem:[#allocation5 + $0x450] sm:$0xff] }
 0x179   :  { %3189 = vmatpush2.msra.mxu0 %v2008_v58  ;;  %v5315_v27 = vmul.f32 0.6931472, %v4262_v25  ;;  %v2184_v58 = vld [vmem:[#allocation5 + $0xb10] sm:$0xff] }
 0x17a   :  { %3190 = vmatprep.subr.mxu0 %v2001_v14  ;;  %v1961_v14 = vld [vmem:[#allocation5 + $0x418] sm:$0xff]  ;;  %v2176_v25 = vld [vmem:[#allocation5 + $0xad0] sm:$0xff] }
 0x17b   :  { %3191 = vmatpush2.msra.mxu0 %v2000_v49  ;;  %3132 = vmatmul.mubr.f32.vlgmr.msra.gmra.mxu1 %v5315_v27  ;;  %v2177_v49 = vld [vmem:[#allocation5 + $0xad8] sm:$0xff] }
 0x17c   :  { %3192 = vmatprep.subr.mxu0 %v1993_v52  ;;  %3210 = vmatpush1.msra.mxu1 %v2208_v43  ;;  %v1960_v52 = vld [vmem:[#allocation5 + $0x410] sm:$0xff] }
 0x17d   :  { %3193 = vmatpush2.msra.mxu0 %v1992_v23  ;;  %3211 = vmatprep.subr.mxu1 %v2201_v8  ;;  %v2169_v23 = vld [vmem:[#allocation5 + $0xa98] sm:$0xff]  ;;  %v2168_v43 = vld [vmem:[#allocation5 + $0xa90] sm:$0xff] }
 0x17e   :  { %3194 = vmatprep.subr.mxu0 %v1985_v57  ;;  %3212 = vmatpush1.msra.mxu1 %v2200_v33  ;;  %v2465_v57 = vld [vmem:[#allocation5 + $0x13d8] sm:$0xff]  ;;  %v2160_v33 = vld [vmem:[#allocation5 + $0xa50] sm:$0xff] }
 0x17f   :  { %3195 = vmatpush2.msra.mxu0 %v1984_v61  ;;  %3213 = vmatprep.subr.mxu1 %v2193_v31  ;;  %v2161_v8 = vld [vmem:[#allocation5 + $0xa58] sm:$0xff]  ;;  %v2464_v61 = vld [vmem:[#allocation5 + $0x13d0] sm:$0xff] }
 0x180   :  { %3196 = vmatprep.subr.mxu0 %v1977_v13  ;;  %3214 = vmatpush1.msra.mxu1 %v2192_v30  ;;  %v2457_v13 = vld [vmem:[#allocation5 + $0x1398] sm:$0xff]  ;;  %v2152_v30 = vld [vmem:[#allocation5 + $0xa10] sm:$0xff] }
 0x181   :  { %3197 = vmatpush2.msra.mxu0 %v1976_v48  ;;  %3215 = vmatprep.subr.mxu1 %v2185_v44  ;;  %v2153_v31 = vld [vmem:[#allocation5 + $0xa18] sm:$0xff]  ;;  %v2456_v48 = vld [vmem:[#allocation5 + $0x1390] sm:$0xff] }
 0x182   :  { %3198 = vmatprep.subr.mxu0 %v1969_v24  ;;  %3216 = vmatpush1.msra.mxu1 %v2184_v58  ;;  %v2449_v24 = vld [vmem:[#allocation5 + $0x1358] sm:$0xff]  ;;  %v2144_v58 = vld [vmem:[#allocation5 + $0x9d0] sm:$0xff] }
 0x183   :  { %3199 = vmatpush2.msra.mxu0 %v1968_v41  ;;  %3217 = vmatprep.subr.mxu1 %v2177_v49  ;;  %v2145_v44 = vld [vmem:[#allocation5 + $0x9d8] sm:$0xff]  ;;  %v2448_v41 = vld [vmem:[#allocation5 + $0x1350] sm:$0xff] }
 0x184   :  { %3200 = vmatprep.subr.mxu0 %v1961_v14  ;;  %3218 = vmatpush1.msra.mxu1 %v2176_v25  ;;  %v2441_v14 = vld [vmem:[#allocation5 + $0x1318] sm:$0xff]  ;;  %v2136_v25 = vld [vmem:[#allocation5 + $0x990] sm:$0xff] }
 0x185   :  { %3201 = vmatpush2.msra.mxu0 %v1960_v52  ;;  %3219 = vmatprep.subr.mxu1 %v2169_v23  ;;  %v2137_v49 = vld [vmem:[#allocation5 + $0x998] sm:$0xff]  ;;  %v2440_v52 = vld [vmem:[#allocation5 + $0x1310] sm:$0xff] }
 0x186   :  { %3203 = vmatmul.mubr.f32.vlgmr.msra.gmra.mxu0 %v4946_v29  ;;  %3273 = vmatprep.mubr.f32.mxu1 %v4848_v12  ;;  %v2433_v23 = vld [vmem:[#allocation5 + $0x12d8] sm:$0xff] }
 0x187   :  { %3220 = vmatpush1.msra.mxu1 %v2168_v43  ;;  %3280 = vmatprep.subr.mxu0 %v2465_v57  ;;  %v2129_v43 = vld [vmem:[#allocation5 + $0x958] sm:$0xff]  ;;  %v2432_v57 = vld [vmem:[#allocation5 + $0x12d0] sm:$0xff] }
 0x188   :  { %3221 = vmatprep.subr.mxu1 %v2161_v8  ;;  %3281 = vmatpush1.msra.mxu0 %v2464_v61  ;;  %v2128_v8 = vld [vmem:[#allocation5 + $0x950] sm:$0xff]  ;;  %v2425_v61 = vld [vmem:[#allocation5 + $0x1298] sm:$0xff] }
 0x189   :  { %3222 = vmatpush1.msra.mxu1 %v2160_v33  ;;  %3282 = vmatprep.subr.mxu0 %v2457_v13  ;;  %v2121_v33 = vld [vmem:[#allocation5 + $0x918] sm:$0xff]  ;;  %v2424_v13 = vld [vmem:[#allocation5 + $0x1290] sm:$0xff] }
 0x18a   :  { %3223 = vmatprep.subr.mxu1 %v2153_v31  ;;  %3283 = vmatpush1.msra.mxu0 %v2456_v48  ;;  %v2120_v31 = vld [vmem:[#allocation5 + $0x910] sm:$0xff]  ;;  %v2417_v48 = vld [vmem:[#allocation5 + $0x1258] sm:$0xff] }
 0x18b   :  { %3224 = vmatpush1.msra.mxu1 %v2152_v30  ;;  %3284 = vmatprep.subr.mxu0 %v2449_v24  ;;  %v2113_v30 = vld [vmem:[#allocation5 + $0x8d8] sm:$0xff]  ;;  %v2416_v24 = vld [vmem:[#allocation5 + $0x1250] sm:$0xff] }
 0x18c   :  { %3225 = vmatprep.subr.mxu1 %v2145_v44  ;;  %3285 = vmatpush1.msra.mxu0 %v2448_v41  ;;  %v2112_v44 = vld [vmem:[#allocation5 + $0x8d0] sm:$0xff]  ;;  %v2409_v41 = vld [vmem:[#allocation5 + $0x1218] sm:$0xff] }
 0x18d   :  { %3226 = vmatpush1.msra.mxu1 %v2144_v58  ;;  %3286 = vmatprep.subr.mxu0 %v2441_v14  ;;  %v2105_v58 = vld [vmem:[#allocation5 + $0x898] sm:$0xff]  ;;  %v2408_v14 = vld [vmem:[#allocation5 + $0x1210] sm:$0xff] }
 0x18e   :  { %3227 = vmatprep.subr.mxu1 %v2137_v49  ;;  %3287 = vmatpush1.msra.mxu0 %v2440_v52  ;;  %v2104_v49 = vld [vmem:[#allocation5 + $0x890] sm:$0xff]  ;;  %v2401_v52 = vld [vmem:[#allocation5 + $0x11d8] sm:$0xff] }
 0x18f   :  { %3228 = vmatpush1.msra.mxu1 %v2136_v25  ;;  %3288 = vmatprep.subr.mxu0 %v2433_v23  ;;  %v2097_v25 = vld [vmem:[#allocation5 + $0x858] sm:$0xff]  ;;  %v2400_v23 = vld [vmem:[#allocation5 + $0x11d0] sm:$0xff] }
 0x190   :  { %3229 = vmatprep.subr.mxu1 %v2129_v43  ;;  %3289 = vmatpush1.msra.mxu0 %v2432_v57  ;;  %v2096_v43 = vld [vmem:[#allocation5 + $0x850] sm:$0xff]  ;;  %v2393_v57 = vld [vmem:[#allocation5 + $0x1198] sm:$0xff] }
 0x191   :  { %3230 = vmatpush1.msra.mxu1 %v2128_v8  ;;  %3290 = vmatprep.subr.mxu0 %v2425_v61  ;;  %v2089_v8 = vld [vmem:[#allocation5 + $0x818] sm:$0xff]  ;;  %v2392_v61 = vld [vmem:[#allocation5 + $0x1190] sm:$0xff] }
 0x192   :  { %3231 = vmatprep.subr.mxu1 %v2121_v33  ;;  %3291 = vmatpush1.msra.mxu0 %v2424_v13  ;;  %v2088_v33 = vld [vmem:[#allocation5 + $0x810] sm:$0xff]  ;;  %v2385_v13 = vld [vmem:[#allocation5 + $0x1158] sm:$0xff] }
 0x193   :  { %3232 = vmatpush1.msra.mxu1 %v2120_v31  ;;  %3292 = vmatprep.subr.mxu0 %v2417_v48  ;;  %v2337_v31 = vld [vmem:[#allocation5 + $0xfd8] sm:$0xff]  ;;  %v2384_v48 = vld [vmem:[#allocation5 + $0x1150] sm:$0xff] }
 0x194   :  { %3233 = vmatprep.subr.mxu1 %v2113_v30  ;;  %3293 = vmatpush1.msra.mxu0 %v2416_v24  ;;  %v2336_v30 = vld [vmem:[#allocation5 + $0xfd0] sm:$0xff]  ;;  %v2377_v24 = vld [vmem:[#allocation5 + $0x1118] sm:$0xff] }
 0x195   :  { %3234 = vmatpush1.msra.mxu1 %v2112_v44  ;;  %3294 = vmatprep.subr.mxu0 %v2409_v41  ;;  %v2329_v44 = vld [vmem:[#allocation5 + $0xf98] sm:$0xff]  ;;  %v2376_v41 = vld [vmem:[#allocation5 + $0x1110] sm:$0xff] }
 0x196   :  { %3235 = vmatprep.subr.mxu1 %v2105_v58  ;;  %3295 = vmatpush1.msra.mxu0 %v2408_v14  ;;  %v2328_v58 = vld [vmem:[#allocation5 + $0xf90] sm:$0xff]  ;;  %v2369_v14 = vld [vmem:[#allocation5 + $0x10d8] sm:$0xff] }
 0x197   :  { %3236 = vmatpush1.msra.mxu1 %v2104_v49  ;;  %3296 = vmatprep.subr.mxu0 %v2401_v52  ;;  %v2321_v49 = vld [vmem:[#allocation5 + $0xf58] sm:$0xff]  ;;  %v2368_v52 = vld [vmem:[#allocation5 + $0x10d0] sm:$0xff] }
 0x198   :  { %3237 = vmatprep.subr.mxu1 %v2097_v25  ;;  %3297 = vmatpush1.msra.mxu0 %v2400_v23  ;;  %v2320_v25 = vld [vmem:[#allocation5 + $0xf50] sm:$0xff]  ;;  %v2361_v23 = vld [vmem:[#allocation5 + $0x1098] sm:$0xff] }
 0x199   :  { %3238 = vmatpush1.msra.mxu1 %v2096_v43  ;;  %3298 = vmatprep.subr.mxu0 %v2393_v57  ;;  %v2313_v43 = vld [vmem:[#allocation5 + $0xf18] sm:$0xff]  ;;  %v2360_v57 = vld [vmem:[#allocation5 + $0x1090] sm:$0xff] }
 0x19a   :  { %3239 = vmatprep.subr.mxu1 %v2089_v8  ;;  %3299 = vmatpush1.msra.mxu0 %v2392_v61  ;;  %v2312_v8 = vld [vmem:[#allocation5 + $0xf10] sm:$0xff]  ;;  %v2353_v61 = vld [vmem:[#allocation5 + $0x1058] sm:$0xff] }
 0x19b   :  { %3240 = vmatpush1.msra.mxu1 %v2088_v33  ;;  %3300 = vmatprep.subr.mxu0 %v2385_v13  ;;  %v2305_v33 = vld [vmem:[#allocation5 + $0xed8] sm:$0xff]  ;;  %v2352_v13 = vld [vmem:[#allocation5 + $0x1050] sm:$0xff] }
 0x19c   :  { %3241 = vmatprep.subr.mxu1 %v2337_v31  ;;  %3301 = vmatpush1.msra.mxu0 %v2384_v48  ;;  %v2304_v31 = vld [vmem:[#allocation5 + $0xed0] sm:$0xff]  ;;  %v2345_v48 = vld [vmem:[#allocation5 + $0x1018] sm:$0xff] }
 0x19d   :  { %3242 = vmatpush2.msra.mxu1 %v2336_v30  ;;  %3302 = vmatprep.subr.mxu0 %v2377_v24  ;;  %v2297_v30 = vld [vmem:[#allocation5 + $0xe98] sm:$0xff]  ;;  %v2344_v24 = vld [vmem:[#allocation5 + $0x1010] sm:$0xff] }
 0x19e   :  { %3243 = vmatprep.subr.mxu1 %v2329_v44  ;;  %3303 = vmatpush1.msra.mxu0 %v2376_v41  ;;  %v2296_v44 = vld [vmem:[#allocation5 + $0xe90] sm:$0xff]  ;;  %v2593_v41 = vld [vmem:[#allocation5 + $0x17d8] sm:$0xff] }
 0x19f   :  { %3244 = vmatpush2.msra.mxu1 %v2328_v58  ;;  %3304 = vmatprep.subr.mxu0 %v2369_v14  ;;  %v2289_v58 = vld [vmem:[#allocation5 + $0xe58] sm:$0xff]  ;;  %v2592_v14 = vld [vmem:[#allocation5 + $0x17d0] sm:$0xff] }
 0x1a0   :  { %3245 = vmatprep.subr.mxu1 %v2321_v49  ;;  %3305 = vmatpush1.msra.mxu0 %v2368_v52  ;;  %v2288_v49 = vld [vmem:[#allocation5 + $0xe50] sm:$0xff]  ;;  %v2585_v52 = vld [vmem:[#allocation5 + $0x1798] sm:$0xff] }
 0x1a1   :  { %3246 = vmatpush2.msra.mxu1 %v2320_v25  ;;  %3306 = vmatprep.subr.mxu0 %v2361_v23  ;;  %v2281_v25 = vld [vmem:[#allocation5 + $0xe18] sm:$0xff]  ;;  %v2584_v23 = vld [vmem:[#allocation5 + $0x1790] sm:$0xff] }
 0x1a2   :  { %3247 = vmatprep.subr.mxu1 %v2313_v43  ;;  %3307 = vmatpush1.msra.mxu0 %v2360_v57  ;;  %v2280_v43 = vld [vmem:[#allocation5 + $0xe10] sm:$0xff]  ;;  %v2577_v57 = vld [vmem:[#allocation5 + $0x1758] sm:$0xff] }
 0x1a3   :  { %3248 = vmatpush2.msra.mxu1 %v2312_v8  ;;  %3308 = vmatprep.subr.mxu0 %v2353_v61  ;;  %v2273_v8 = vld [vmem:[#allocation5 + $0xdd8] sm:$0xff]  ;;  %v2576_v61 = vld [vmem:[#allocation5 + $0x1750] sm:$0xff] }
 0x1a4   :  { %3249 = vmatprep.subr.mxu1 %v2305_v33  ;;  %3309 = vmatpush1.msra.mxu0 %v2352_v13  ;;  %v2272_v33 = vld [vmem:[#allocation5 + $0xdd0] sm:$0xff]  ;;  %v2569_v13 = vld [vmem:[#allocation5 + $0x1718] sm:$0xff] }
 0x1a5   :  { %3250 = vmatpush2.msra.mxu1 %v2304_v31  ;;  %3310 = vmatprep.subr.mxu0 %v2345_v48  ;;  %v2265_v31 = vld [vmem:[#allocation5 + $0xd98] sm:$0xff]  ;;  %v2568_v48 = vld [vmem:[#allocation5 + $0x1710] sm:$0xff] }
 0x1a6   :  { %3251 = vmatprep.subr.mxu1 %v2297_v30  ;;  %3311 = vmatpush1.msra.mxu0 %v2344_v24  ;;  %v2264_v30 = vld [vmem:[#allocation5 + $0xd90] sm:$0xff]  ;;  %v2561_v24 = vld [vmem:[#allocation5 + $0x16d8] sm:$0xff] }
 0x1a7   :  { %3252 = vmatpush2.msra.mxu1 %v2296_v44  ;;  %3312 = vmatprep.subr.mxu0 %v2593_v41  ;;  %v2257_v44 = vld [vmem:[#allocation5 + $0xd58] sm:$0xff]  ;;  %v2560_v41 = vld [vmem:[#allocation5 + $0x16d0] sm:$0xff] }
 0x1a8   :  { %3253 = vmatprep.subr.mxu1 %v2289_v58  ;;  %3313 = vmatpush2.msra.mxu0 %v2592_v14  ;;  %v2256_v58 = vld [vmem:[#allocation5 + $0xd50] sm:$0xff]  ;;  %v2553_v14 = vld [vmem:[#allocation5 + $0x1698] sm:$0xff] }
 0x1a9   :  { %3254 = vmatpush2.msra.mxu1 %v2288_v49  ;;  %3314 = vmatprep.subr.mxu0 %v2585_v52  ;;  %v2249_v49 = vld [vmem:[#allocation5 + $0xd18] sm:$0xff]  ;;  %v2552_v52 = vld [vmem:[#allocation5 + $0x1690] sm:$0xff] }
 0x1aa   :  { %3255 = vmatprep.subr.mxu1 %v2281_v25  ;;  %3315 = vmatpush2.msra.mxu0 %v2584_v23  ;;  %v2248_v25 = vld [vmem:[#allocation5 + $0xd10] sm:$0xff]  ;;  %v2545_v23 = vld [vmem:[#allocation5 + $0x1658] sm:$0xff] }
 0x1ab   :  { %3256 = vmatpush2.msra.mxu1 %v2280_v43  ;;  %3316 = vmatprep.subr.mxu0 %v2577_v57  ;;  %v2241_v43 = vld [vmem:[#allocation5 + $0xcd8] sm:$0xff]  ;;  %v2544_v57 = vld [vmem:[#allocation5 + $0x1650] sm:$0xff] }
 0x1ac   :  { %3257 = vmatprep.subr.mxu1 %v2273_v8  ;;  %3317 = vmatpush2.msra.mxu0 %v2576_v61  ;;  %v2240_v8 = vld [vmem:[#allocation5 + $0xcd0] sm:$0xff]  ;;  %v2537_v61 = vld [vmem:[#allocation5 + $0x1618] sm:$0xff] }
 0x1ad   :  { %3258 = vmatpush2.msra.mxu1 %v2272_v33  ;;  %3318 = vmatprep.subr.mxu0 %v2569_v13  ;;  %v2233_v33 = vld [vmem:[#allocation5 + $0xc98] sm:$0xff]  ;;  %v2536_v13 = vld [vmem:[#allocation5 + $0x1610] sm:$0xff] }
 0x1ae   :  { %3259 = vmatprep.subr.mxu1 %v2265_v31  ;;  %3319 = vmatpush2.msra.mxu0 %v2568_v48  ;;  %v2232_v31 = vld [vmem:[#allocation5 + $0xc90] sm:$0xff]  ;;  %v2529_v48 = vld [vmem:[#allocation5 + $0x15d8] sm:$0xff] }
 0x1af   :  { %3260 = vmatpush2.msra.mxu1 %v2264_v30  ;;  %3320 = vmatprep.subr.mxu0 %v2561_v24  ;;  %v2225_v30 = vld [vmem:[#allocation5 + $0xc58] sm:$0xff]  ;;  %v2528_v24 = vld [vmem:[#allocation5 + $0x15d0] sm:$0xff] }
 0x1b0   :  { %3261 = vmatprep.subr.mxu1 %v2257_v44  ;;  %3321 = vmatpush2.msra.mxu0 %v2560_v41  ;;  %v2224_v44 = vld [vmem:[#allocation5 + $0xc50] sm:$0xff]  ;;  %v2521_v41 = vld [vmem:[#allocation5 + $0x1598] sm:$0xff] }
 0x1b1   :  { %3262 = vmatpush2.msra.mxu1 %v2256_v58  ;;  %3322 = vmatprep.subr.mxu0 %v2553_v14  ;;  %v2217_v58 = vld [vmem:[#allocation5 + $0xc18] sm:$0xff]  ;;  %v2520_v14 = vld [vmem:[#allocation5 + $0x1590] sm:$0xff] }
 0x1b2   :  { %3263 = vmatprep.subr.mxu1 %v2249_v49  ;;  %3323 = vmatpush2.msra.mxu0 %v2552_v52  ;;  %v2216_v49 = vld [vmem:[#allocation5 + $0xc10] sm:$0xff]  ;;  %v2513_v52 = vld [vmem:[#allocation5 + $0x1558] sm:$0xff] }
 0x1b3   :  { %3264 = vmatpush2.msra.mxu1 %v2248_v25  ;;  %3324 = vmatprep.subr.mxu0 %v2545_v23  ;;  %v2721_v25 = vld [vmem:[#allocation5 + $0x1bd8] sm:$0xff]  ;;  %v2720_v23 = vld [vmem:[#allocation5 + $0x1bd0] sm:$0xff] }
 0x1b4   :  { %3265 = vmatprep.subr.mxu1 %v2241_v43  ;;  %3325 = vmatpush2.msra.mxu0 %v2544_v57  ;;  %v2512_v43 = vld [vmem:[#allocation5 + $0x1550] sm:$0xff]  ;;  %v2713_v57 = vld [vmem:[#allocation5 + $0x1b98] sm:$0xff] }
 0x1b5   :  { %3266 = vmatpush2.msra.mxu1 %v2240_v8  ;;  %3326 = vmatprep.subr.mxu0 %v2537_v61  ;;  %v2505_v8 = vld [vmem:[#allocation5 + $0x1518] sm:$0xff]  ;;  %v2712_v61 = vld [vmem:[#allocation5 + $0x1b90] sm:$0xff] }
 0x1b6   :  { %3267 = vmatprep.subr.mxu1 %v2233_v33  ;;  %3327 = vmatpush2.msra.mxu0 %v2536_v13  ;;  %v2504_v33 = vld [vmem:[#allocation5 + $0x1510] sm:$0xff]  ;;  %v2705_v13 = vld [vmem:[#allocation5 + $0x1b58] sm:$0xff] }
 0x1b7   :  { %3268 = vmatpush2.msra.mxu1 %v2232_v31  ;;  %3328 = vmatprep.subr.mxu0 %v2529_v48  ;;  %v2497_v31 = vld [vmem:[#allocation5 + $0x14d8] sm:$0xff]  ;;  %v2704_v48 = vld [vmem:[#allocation5 + $0x1b50] sm:$0xff] }
 0x1b8   :  { %3269 = vmatprep.subr.mxu1 %v2225_v30  ;;  %3329 = vmatpush2.msra.mxu0 %v2528_v24  ;;  %v2496_v30 = vld [vmem:[#allocation5 + $0x14d0] sm:$0xff]  ;;  %v2697_v24 = vld [vmem:[#allocation5 + $0x1b18] sm:$0xff] }
 0x1b9   :  { %3270 = vmatpush2.msra.mxu1 %v2224_v44  ;;  %3330 = vmatprep.subr.mxu0 %v2521_v41  ;;  %v2489_v44 = vld [vmem:[#allocation5 + $0x1498] sm:$0xff]  ;;  %v2696_v41 = vld [vmem:[#allocation5 + $0x1b10] sm:$0xff] }
 0x1ba   :  { %3271 = vmatprep.subr.mxu1 %v2217_v58  ;;  %3331 = vmatpush2.msra.mxu0 %v2520_v14  ;;  %v2488_v58 = vld [vmem:[#allocation5 + $0x1490] sm:$0xff]  ;;  %v2689_v14 = vld [vmem:[#allocation5 + $0x1ad8] sm:$0xff] }
 0x1bb   :  { %3272 = vmatpush2.msra.mxu1 %v2216_v49  ;;  %3332 = vmatprep.subr.mxu0 %v2513_v52  ;;  %v2481_v49 = vld [vmem:[#allocation5 + $0x1458] sm:$0xff]  ;;  %v2688_v52 = vld [vmem:[#allocation5 + $0x1ad0] sm:$0xff] }
 0x1bc   :  { %3351 = vmatprep.subr.mxu1 %v2721_v25  ;;  %3274 = vmatmul.mubr.f32.vlgmr.msra.gmra.mxu1 %v5072_v51  ;;  %v2480_v25 = vld [vmem:[#allocation5 + $0x1450] sm:$0xff] }
 0x1bd   :  { %3352 = vmatpush1.msra.mxu1 %v2720_v23  ;;  %3333 = vmatpush2.msra.mxu0 %v2512_v43  ;;  %v2681_v23 = vld [vmem:[#allocation5 + $0x1a98] sm:$0xff] }
 0x1be   :  { %3353 = vmatprep.subr.mxu1 %v2713_v57  ;;  %3334 = vmatprep.subr.mxu0 %v2505_v8  ;;  %v2473_v43 = vld [vmem:[#allocation5 + $0x1418] sm:$0xff]  ;;  %v2680_v57 = vld [vmem:[#allocation5 + $0x1a90] sm:$0xff] }
 0x1bf   :  { %3354 = vmatpush1.msra.mxu1 %v2712_v61  ;;  %3335 = vmatpush2.msra.mxu0 %v2504_v33  ;;  %v2472_v8 = vld [vmem:[#allocation5 + $0x1410] sm:$0xff]  ;;  %v2673_v61 = vld [vmem:[#allocation5 + $0x1a58] sm:$0xff] }
 0x1c0   :  { %3355 = vmatprep.subr.mxu1 %v2705_v13  ;;  %3336 = vmatprep.subr.mxu0 %v2497_v31  ;;  %v2672_v33 = vld [vmem:[#allocation5 + $0x1a50] sm:$0xff]  ;;  %v2665_v13 = vld [vmem:[#allocation5 + $0x1a18] sm:$0xff] }
 0x1c1   :  { %3356 = vmatpush1.msra.mxu1 %v2704_v48  ;;  %3337 = vmatpush2.msra.mxu0 %v2496_v30  ;;  %v2664_v31 = vld [vmem:[#allocation5 + $0x1a10] sm:$0xff]  ;;  %v1955_v48 = vld [vmem:[#allocation5 + $0x3e8] sm:$0xff]  ;;  %v2657_v30 = vld [vmem:[#allocation5 + $0x19d8] sm:$0xff] }
 0x1c2   :  { %3357 = vmatprep.subr.mxu1 %v2697_v24  ;;  %3338 = vmatprep.subr.mxu0 %v2489_v44  ;;  %v1954_v24 = vld [vmem:[#allocation5 + $0x3e0] sm:$0xff]  ;;  %v2656_v44 = vld [vmem:[#allocation5 + $0x19d0] sm:$0xff] }
 0x1c3   :  { %3358 = vmatpush1.msra.mxu1 %v2696_v41  ;;  %3339 = vmatpush2.msra.mxu0 %v2488_v58  ;;  %v1947_v41 = vld [vmem:[#allocation5 + $0x3a8] sm:$0xff]  ;;  %v2649_v58 = vld [vmem:[#allocation5 + $0x1998] sm:$0xff] }
 0x1c4   :  { %3359 = vmatprep.subr.mxu1 %v2689_v14  ;;  %3340 = vmatprep.subr.mxu0 %v2481_v49  ;;  %v1946_v14 = vld [vmem:[#allocation5 + $0x3a0] sm:$0xff]  ;;  %v2648_v49 = vld [vmem:[#allocation5 + $0x1990] sm:$0xff] }
 0x1c5   :  { %3360 = vmatpush1.msra.mxu1 %v2688_v52  ;;  %3341 = vmatpush2.msra.mxu0 %v2480_v25  ;;  %v1939_v52 = vld [vmem:[#allocation5 + $0x368] sm:$0xff]  ;;  %v2641_v25 = vld [vmem:[#allocation5 + $0x1958] sm:$0xff] }
 0x1c6   :  { %3361 = vmatprep.subr.mxu1 %v2681_v23  ;;  %3342 = vmatprep.subr.mxu0 %v2473_v43  ;;  %v1938_v23 = vld [vmem:[#allocation5 + $0x360] sm:$0xff]  ;;  %v2640_v43 = vld [vmem:[#allocation5 + $0x1950] sm:$0xff] }
 0x1c7   :  { %3362 = vmatpush1.msra.mxu1 %v2680_v57  ;;  %3343 = vmatpush2.msra.mxu0 %v2472_v8  ;;  %v1931_v57 = vld [vmem:[#allocation5 + $0x328] sm:$0xff]  ;;  %v2633_v8 = vld [vmem:[#allocation5 + $0x1918] sm:$0xff] }
 0x1c8   :  { %3363 = vmatprep.subr.mxu1 %v2673_v61  ;;  %3344 = vmatprep.mubr.f32.mxu0 %v5220_v16  ;;  %v1930_v61 = vld [vmem:[#allocation5 + $0x320] sm:$0xff] }
 0x1c9   :  { %3364 = vmatpush1.msra.mxu1 %v2672_v33  ;;  %3345 = vmatmul.mubr.f32.vlgmr.msra.gmra.mxu0 %v5253_v36  ;;  %v2632_v33 = vld [vmem:[#allocation5 + $0x1910] sm:$0xff] }
 0x1ca   :  { %3365 = vmatprep.subr.mxu1 %v2665_v13  ;;  %3415 = vmatprep.mubr.f32.mxu1 %v5297_v50  ;;  %v1923_v13 = vld [vmem:[#allocation5 + $0x2e8] sm:$0xff] }
 0x1cb   :  { %3366 = vmatpush1.msra.mxu1 %v2664_v31  ;;  %3422 = vmatprep.subr.mxu0 %v1955_v48  ;;  %v2625_v31 = vld [vmem:[#allocation5 + $0x18d8] sm:$0xff]  ;;  %v1922_v48 = vld [vmem:[#allocation5 + $0x2e0] sm:$0xff] }
 0x1cc   :  { %3367 = vmatprep.subr.mxu1 %v2657_v30  ;;  %3423 = vmatpush1.msra.mxu0 %v1954_v24  ;;  %v2624_v30 = vld [vmem:[#allocation5 + $0x18d0] sm:$0xff]  ;;  %v1915_v24 = vld [vmem:[#allocation5 + $0x2a8] sm:$0xff] }
 0x1cd   :  { %3368 = vmatpush1.msra.mxu1 %v2656_v44  ;;  %3424 = vmatprep.subr.mxu0 %v1947_v41  ;;  %v2617_v44 = vld [vmem:[#allocation5 + $0x1898] sm:$0xff]  ;;  %v1914_v41 = vld [vmem:[#allocation5 + $0x2a0] sm:$0xff] }
 0x1ce   :  { %3369 = vmatprep.subr.mxu1 %v2649_v58  ;;  %3425 = vmatpush1.msra.mxu0 %v1946_v14  ;;  %v2616_v58 = vld [vmem:[#allocation5 + $0x1890] sm:$0xff]  ;;  %v1907_v14 = vld [vmem:[#allocation5 + $0x268] sm:$0xff] }
 0x1cf   :  { %3370 = vmatpush1.msra.mxu1 %v2648_v49  ;;  %3426 = vmatprep.subr.mxu0 %v1939_v52  ;;  %v2609_v49 = vld [vmem:[#allocation5 + $0x1858] sm:$0xff]  ;;  %v1906_v52 = vld [vmem:[#allocation5 + $0x260] sm:$0xff] }
 0x1d0   :  { %3371 = vmatprep.subr.mxu1 %v2641_v25  ;;  %3427 = vmatpush1.msra.mxu0 %v1938_v23  ;;  %v2608_v25 = vld [vmem:[#allocation5 + $0x1850] sm:$0xff]  ;;  %v1899_v23 = vld [vmem:[#allocation5 + $0x228] sm:$0xff] }
 0x1d1   :  { %3372 = vmatpush1.msra.mxu1 %v2640_v43  ;;  %3428 = vmatprep.subr.mxu0 %v1931_v57  ;;  %v2601_v43 = vld [vmem:[#allocation5 + $0x1818] sm:$0xff]  ;;  %v1898_v57 = vld [vmem:[#allocation5 + $0x220] sm:$0xff] }
 0x1d2   :  { %3373 = vmatprep.subr.mxu1 %v2633_v8  ;;  %3429 = vmatpush1.msra.mxu0 %v1930_v61  ;;  %v2600_v8 = vld [vmem:[#allocation5 + $0x1810] sm:$0xff]  ;;  %v1891_v61 = vld [vmem:[#allocation5 + $0x1e8] sm:$0xff] }
 0x1d3   :  { %3374 = vmatpush1.msra.mxu1 %v2632_v33  ;;  %3430 = vmatprep.subr.mxu0 %v1923_v13  ;;  %v2849_v33 = vld [vmem:[#allocation5 + $0x1fd8] sm:$0xff]  ;;  %v1890_v13 = vld [vmem:[#allocation5 + $0x1e0] sm:$0xff] }
 0x1d4   :  { %3375 = vmatprep.subr.mxu1 %v2625_v31  ;;  %3431 = vmatpush1.msra.mxu0 %v1922_v48  ;;  %v2848_v31 = vld [vmem:[#allocation5 + $0x1fd0] sm:$0xff]  ;;  %v1883_v48 = vld [vmem:[#allocation5 + $0x1a8] sm:$0xff] }
 0x1d5   :  { %3376 = vmatpush1.msra.mxu1 %v2624_v30  ;;  %3432 = vmatprep.subr.mxu0 %v1915_v24  ;;  %v2841_v30 = vld [vmem:[#allocation5 + $0x1f98] sm:$0xff]  ;;  %v1882_v24 = vld [vmem:[#allocation5 + $0x1a0] sm:$0xff] }
 0x1d6   :  { %3377 = vmatprep.subr.mxu1 %v2617_v44  ;;  %3433 = vmatpush1.msra.mxu0 %v1914_v41  ;;  %v2840_v44 = vld [vmem:[#allocation5 + $0x1f90] sm:$0xff]  ;;  %v1875_v41 = vld [vmem:[#allocation5 + $0x168] sm:$0xff] }
 0x1d7   :  { %3378 = vmatpush1.msra.mxu1 %v2616_v58  ;;  %3434 = vmatprep.subr.mxu0 %v1907_v14  ;;  %v2833_v58 = vld [vmem:[#allocation5 + $0x1f58] sm:$0xff]  ;;  %v1874_v14 = vld [vmem:[#allocation5 + $0x160] sm:$0xff] }
 0x1d8   :  { %3379 = vmatprep.subr.mxu1 %v2609_v49  ;;  %3435 = vmatpush1.msra.mxu0 %v1906_v52  ;;  %v2832_v49 = vld [vmem:[#allocation5 + $0x1f50] sm:$0xff]  ;;  %v1867_v52 = vld [vmem:[#allocation5 + $0x128] sm:$0xff] }
 0x1d9   :  { %3380 = vmatpush1.msra.mxu1 %v2608_v25  ;;  %3436 = vmatprep.subr.mxu0 %v1899_v23  ;;  %v2825_v25 = vld [vmem:[#allocation5 + $0x1f18] sm:$0xff]  ;;  %v1866_v23 = vld [vmem:[#allocation5 + $0x120] sm:$0xff] }
 0x1da   :  { %3381 = vmatprep.subr.mxu1 %v2601_v43  ;;  %3437 = vmatpush1.msra.mxu0 %v1898_v57  ;;  %v2824_v43 = vld [vmem:[#allocation5 + $0x1f10] sm:$0xff]  ;;  %v1859_v57 = vld [vmem:[#allocation5 + $0xe8] sm:$0xff] }
 0x1db   :  { %3382 = vmatpush1.msra.mxu1 %v2600_v8  ;;  %3438 = vmatprep.subr.mxu0 %v1891_v61  ;;  %v2817_v8 = vld [vmem:[#allocation5 + $0x1ed8] sm:$0xff]  ;;  %v1858_v61 = vld [vmem:[#allocation5 + $0xe0] sm:$0xff] }
 0x1dc   :  { %3383 = vmatprep.subr.mxu1 %v2849_v33  ;;  %3439 = vmatpush1.msra.mxu0 %v1890_v13  ;;  %v2816_v33 = vld [vmem:[#allocation5 + $0x1ed0] sm:$0xff]  ;;  %v1851_v13 = vld [vmem:[#allocation5 + $0xa8] sm:$0xff] }
 0x1dd   :  { %3384 = vmatpush2.msra.mxu1 %v2848_v31  ;;  %3440 = vmatprep.subr.mxu0 %v1883_v48  ;;  %v2809_v31 = vld [vmem:[#allocation5 + $0x1e98] sm:$0xff]  ;;  %v1850_v48 = vld [vmem:[#allocation5 + $0xa0] sm:$0xff] }
 0x1de   :  { %3385 = vmatprep.subr.mxu1 %v2841_v30  ;;  %3441 = vmatpush1.msra.mxu0 %v1882_v24  ;;  %v2808_v30 = vld [vmem:[#allocation5 + $0x1e90] sm:$0xff]  ;;  %v1843_v24 = vld [vmem:[#allocation5 + $0x68] sm:$0xff] }
 0x1df   :  { %3386 = vmatpush2.msra.mxu1 %v2840_v44  ;;  %3442 = vmatprep.subr.mxu0 %v1875_v41  ;;  %v2801_v44 = vld [vmem:[#allocation5 + $0x1e58] sm:$0xff]  ;;  %v1842_v41 = vld [vmem:[#allocation5 + $0x60] sm:$0xff] }
 0x1e0   :  { %3387 = vmatprep.subr.mxu1 %v2833_v58  ;;  %3443 = vmatpush1.msra.mxu0 %v1874_v14  ;;  %v2800_v58 = vld [vmem:[#allocation5 + $0x1e50] sm:$0xff]  ;;  %v1835_v14 = vld [vmem:[#allocation5 + $0x28] sm:$0xff] }
 0x1e1   :  { %3388 = vmatpush2.msra.mxu1 %v2832_v49  ;;  %3444 = vmatprep.subr.mxu0 %v1867_v52  ;;  %v2793_v49 = vld [vmem:[#allocation5 + $0x1e18] sm:$0xff]  ;;  %v1834_v52 = vld [vmem:[#allocation5 + $0x20] sm:$0xff] }
 0x1e2   :  { %3389 = vmatprep.subr.mxu1 %v2825_v25  ;;  %3445 = vmatpush1.msra.mxu0 %v1866_v23  ;;  %v2792_v25 = vld [vmem:[#allocation5 + $0x1e10] sm:$0xff]  ;;  %v2083_v23 = vld [vmem:[#allocation5 + $0x7e8] sm:$0xff] }
 0x1e3   :  { %3390 = vmatpush2.msra.mxu1 %v2824_v43  ;;  %3446 = vmatprep.subr.mxu0 %v1859_v57  ;;  %v2785_v43 = vld [vmem:[#allocation5 + $0x1dd8] sm:$0xff]  ;;  %v2082_v57 = vld [vmem:[#allocation5 + $0x7e0] sm:$0xff] }
 0x1e4   :  { %3391 = vmatprep.subr.mxu1 %v2817_v8  ;;  %3447 = vmatpush1.msra.mxu0 %v1858_v61  ;;  %v2784_v8 = vld [vmem:[#allocation5 + $0x1dd0] sm:$0xff]  ;;  %v2075_v61 = vld [vmem:[#allocation5 + $0x7a8] sm:$0xff] }
 0x1e5   :  { %3392 = vmatpush2.msra.mxu1 %v2816_v33  ;;  %3448 = vmatprep.subr.mxu0 %v1851_v13  ;;  %v2777_v33 = vld [vmem:[#allocation5 + $0x1d98] sm:$0xff]  ;;  %v2074_v13 = vld [vmem:[#allocation5 + $0x7a0] sm:$0xff] }
 0x1e6   :  { %3393 = vmatprep.subr.mxu1 %v2809_v31  ;;  %3449 = vmatpush1.msra.mxu0 %v1850_v48  ;;  %v2776_v31 = vld [vmem:[#allocation5 + $0x1d90] sm:$0xff]  ;;  %v2067_v48 = vld [vmem:[#allocation5 + $0x768] sm:$0xff] }
 0x1e7   :  { %3394 = vmatpush2.msra.mxu1 %v2808_v30  ;;  %3450 = vmatprep.subr.mxu0 %v1843_v24  ;;  %v2769_v30 = vld [vmem:[#allocation5 + $0x1d58] sm:$0xff]  ;;  %v2066_v24 = vld [vmem:[#allocation5 + $0x760] sm:$0xff] }
 0x1e8   :  { %3395 = vmatprep.subr.mxu1 %v2801_v44  ;;  %3451 = vmatpush1.msra.mxu0 %v1842_v41  ;;  %v2768_v44 = vld [vmem:[#allocation5 + $0x1d50] sm:$0xff]  ;;  %v2059_v41 = vld [vmem:[#allocation5 + $0x728] sm:$0xff] }
 0x1e9   :  { %3396 = vmatpush2.msra.mxu1 %v2800_v58  ;;  %3452 = vmatprep.subr.mxu0 %v1835_v14  ;;  %v2761_v58 = vld [vmem:[#allocation5 + $0x1d18] sm:$0xff]  ;;  %v2058_v14 = vld [vmem:[#allocation5 + $0x720] sm:$0xff] }
 0x1ea   :  { %3397 = vmatprep.subr.mxu1 %v2793_v49  ;;  %3453 = vmatpush1.msra.mxu0 %v1834_v52  ;;  %v2760_v49 = vld [vmem:[#allocation5 + $0x1d10] sm:$0xff]  ;;  %v2051_v52 = vld [vmem:[#allocation5 + $0x6e8] sm:$0xff] }
 0x1eb   :  { %3398 = vmatpush2.msra.mxu1 %v2792_v25  ;;  %3454 = vmatprep.subr.mxu0 %v2083_v23  ;;  %v2753_v25 = vld [vmem:[#allocation5 + $0x1cd8] sm:$0xff]  ;;  %v2050_v23 = vld [vmem:[#allocation5 + $0x6e0] sm:$0xff] }
 0x1ec   :  { %3399 = vmatprep.subr.mxu1 %v2785_v43  ;;  %3455 = vmatpush2.msra.mxu0 %v2082_v57  ;;  %v2752_v43 = vld [vmem:[#allocation5 + $0x1cd0] sm:$0xff]  ;;  %v2043_v57 = vld [vmem:[#allocation5 + $0x6a8] sm:$0xff] }
 0x1ed   :  { %3400 = vmatpush2.msra.mxu1 %v2784_v8  ;;  %3456 = vmatprep.subr.mxu0 %v2075_v61  ;;  %v2745_v8 = vld [vmem:[#allocation5 + $0x1c98] sm:$0xff]  ;;  %v2042_v61 = vld [vmem:[#allocation5 + $0x6a0] sm:$0xff] }
 0x1ee   :  { %3401 = vmatprep.subr.mxu1 %v2777_v33  ;;  %3457 = vmatpush2.msra.mxu0 %v2074_v13  ;;  %v2744_v33 = vld [vmem:[#allocation5 + $0x1c90] sm:$0xff]  ;;  %v2035_v13 = vld [vmem:[#allocation5 + $0x668] sm:$0xff] }
 0x1ef   :  { %3402 = vmatpush2.msra.mxu1 %v2776_v31  ;;  %3458 = vmatprep.subr.mxu0 %v2067_v48  ;;  %v2737_v31 = vld [vmem:[#allocation5 + $0x1c58] sm:$0xff]  ;;  %v2034_v48 = vld [vmem:[#allocation5 + $0x660] sm:$0xff] }
 0x1f0   :  { %3403 = vmatprep.subr.mxu1 %v2769_v30  ;;  %3459 = vmatpush2.msra.mxu0 %v2066_v24  ;;  %v2736_v30 = vld [vmem:[#allocation5 + $0x1c50] sm:$0xff]  ;;  %v2027_v24 = vld [vmem:[#allocation5 + $0x628] sm:$0xff] }
 0x1f1   :  { %3404 = vmatpush2.msra.mxu1 %v2768_v44  ;;  %3460 = vmatprep.subr.mxu0 %v2059_v41  ;;  %v2729_v44 = vld [vmem:[#allocation5 + $0x1c18] sm:$0xff]  ;;  %v2026_v41 = vld [vmem:[#allocation5 + $0x620] sm:$0xff] }
 0x1f2   :  { %3405 = vmatprep.subr.mxu1 %v2761_v58  ;;  %3461 = vmatpush2.msra.mxu0 %v2058_v14  ;;  %v2728_v58 = vld [vmem:[#allocation5 + $0x1c10] sm:$0xff]  ;;  %v2019_v14 = vld [vmem:[#allocation5 + $0x5e8] sm:$0xff] }
 0x1f3   :  { %3406 = vmatpush2.msra.mxu1 %v2760_v49  ;;  %3462 = vmatprep.subr.mxu0 %v2051_v52  ;;  %v2211_v49 = vld [vmem:[#allocation5 + $0xbe8] sm:$0xff]  ;;  %v2210_v52 = vld [vmem:[#allocation5 + $0xbe0] sm:$0xff] }
 0x1f4   :  { %3407 = vmatprep.subr.mxu1 %v2753_v25  ;;  %3463 = vmatpush2.msra.mxu0 %v2050_v23  ;;  %v2018_v25 = vld [vmem:[#allocation5 + $0x5e0] sm:$0xff]  ;;  %v2203_v23 = vld [vmem:[#allocation5 + $0xba8] sm:$0xff] }
 0x1f5   :  { %3408 = vmatpush2.msra.mxu1 %v2752_v43  ;;  %3464 = vmatprep.subr.mxu0 %v2043_v57  ;;  %v2011_v43 = vld [vmem:[#allocation5 + $0x5a8] sm:$0xff]  ;;  %v2202_v57 = vld [vmem:[#allocation5 + $0xba0] sm:$0xff] }
 0x1f6   :  { %3409 = vmatprep.subr.mxu1 %v2745_v8  ;;  %3465 = vmatpush2.msra.mxu0 %v2042_v61  ;;  %v2010_v8 = vld [vmem:[#allocation5 + $0x5a0] sm:$0xff]  ;;  %v2195_v61 = vld [vmem:[#allocation5 + $0xb68] sm:$0xff] }
 0x1f7   :  { %3410 = vmatpush2.msra.mxu1 %v2744_v33  ;;  %3466 = vmatprep.subr.mxu0 %v2035_v13  ;;  %v2003_v33 = vld [vmem:[#allocation5 + $0x568] sm:$0xff]  ;;  %v2194_v13 = vld [vmem:[#allocation5 + $0xb60] sm:$0xff] }
 0x1f8   :  { %3411 = vmatprep.subr.mxu1 %v2737_v31  ;;  %3467 = vmatpush2.msra.mxu0 %v2034_v48  ;;  %v2002_v31 = vld [vmem:[#allocation5 + $0x560] sm:$0xff]  ;;  %v2187_v48 = vld [vmem:[#allocation5 + $0xb28] sm:$0xff] }
 0x1f9   :  { %3412 = vmatpush2.msra.mxu1 %v2736_v30  ;;  %3468 = vmatprep.subr.mxu0 %v2027_v24  ;;  %v1995_v30 = vld [vmem:[#allocation5 + $0x528] sm:$0xff]  ;;  %v2186_v24 = vld [vmem:[#allocation5 + $0xb20] sm:$0xff] }
 0x1fa   :  { %3413 = vmatprep.subr.mxu1 %v2729_v44  ;;  %3469 = vmatpush2.msra.mxu0 %v2026_v41  ;;  %v1994_v44 = vld [vmem:[#allocation5 + $0x520] sm:$0xff]  ;;  %v2179_v41 = vld [vmem:[#allocation5 + $0xae8] sm:$0xff] }
 0x1fb   :  { %3414 = vmatpush2.msra.mxu1 %v2728_v58  ;;  %3470 = vmatprep.subr.mxu0 %v2019_v14  ;;  %v1987_v58 = vld [vmem:[#allocation5 + $0x4e8] sm:$0xff]  ;;  %v2178_v14 = vld [vmem:[#allocation5 + $0xae0] sm:$0xff] }
 0x1fc   :  { %3493 = vmatprep.subr.mxu1 %v2211_v49  ;;  %3416 = vmatmul.mubr.f32.vlgmr.msra.gmra.mxu1 %v5315_v27  ;;  %v1986_v49 = vld [vmem:[#allocation5 + $0x4e0] sm:$0xff] }
 0x1fd   :  { %3494 = vmatpush1.msra.mxu1 %v2210_v52  ;;  %3471 = vmatpush2.msra.mxu0 %v2018_v25  ;;  %v2171_v52 = vld [vmem:[#allocation5 + $0xaa8] sm:$0xff] }
 0x1fe   :  { %3495 = vmatprep.subr.mxu1 %v2203_v23  ;;  %3472 = vmatprep.subr.mxu0 %v2011_v43  ;;  %v1979_v25 = vld [vmem:[#allocation5 + $0x4a8] sm:$0xff]  ;;  %v2170_v23 = vld [vmem:[#allocation5 + $0xaa0] sm:$0xff] }
 0x1ff   :  { %3496 = vmatpush1.msra.mxu1 %v2202_v57  ;;  %3473 = vmatpush2.msra.mxu0 %v2010_v8  ;;  %v1978_v43 = vld [vmem:[#allocation5 + $0x4a0] sm:$0xff]  ;;  %v2163_v57 = vld [vmem:[#allocation5 + $0xa68] sm:$0xff] }
 0x200   :  { %3497 = vmatprep.subr.mxu1 %v2195_v61  ;;  %3474 = vmatprep.subr.mxu0 %v2003_v33  ;;  %v1971_v8 = vld [vmem:[#allocation5 + $0x468] sm:$0xff]  ;;  %v2162_v61 = vld [vmem:[#allocation5 + $0xa60] sm:$0xff] }
 0x201   :  { %3498 = vmatpush1.msra.mxu1 %v2194_v13  ;;  %3475 = vmatpush2.msra.mxu0 %v2002_v31  ;;  %v1970_v33 = vld [vmem:[#allocation5 + $0x460] sm:$0xff]  ;;  %v1035_v13 = vand.u32 3, %v4763_v53  ;;  %v2155_v31 = vld [vmem:[#allocation5 + $0xa28] sm:$0xff] }
 0x202   :  { %3499 = vmatprep.subr.mxu1 %v2187_v48  ;;  %3476 = vmatprep.subr.mxu0 %v1995_v30  ;;  %v1963_v48 = vld [vmem:[#allocation5 + $0x428] sm:$0xff]  ;;  %v2154_v30 = vld [vmem:[#allocation5 + $0xa20] sm:$0xff] }
 0x203   :  { %3500 = vmatpush1.msra.mxu1 %v2186_v24  ;;  %3477 = vmatpush2.msra.mxu0 %v1994_v44  ;;  %v1962_v24 = vld [vmem:[#allocation5 + $0x420] sm:$0xff]  ;;  %v1138_v44 = vand.u32 3, %v4595_v20  ;;  %vm1037_vm13 = vcmp.eq.s32.totalorder %v1035_v13, 0  ;;  %vm1040_vm14 = vcmp.eq.s32.totalorder %v1035_v13, 2  ;;  %v2139_v53 = vld [vmem:[#allocation5 + $0x9a8] sm:$0xff]  ;;  %vm1036_vm6 = vcmp.lt.s32.totalorder %v1035_v13, 2 }
 0x204   :  { %3501 = vmatprep.subr.mxu1 %v2179_v41  ;;  %3478 = vmatprep.subr.mxu0 %v1987_v58  ;;  %v2147_v41 = vld [vmem:[#allocation5 + $0x9e8] sm:$0xff]  ;;  %v2146_v58 = vld [vmem:[#allocation5 + $0x9e0] sm:$0xff] }
 0x205   :  { %3502 = vmatpush1.msra.mxu1 %v2178_v14  ;;  %3479 = vmatpush2.msra.mxu0 %v1986_v49  ;;  %v2138_v14 = vld [vmem:[#allocation5 + $0x9a0] sm:$0xff]  ;;  %v2467_v49 = vld [vmem:[#allocation5 + $0x13e8] sm:$0xff]  ;;  %vm1140_vm1 = vcmp.eq.s32.totalorder %v1138_v44, 0  ;;  %vm1143_vm5 = vcmp.eq.s32.totalorder %v1138_v44, 2  ;;  %vm1139_vm8 = vcmp.lt.s32.totalorder %v1138_v44, 2 }
 0x206   :  { %3503 = vmatprep.subr.mxu1 %v2171_v52  ;;  %3480 = vmatprep.subr.mxu0 %v1979_v25  ;;  %v2131_v20 = vld [vmem:[#allocation5 + $0x968] sm:$0xff]  ;;  %v2466_v52 = vld [vmem:[#allocation5 + $0x13e0] sm:$0xff]  ;;  %v5494_v25 = vxor.u32 2147483648, %v4846_v59 }
 0x207   :  { %3504 = vmatpush1.msra.mxu1 %v2170_v23  ;;  %3481 = vmatpush2.msra.mxu0 %v1978_v43  ;;  %v5495_v43 = vxor.u32 2147483648, %v4839_v55  ;;  %v2106_v13 = vld [vmem:[#allocation5 + $0x8a0] sm:$0xff] }
 0x208   :  { %3505 = vmatprep.subr.mxu1 %v2163_v57  ;;  %3482 = vmatprep.subr.mxu0 %v1971_v8  ;;  %v1039_v23 = vsel %vm1037_vm13, %v4839_v55, %v5494_v25  ;;  %v2130_v8 = vld [vmem:[#allocation5 + $0x960] sm:$0xff]  ;;  %v5497_v55 = vxor.u32 2147483648, %v4683_v40  ;;  %v2443_v25 = vld [vmem:[#allocation5 + $0x1328] sm:$0xff] }
 0x209   :  { %3506 = vmatpush1.msra.mxu1 %v2162_v61  ;;  %3483 = vmatpush2.msra.mxu0 %v1970_v33  ;;  %v1042_v57 = vsel %vm1040_vm14, %v5495_v43, %v4846_v59  ;;  %v2459_v61 = vld [vmem:[#allocation5 + $0x13a8] sm:$0xff] }
 0x20a   :  { %3507 = vmatprep.subr.mxu1 %v2155_v31  ;;  %3484 = vmatprep.subr.mxu0 %v1963_v48  ;;  %v2123_v33 = vld [vmem:[#allocation5 + $0x928] sm:$0xff]  ;;  %v2458_v31 = vld [vmem:[#allocation5 + $0x13a0] sm:$0xff]  ;;  %v5496_v48 = vxor.u32 2147483648, %v4693_v0  ;;  %v1145_v59 = vsel %vm1143_vm5, %v5497_v55, %v4693_v0 }
 0x20b   :  { %3508 = vmatpush1.msra.mxu1 %v2154_v30  ;;  %3485 = vmatpush2.msra.mxu0 %v1962_v24  ;;  %v2122_v24 = vld [vmem:[#allocation5 + $0x920] sm:$0xff] }
 0x20c   :  { %3509 = vmatprep.subr.mxu1 %v2147_v41  ;;  %3486 = vmatprep.mubr.f32.mxu0 %v4809_v19  ;;  %v1142_v30 = vsel %vm1140_vm1, %v4683_v40, %v5496_v48  ;;  %v2451_v41 = vld [vmem:[#allocation5 + $0x1368] sm:$0xff]  ;;  %v2442_v0 = vld [vmem:[#allocation5 + $0x1320] sm:$0xff] }
 0x20d   :  { %3510 = vmatpush1.msra.mxu1 %v2146_v58  ;;  %3487 = vmatmul.mubr.f32.vlgmr.msra.gmra.mxu0 %v4946_v29  ;;  %v1043_v58 = vsel %vm1036_vm6, %v1039_v23, %v1042_v57  ;;  %v1146_v43 = vsel %vm1139_vm8, %v1142_v30, %v1145_v59  ;;  %v2107_v40 = vld [vmem:[#allocation5 + $0x8a8] sm:$0xff]  ;;  %v2434_v57 = vld [vmem:[#allocation5 + $0x12e0] sm:$0xff] }
 0x20e   :  { %3511 = vmatprep.subr.mxu1 %v2139_v53  ;;  %3557 = vmatprep.mubr.f32.mxu1 %v4848_v12  ;;  %v2115_v53 = vld [vmem:[#allocation5 + $0x8e8] sm:$0xff]  ;;  %v5354_v44 = vsel %vm306_vm12, nan, %v1146_v43  ;;  %v2090_v48 = vld [vmem:[#allocation5 + $0x820] sm:$0xff] }
 0x20f   :  { %3512 = vmatpush1.msra.mxu1 %v2138_v14  ;;  %3564 = vmatprep.subr.mxu0 %v2467_v49  ;;  %v2450_v14 = vld [vmem:[#allocation5 + $0x1360] sm:$0xff]  ;;  %v2099_v23 = vld [vmem:[#allocation5 + $0x868] sm:$0xff]  ;;  %v1799_v55 = vand.u32 2147483647, %v5354_v44 }
 0x210   :  { %3513 = vmatprep.subr.mxu1 %v2131_v20  ;;  %3565 = vmatpush1.msra.mxu0 %v2466_v52  ;;  %v2114_v49 = vld [vmem:[#allocation5 + $0x8e0] sm:$0xff]  ;;  %v5350_v20 = vsel %vm202_vm3, nan, %v1043_v58  ;;  %v2435_v52 = vld [vmem:[#allocation5 + $0x12e8] sm:$0xff]  ;;  %vm4007_vm3 = vcmp.lt.f32.partialorder %v5354_v44, 0.0 }
 0x211   :  { %3514 = vmatpush1.msra.mxu1 %v2130_v8  ;;  %3566 = vmatprep.subr.mxu0 %v2459_v61  ;;  %v2098_v8 = vld [vmem:[#allocation5 + $0x860] sm:$0xff]  ;;  %v2427_v61 = vld [vmem:[#allocation5 + $0x12a8] sm:$0xff]  ;;  %v1798_v39 = vand.u32 2147483647, %v5350_v20  ;;  %v1807_v43 = vadd.f32 1e-06, %v1799_v55 }
 0x212   :  { %3515 = vmatprep.subr.mxu1 %v2123_v33  ;;  %3567 = vmatpush1.msra.mxu0 %v2458_v31  ;;  %v2091_v33 = vld [vmem:[#allocation5 + $0x828] sm:$0xff]  ;;  %v2426_v31 = vld [vmem:[#allocation5 + $0x12a0] sm:$0xff]  ;;  %vm4006_vm12 = vcmp.lt.f32.partialorder %v5350_v20, 0.0 }
 0x213   :  { %3516 = vmatpush1.msra.mxu1 %v2122_v24  ;;  %3568 = vmatprep.subr.mxu0 %v2451_v41  ;;  %v2419_v30 = vld [vmem:[#allocation5 + $0x1268] sm:$0xff]  ;;  %v2418_v59 = vld [vmem:[#allocation5 + $0x1260] sm:$0xff]  ;;  %v1806_v58 = vadd.f32 1e-06, %v1798_v39 }
 0x214   :  { %3517 = vmatprep.subr.mxu1 %v2115_v53  ;;  %3569 = vmatpush1.msra.mxu0 %v2450_v14  ;;  %v2338_v24 = vld [vmem:[#allocation5 + $0xfe0] sm:$0xff]  ;;  %v2411_v41 = vld [vmem:[#allocation5 + $0x1228] sm:$0xff] }
 0x215   :  { %3518 = vmatpush1.msra.mxu1 %v2114_v49  ;;  %3570 = vmatprep.subr.mxu0 %v2443_v25  ;;  %v2331_v53 = vld [vmem:[#allocation5 + $0xfa8] sm:$0xff]  ;;  %v2410_v14 = vld [vmem:[#allocation5 + $0x1220] sm:$0xff]  ;;  %4263 = vlog2.f32 %v1806_v58 }
 0x216   :  { %3519 = vmatprep.subr.mxu1 %v2107_v40  ;;  %3571 = vmatpush1.msra.mxu0 %v2442_v0  ;;  %v2330_v49 = vld [vmem:[#allocation5 + $0xfa0] sm:$0xff]  ;;  %v2403_v25 = vld [vmem:[#allocation5 + $0x11e8] sm:$0xff]  ;;  %4265 = vlog2.f32 %v1807_v43 }
 0x217   :  { %3520 = vmatpush1.msra.mxu1 %v2106_v13  ;;  %3572 = vmatprep.subr.mxu0 %v2435_v52  ;;  %v2323_v40 = vld [vmem:[#allocation5 + $0xf68] sm:$0xff]  ;;  %v2402_v0 = vld [vmem:[#allocation5 + $0x11e0] sm:$0xff] }
 0x218   :  { %3521 = vmatprep.subr.mxu1 %v2099_v23  ;;  %3573 = vmatpush1.msra.mxu0 %v2434_v57  ;;  %v2322_v13 = vld [vmem:[#allocation5 + $0xf60] sm:$0xff]  ;;  %v2395_v52 = vld [vmem:[#allocation5 + $0x11a8] sm:$0xff] }
 0x219   :  { %3522 = vmatpush1.msra.mxu1 %v2098_v8  ;;  %3574 = vmatprep.subr.mxu0 %v2427_v61  ;;  %v2315_v23 = vld [vmem:[#allocation5 + $0xf28] sm:$0xff]  ;;  %v2394_v57 = vld [vmem:[#allocation5 + $0x11a0] sm:$0xff] }
 0x21a   :  { %3523 = vmatprep.subr.mxu1 %v2091_v33  ;;  %3575 = vmatpush1.msra.mxu0 %v2426_v31  ;;  %v2314_v8 = vld [vmem:[#allocation5 + $0xf20] sm:$0xff]  ;;  %v2387_v61 = vld [vmem:[#allocation5 + $0x1168] sm:$0xff] }
 0x21b   :  { %3524 = vmatpush1.msra.mxu1 %v2090_v48  ;;  %3576 = vmatprep.subr.mxu0 %v2419_v30  ;;  %v2307_v39 = vld [vmem:[#allocation5 + $0xee8] sm:$0xff]  ;;  %v2386_v33 = vld [vmem:[#allocation5 + $0x1160] sm:$0xff] }
 0x21c   :  { %3525 = vmatprep.subr.mxu1 %v2339_v21  ;;  %3577 = vmatpush1.msra.mxu0 %v2418_v59  ;;  %v2306_v31 = vld [vmem:[#allocation5 + $0xee0] sm:$0xff]  ;;  %v2379_v48 = vld [vmem:[#allocation5 + $0x1128] sm:$0xff] }
 0x21d   :  { %3526 = vmatpush2.msra.mxu1 %v2338_v24  ;;  %3578 = vmatprep.subr.mxu0 %v2411_v41  ;;  %v2299_v30 = vld [vmem:[#allocation5 + $0xea8] sm:$0xff]  ;;  %v2378_v55 = vld [vmem:[#allocation5 + $0x1120] sm:$0xff] }
 0x21e   :  { %3527 = vmatprep.subr.mxu1 %v2331_v53  ;;  %3579 = vmatpush1.msra.mxu0 %v2410_v14  ;;  %v2298_v21 = vld [vmem:[#allocation5 + $0xea0] sm:$0xff]  ;;  %v2371_v59 = vld [vmem:[#allocation5 + $0x10e8] sm:$0xff] }
 0x21f   :  { %3528 = vmatpush2.msra.mxu1 %v2330_v49  ;;  %3580 = vmatprep.subr.mxu0 %v2403_v25  ;;  %v2291_v24 = vld [vmem:[#allocation5 + $0xe68] sm:$0xff]  ;;  %v2370_v41 = vld [vmem:[#allocation5 + $0x10e0] sm:$0xff] }
 0x220   :  { %3529 = vmatprep.subr.mxu1 %v2323_v40  ;;  %3581 = vmatpush1.msra.mxu0 %v2402_v0  ;;  %v2290_v58 = vld [vmem:[#allocation5 + $0xe60] sm:$0xff]  ;;  %v2363_v53 = vld [vmem:[#allocation5 + $0x10a8] sm:$0xff] }
 0x221   :  { %3530 = vmatpush2.msra.mxu1 %v2322_v13  ;;  %3582 = vmatprep.subr.mxu0 %v2395_v52  ;;  %v2283_v14 = vld [vmem:[#allocation5 + $0xe28] sm:$0xff]  ;;  %v2362_v49 = vld [vmem:[#allocation5 + $0x10a0] sm:$0xff] }
 0x222   :  { %3531 = vmatprep.subr.mxu1 %v2315_v23  ;;  %3583 = vmatpush1.msra.mxu0 %v2394_v57  ;;  %v2282_v25 = vld [vmem:[#allocation5 + $0xe20] sm:$0xff]  ;;  %v2355_v43 = vld [vmem:[#allocation5 + $0x1068] sm:$0xff] }
 0x223   :  { %3532 = vmatpush2.msra.mxu1 %v2314_v8  ;;  %3584 = vmatprep.subr.mxu0 %v2387_v61  ;;  %v2275_v40 = vld [vmem:[#allocation5 + $0xde8] sm:$0xff]  ;;  %v2354_v0 = vld [vmem:[#allocation5 + $0x1060] sm:$0xff]  ;;  %v4264_v8 = vpop.eup %4263 }
 0x224   :  { %3533 = vmatprep.subr.mxu1 %v2307_v39  ;;  %3585 = vmatpush1.msra.mxu0 %v2386_v33  ;;  %v2274_v13 = vld [vmem:[#allocation5 + $0xde0] sm:$0xff]  ;;  %v2347_v52 = vld [vmem:[#allocation5 + $0x1028] sm:$0xff] }
 0x225   :  { %3534 = vmatpush2.msra.mxu1 %v2306_v31  ;;  %3586 = vmatprep.subr.mxu0 %v2379_v48  ;;  %v2267_v23 = vld [vmem:[#allocation5 + $0xda8] sm:$0xff]  ;;  %v2346_v57 = vld [vmem:[#allocation5 + $0x1020] sm:$0xff]  ;;  %v4266_v48 = vpop.eup %4265 }
 0x226   :  { %3535 = vmatprep.subr.mxu1 %v2299_v30  ;;  %3587 = vmatpush1.msra.mxu0 %v2378_v55  ;;  %v2266_v61 = vld [vmem:[#allocation5 + $0xda0] sm:$0xff]  ;;  %v2595_v39 = vld [vmem:[#allocation5 + $0x17e8] sm:$0xff]  ;;  %v2920_v30 = vpop.f32.mrf.mxu0 }
 0x227   :  { %3536 = vmatpush2.msra.mxu1 %v2298_v21  ;;  %3588 = vmatprep.subr.mxu0 %v2371_v59  ;;  %v2259_v33 = vld [vmem:[#allocation5 + $0xd68] sm:$0xff]  ;;  %v2594_v31 = vld [vmem:[#allocation5 + $0x17e0] sm:$0xff]  ;;  %v1815_v59 = vmul.f32 0.6931472, %v4264_v8 }
 0x228   :  { %3537 = vmatprep.subr.mxu1 %v2291_v24  ;;  %3589 = vmatpush1.msra.mxu0 %v2370_v41  ;;  %v2258_v55 = vld [vmem:[#allocation5 + $0xd60] sm:$0xff]  ;;  %v2587_v21 = vld [vmem:[#allocation5 + $0x17a8] sm:$0xff] }
 0x229   :  { %3538 = vmatpush2.msra.mxu1 %v2290_v58  ;;  %3590 = vmatprep.subr.mxu0 %v2363_v53  ;;  %v2251_v24 = vld [vmem:[#allocation5 + $0xd28] sm:$0xff]  ;;  %v2586_v41 = vld [vmem:[#allocation5 + $0x17a0] sm:$0xff] }
 0x22a   :  { %3539 = vmatprep.subr.mxu1 %v2283_v14  ;;  %3591 = vmatpush1.msra.mxu0 %v2362_v49  ;;  %v2250_v58 = vld [vmem:[#allocation5 + $0xd20] sm:$0xff]  ;;  %v2579_v53 = vld [vmem:[#allocation5 + $0x1768] sm:$0xff]  ;;  %v1817_v14 = vmul.f32 0.6931472, %v4266_v48 }
 0x22b   :  { %3540 = vmatpush2.msra.mxu1 %v2282_v25  ;;  %3592 = vmatprep.subr.mxu0 %v2355_v43  ;;  %v2243_v49 = vld [vmem:[#allocation5 + $0xce8] sm:$0xff]  ;;  %v2578_v25 = vld [vmem:[#allocation5 + $0x1760] sm:$0xff]  ;;  %v2922_v43 = vpop.f32.mrf.mxu0 }
 0x22c   :  { %3541 = vmatprep.subr.mxu1 %v2275_v40  ;;  %3593 = vmatpush1.msra.mxu0 %v2354_v0  ;;  %v2242_v40 = vld [vmem:[#allocation5 + $0xce0] sm:$0xff]  ;;  %v2571_v0 = vld [vmem:[#allocation5 + $0x1728] sm:$0xff] }
 0x22d   :  { %3542 = vmatpush2.msra.mxu1 %v2274_v13  ;;  %3594 = vmatprep.subr.mxu0 %v2347_v52  ;;  %v2921_v13 = vadd.f32 %v2920_v30, %v1815_v59  ;;  %v2235_v52 = vld [vmem:[#allocation5 + $0xca8] sm:$0xff]  ;;  %v2234_v8 = vld [vmem:[#allocation5 + $0xca0] sm:$0xff] }
 0x22e   :  { %3543 = vmatprep.subr.mxu1 %v2267_v23  ;;  %3595 = vmatpush1.msra.mxu0 %v2346_v57  ;;  %v2570_v23 = vld [vmem:[#allocation5 + $0x1720] sm:$0xff]  ;;  %v2991_v57 = vpop.f32.mrf.mxu1  ;;  %v2219_v59 = vld [vmem:[#allocation5 + $0xc28] sm:$0xff] }
 0x22f   :  { %3544 = vmatpush2.msra.mxu1 %v2266_v61  ;;  %3596 = vmatprep.subr.mxu0 %v2595_v39  ;;  %v3062_v61 = vpop.f32.mrf.mxu0  ;;  %v2563_v39 = vld [vmem:[#allocation5 + $0x16e8] sm:$0xff]  ;;  %v2562_v48 = vld [vmem:[#allocation5 + $0x16e0] sm:$0xff]  ;;  %v2992_v30 = vadd.f32 %v2991_v57, %v2921_v13 }
 0x230   :  { %3545 = vmatprep.subr.mxu1 %v2259_v33  ;;  %3597 = vmatpush2.msra.mxu0 %v2594_v31  ;;  %v2923_v33 = vadd.f32 %v2922_v43, %v1817_v14  ;;  %v2227_v31 = vld [vmem:[#allocation5 + $0xc68] sm:$0xff]  ;;  %v2474_v20 = vld [vmem:[#allocation5 + $0x1420] sm:$0xff] }
 0x231   :  { %3546 = vmatpush2.msra.mxu1 %v2258_v55  ;;  %3598 = vmatprep.subr.mxu0 %v2587_v21  ;;  %v2226_v55 = vld [vmem:[#allocation5 + $0xc60] sm:$0xff]  ;;  %v2555_v21 = vld [vmem:[#allocation5 + $0x16a8] sm:$0xff] }
 0x232   :  { %3547 = vmatprep.subr.mxu1 %v2251_v24  ;;  %3599 = vmatpush2.msra.mxu0 %v2586_v41  ;;  %v2554_v24 = vld [vmem:[#allocation5 + $0x16a0] sm:$0xff]  ;;  %v2993_v41 = vpop.f32.mrf.mxu1  ;;  %v2723_v43 = vld [vmem:[#allocation5 + $0x1be8] sm:$0xff] }
 0x233   :  { %3548 = vmatpush2.msra.mxu1 %v2250_v58  ;;  %3600 = vmatprep.subr.mxu0 %v2579_v53  ;;  %v2218_v58 = vld [vmem:[#allocation5 + $0xc20] sm:$0xff]  ;;  %v3064_v53 = vpop.f32.mrf.mxu0  ;;  %v2994_v14 = vadd.f32 %v2993_v41, %v2923_v33  ;;  %v2523_v41 = vld [vmem:[#allocation5 + $0x15a8] sm:$0xff] }
 0x234   :  { %3549 = vmatprep.subr.mxu1 %v2243_v49  ;;  %3601 = vmatpush2.msra.mxu0 %v2578_v25  ;;  %v2547_v49 = vld [vmem:[#allocation5 + $0x1668] sm:$0xff]  ;;  %v3063_v25 = vadd.f32 %v3062_v61, %v2992_v30 }
 0x235   :  { %3550 = vmatpush2.msra.mxu1 %v2242_v40  ;;  %3602 = vmatprep.subr.mxu0 %v2571_v0  ;;  %v2722_v40 = vld [vmem:[#allocation5 + $0x1be0] sm:$0xff]  ;;  %v3065_v13 = vadd.f32 %v3064_v53, %v2994_v14  ;;  %v2707_v61 = vld [vmem:[#allocation5 + $0x1b68] sm:$0xff] }
 0x236   :  { %3551 = vmatprep.subr.mxu1 %v2235_v52  ;;  %3603 = vmatpush2.msra.mxu0 %v2570_v23  ;;  %v2546_v0 = vld [vmem:[#allocation5 + $0x1660] sm:$0xff]  ;;  %v2715_v52 = vld [vmem:[#allocation5 + $0x1ba8] sm:$0xff] }
 0x237   :  { %3552 = vmatpush2.msra.mxu1 %v2234_v8  ;;  %3604 = vmatprep.subr.mxu0 %v2563_v39  ;;  %v2539_v23 = vld [vmem:[#allocation5 + $0x1628] sm:$0xff]  ;;  %v2714_v8 = vld [vmem:[#allocation5 + $0x1ba0] sm:$0xff] }
 0x238   :  { %3553 = vmatprep.subr.mxu1 %v2227_v31  ;;  %3605 = vmatpush2.msra.mxu0 %v2562_v48  ;;  %v2538_v39 = vld [vmem:[#allocation5 + $0x1620] sm:$0xff]  ;;  %v2531_v31 = vld [vmem:[#allocation5 + $0x15e8] sm:$0xff] }
 0x239   :  { %3554 = vmatpush2.msra.mxu1 %v2226_v55  ;;  %3606 = vmatprep.subr.mxu0 %v2555_v21  ;;  %v2706_v55 = vld [vmem:[#allocation5 + $0x1b60] sm:$0xff]  ;;  %v2691_v14 = vld [vmem:[#allocation5 + $0x1ae8] sm:$0xff] }
 0x23a   :  { %3555 = vmatprep.subr.mxu1 %v2219_v59  ;;  %3607 = vmatpush2.msra.mxu0 %v2554_v24  ;;  %v2530_v21 = vld [vmem:[#allocation5 + $0x15e0] sm:$0xff]  ;;  %v2699_v24 = vld [vmem:[#allocation5 + $0x1b28] sm:$0xff] }
 0x23b   :  { %3556 = vmatpush2.msra.mxu1 %v2218_v58  ;;  %3608 = vmatprep.subr.mxu0 %v2547_v49  ;;  %v3133_v57 = vpop.f32.mrf.mxu1  ;;  %v2698_v58 = vld [vmem:[#allocation5 + $0x1b20] sm:$0xff] }
 0x23c   :  { %3635 = vmatprep.subr.mxu1 %v2723_v43  ;;  %3558 = vmatmul.mubr.f32.vlgmr.msra.gmra.mxu1 %v5072_v51  ;;  %v3134_v33 = vadd.f32 %v3133_v57, %v3063_v25  ;;  %v2522_v53 = vld [vmem:[#allocation5 + $0x15a0] sm:$0xff]  ;;  %v2515_v25 = vld [vmem:[#allocation5 + $0x1568] sm:$0xff] }
 0x23d   :  { %3636 = vmatpush1.msra.mxu1 %v2722_v40  ;;  %3609 = vmatpush2.msra.mxu0 %v2546_v0  ;;  %v3135_v48 = vpop.f32.mrf.mxu1  ;;  %v2690_v43 = vld [vmem:[#allocation5 + $0x1ae0] sm:$0xff]  ;;  %v2683_v0 = vld [vmem:[#allocation5 + $0x1aa8] sm:$0xff] }
 0x23e   :  { %3637 = vmatprep.subr.mxu1 %v2715_v52  ;;  %3610 = vmatprep.subr.mxu0 %v2539_v23  ;;  %v3990_v30 = vmul.f32 1.442695, %v3134_v33  ;;  %v3136_v59 = vadd.f32 %v3135_v48, %v3065_v13  ;;  %v2514_v40 = vld [vmem:[#allocation5 + $0x1560] sm:$0xff]  ;;  %v2507_v13 = vld [vmem:[#allocation5 + $0x1528] sm:$0xff] }
 0x23f   :  { %3638 = vmatpush1.msra.mxu1 %v2714_v8  ;;  %3611 = vmatpush2.msra.mxu0 %v2538_v39  ;;  %v2682_v52 = vld [vmem:[#allocation5 + $0x1aa0] sm:$0xff]  ;;  %v2675_v57 = vld [vmem:[#allocation5 + $0x1a68] sm:$0xff] }
 0x240   :  { %3639 = vmatprep.subr.mxu1 %v2707_v61  ;;  %3612 = vmatprep.subr.mxu0 %v2531_v31  ;;  %4267 = vpow2.f32 %v3990_v30  ;;  %v3992_v49 = vmul.f32 1.442695, %v3136_v59  ;;  %v2506_v23 = vld [vmem:[#allocation5 + $0x1520] sm:$0xff]  ;;  %v2499_v8 = vld [vmem:[#allocation5 + $0x14e8] sm:$0xff] }
 0x241   :  { %3640 = vmatpush1.msra.mxu1 %v2706_v55  ;;  %3613 = vmatpush2.msra.mxu0 %v2530_v21  ;;  %v2674_v39 = vld [vmem:[#allocation5 + $0x1a60] sm:$0xff]  ;;  %v2667_v61 = vld [vmem:[#allocation5 + $0x1a28] sm:$0xff] }
 0x242   :  { %3641 = vmatprep.subr.mxu1 %v2699_v24  ;;  %3614 = vmatprep.subr.mxu0 %v2523_v41  ;;  %4269 = vpow2.f32 %v3992_v49  ;;  %v2498_v33 = vld [vmem:[#allocation5 + $0x14e0] sm:$0xff]  ;;  %v2491_v31 = vld [vmem:[#allocation5 + $0x14a8] sm:$0xff] }
 0x243   :  { %3642 = vmatpush1.msra.mxu1 %v2698_v58  ;;  %3615 = vmatpush2.msra.mxu0 %v2522_v53  ;;  %v2666_v48 = vld [vmem:[#allocation5 + $0x1a20] sm:$0xff]  ;;  %v2659_v21 = vld [vmem:[#allocation5 + $0x19e8] sm:$0xff]  ;;  %v4373_v53 = vmov 1.0  }
 0x244   :  { %3643 = vmatprep.subr.mxu1 %v2691_v14  ;;  %3616 = vmatprep.subr.mxu0 %v2515_v25  ;;  %v2490_v55 = vld [vmem:[#allocation5 + $0x14a0] sm:$0xff]  ;;  %v2483_v30 = vld [vmem:[#allocation5 + $0x1468] sm:$0xff]  ;;  %v4014_v49 = vsel %vm4006_vm12, -1.0, %v4373_v53 }
 0x245   :  { %3644 = vmatpush1.msra.mxu1 %v2690_v43  ;;  %3617 = vmatpush2.msra.mxu0 %v2514_v40  ;;  %v2658_v59 = vld [vmem:[#allocation5 + $0x19e0] sm:$0xff]  ;;  %v2651_v41 = vld [vmem:[#allocation5 + $0x19a8] sm:$0xff]  ;;  %v4015_v40 = vsel %vm4007_vm3, -1.0, %v4373_v53 }
 0x246   :  { %3645 = vmatprep.subr.mxu1 %v2683_v0  ;;  %3618 = vmatprep.subr.mxu0 %v2507_v13  ;;  %v2482_v24 = vld [vmem:[#allocation5 + $0x1460] sm:$0xff]  ;;  %v2475_v58 = vld [vmem:[#allocation5 + $0x1428] sm:$0xff] }
 0x247   :  { %3646 = vmatpush1.msra.mxu1 %v2682_v52  ;;  %3619 = vmatpush2.msra.mxu0 %v2506_v23  ;;  %v2650_v14 = vld [vmem:[#allocation5 + $0x19a0] sm:$0xff]  ;;  %v2643_v25 = vld [vmem:[#allocation5 + $0x1968] sm:$0xff] }
 0x248   :  { %3647 = vmatprep.subr.mxu1 %v2675_v57  ;;  %3620 = vmatprep.subr.mxu0 %v2499_v8  ;;  %v2642_v0 = vld [vmem:[#allocation5 + $0x1960] sm:$0xff]  ;;  %v2635_v13 = vld [vmem:[#allocation5 + $0x1928] sm:$0xff]  ;;  %v1957_v57 = vld [vmem:[#allocation5 + $0x3f8] sm:$0xff] }
 0x249   :  { %3648 = vmatpush1.msra.mxu1 %v2674_v39  ;;  %3621 = vmatpush2.msra.mxu0 %v2498_v33  ;;  %v2634_v23 = vld [vmem:[#allocation5 + $0x1920] sm:$0xff]  ;;  %v2627_v39 = vld [vmem:[#allocation5 + $0x18e8] sm:$0xff]  ;;  %v1956_v33 = vld [vmem:[#allocation5 + $0x3f0] sm:$0xff] }
 0x24a   :  { %3649 = vmatprep.subr.mxu1 %v2667_v61  ;;  %3622 = vmatprep.subr.mxu0 %v2491_v31  ;;  %v2626_v61 = vld [vmem:[#allocation5 + $0x18e0] sm:$0xff]  ;;  %v1949_v31 = vld [vmem:[#allocation5 + $0x3b8] sm:$0xff] }
 0x24b   :  { %3650 = vmatpush1.msra.mxu1 %v2666_v48  ;;  %3623 = vmatpush2.msra.mxu0 %v2490_v55  ;;  %v2619_v48 = vld [vmem:[#allocation5 + $0x18a8] sm:$0xff]  ;;  %v1948_v55 = vld [vmem:[#allocation5 + $0x3b0] sm:$0xff] }
 0x24c   :  { %3651 = vmatprep.subr.mxu1 %v2659_v21  ;;  %3624 = vmatprep.subr.mxu0 %v2483_v30  ;;  %v2618_v21 = vld [vmem:[#allocation5 + $0x18a0] sm:$0xff]  ;;  %v1941_v30 = vld [vmem:[#allocation5 + $0x378] sm:$0xff] }
 0x24d   :  { %3652 = vmatpush1.msra.mxu1 %v2658_v59  ;;  %3625 = vmatpush2.msra.mxu0 %v2482_v24  ;;  %v4268_v43 = vpop.eup %4267  ;;  %v2611_v59 = vld [vmem:[#allocation5 + $0x1868] sm:$0xff]  ;;  %v1940_v24 = vld [vmem:[#allocation5 + $0x370] sm:$0xff] }
 0x24e   :  { %3653 = vmatprep.subr.mxu1 %v2651_v41  ;;  %3626 = vmatprep.subr.mxu0 %v2475_v58  ;;  %v4022_v44 = vmul.f32 %v4268_v43, %v4014_v49  ;;  %v2610_v41 = vld [vmem:[#allocation5 + $0x1860] sm:$0xff]  ;;  %v1933_v58 = vld [vmem:[#allocation5 + $0x338] sm:$0xff]  ;;  %v2603_v49 = vld [vmem:[#allocation5 + $0x1828] sm:$0xff] }
 0x24f   :  { %3654 = vmatpush1.msra.mxu1 %v2650_v14  ;;  %3627 = vmatpush2.msra.mxu0 %v2474_v20  ;;  %v4270_v52 = vpop.eup %4269  ;;  %v1932_v14 = vld [vmem:[#allocation5 + $0x330] sm:$0xff]  ;;  %v2602_v20 = vld [vmem:[#allocation5 + $0x1820] sm:$0xff]  ;;  %v2851_v43 = vld [vmem:[#allocation5 + $0x1fe8] sm:$0xff] }
 0x250   :  { %3655 = vmatprep.subr.mxu1 %v2643_v25  ;;  %3628 = vmatprep.mubr.f32.mxu0 %v5220_v16  ;;  %4030 = vst [vmem:[#allocation7] sm:$0xff] %v4022_v44  ;;  %v4023_v8 = vmul.f32 %v4270_v52, %v4015_v40  ;;  %v1925_v25 = vld [vmem:[#allocation5 + $0x2f8] sm:$0xff]  ;;  %v1924_v40 = vld [vmem:[#allocation5 + $0x2f0] sm:$0xff] }
 0x251   :  { %3656 = vmatpush1.msra.mxu1 %v2642_v0  ;;  %3629 = vmatmul.mubr.f32.vlgmr.msra.gmra.mxu0 %v5253_v36  ;;  %v2850_v0 = vld [vmem:[#allocation5 + $0x1fe0] sm:$0xff]  ;;  %v1917_v44 = vld [vmem:[#allocation5 + $0x2b8] sm:$0xff]  ;;  %v1916_v52 = vld [vmem:[#allocation5 + $0x2b0] sm:$0xff] }
 0x252   :  { %3657 = vmatprep.subr.mxu1 %v2635_v13  ;;  %3699 = vmatprep.mubr.f32.mxu1 %v5297_v50  ;;  %4031 = vst [vmem:[#allocation7 + $0x8] sm:$0xff] %v4023_v8  ;;  %v2843_v13 = vld [vmem:[#allocation5 + $0x1fa8] sm:$0xff] }
 0x253   :  { %3658 = vmatpush1.msra.mxu1 %v2634_v23  ;;  %3706 = vmatprep.subr.mxu0 %v1957_v57  ;;  %v2842_v23 = vld [vmem:[#allocation5 + $0x1fa0] sm:$0xff]  ;;  %v1909_v57 = vld [vmem:[#allocation5 + $0x278] sm:$0xff]  ;;  %v2835_v8 = vld [vmem:[#allocation5 + $0x1f68] sm:$0xff] }
 0x254   :  { %3659 = vmatprep.subr.mxu1 %v2627_v39  ;;  %3707 = vmatpush1.msra.mxu0 %v1956_v33  ;;  %v1908_v39 = vld [vmem:[#allocation5 + $0x270] sm:$0xff]  ;;  %v2834_v33 = vld [vmem:[#allocation5 + $0x1f60] sm:$0xff] }
 0x255   :  { %3660 = vmatpush1.msra.mxu1 %v2626_v61  ;;  %3708 = vmatprep.subr.mxu0 %v1949_v31  ;;  %v1901_v61 = vld [vmem:[#allocation5 + $0x238] sm:$0xff]  ;;  %v2827_v31 = vld [vmem:[#allocation5 + $0x1f28] sm:$0xff] }
 0x256   :  { %3661 = vmatprep.subr.mxu1 %v2619_v48  ;;  %3709 = vmatpush1.msra.mxu0 %v1948_v55  ;;  %v1900_v48 = vld [vmem:[#allocation5 + $0x230] sm:$0xff]  ;;  %v2826_v55 = vld [vmem:[#allocation5 + $0x1f20] sm:$0xff] }
 0x257   :  { %3662 = vmatpush1.msra.mxu1 %v2618_v21  ;;  %3710 = vmatprep.subr.mxu0 %v1941_v30  ;;  %v1893_v21 = vld [vmem:[#allocation5 + $0x1f8] sm:$0xff]  ;;  %v2819_v30 = vld [vmem:[#allocation5 + $0x1ee8] sm:$0xff] }
 0x258   :  { %3663 = vmatprep.subr.mxu1 %v2611_v59  ;;  %3711 = vmatpush1.msra.mxu0 %v1940_v24  ;;  %v1892_v59 = vld [vmem:[#allocation5 + $0x1f0] sm:$0xff]  ;;  %v2818_v24 = vld [vmem:[#allocation5 + $0x1ee0] sm:$0xff] }
 0x259   :  { %3664 = vmatpush1.msra.mxu1 %v2610_v41  ;;  %3712 = vmatprep.subr.mxu0 %v1933_v58  ;;  %v1885_v41 = vld [vmem:[#allocation5 + $0x1b8] sm:$0xff]  ;;  %v2811_v58 = vld [vmem:[#allocation5 + $0x1ea8] sm:$0xff] }
 0x25a   :  { %3665 = vmatprep.subr.mxu1 %v2603_v49  ;;  %3713 = vmatpush1.msra.mxu0 %v1932_v14  ;;  %v1884_v49 = vld [vmem:[#allocation5 + $0x1b0] sm:$0xff]  ;;  %v2810_v14 = vld [vmem:[#allocation5 + $0x1ea0] sm:$0xff] }
 0x25b   :  { %3666 = vmatpush1.msra.mxu1 %v2602_v20  ;;  %3714 = vmatprep.subr.mxu0 %v1925_v25  ;;  %v1877_v20 = vld [vmem:[#allocation5 + $0x178] sm:$0xff]  ;;  %v2803_v25 = vld [vmem:[#allocation5 + $0x1e68] sm:$0xff] }
 0x25c   :  { %3667 = vmatprep.subr.mxu1 %v2851_v43  ;;  %3715 = vmatpush1.msra.mxu0 %v1924_v40  ;;  %v1876_v43 = vld [vmem:[#allocation5 + $0x170] sm:$0xff]  ;;  %v2802_v40 = vld [vmem:[#allocation5 + $0x1e60] sm:$0xff] }
 0x25d   :  { %3668 = vmatpush2.msra.mxu1 %v2850_v0  ;;  %3716 = vmatprep.subr.mxu0 %v1917_v44  ;;  %v1869_v0 = vld [vmem:[#allocation5 + $0x138] sm:$0xff]  ;;  %v2795_v44 = vld [vmem:[#allocation5 + $0x1e28] sm:$0xff] }
 0x25e   :  { %3669 = vmatprep.subr.mxu1 %v2843_v13  ;;  %3717 = vmatpush1.msra.mxu0 %v1916_v52  ;;  %v1868_v13 = vld [vmem:[#allocation5 + $0x130] sm:$0xff]  ;;  %v2794_v52 = vld [vmem:[#allocation5 + $0x1e20] sm:$0xff] }
 0x25f   :  { %3670 = vmatpush2.msra.mxu1 %v2842_v23  ;;  %3718 = vmatprep.subr.mxu0 %v1909_v57  ;;  %v1861_v23 = vld [vmem:[#allocation5 + $0xf8] sm:$0xff]  ;;  %v2787_v57 = vld [vmem:[#allocation5 + $0x1de8] sm:$0xff] }
 0x260   :  { %3671 = vmatprep.subr.mxu1 %v2835_v8  ;;  %3719 = vmatpush1.msra.mxu0 %v1908_v39  ;;  %v1860_v8 = vld [vmem:[#allocation5 + $0xf0] sm:$0xff]  ;;  %v2786_v39 = vld [vmem:[#allocation5 + $0x1de0] sm:$0xff] }
 0x261   :  { %3672 = vmatpush2.msra.mxu1 %v2834_v33  ;;  %3720 = vmatprep.subr.mxu0 %v1901_v61  ;;  %v1853_v33 = vld [vmem:[#allocation5 + $0xb8] sm:$0xff]  ;;  %v2779_v61 = vld [vmem:[#allocation5 + $0x1da8] sm:$0xff] }
 0x262   :  { %3673 = vmatprep.subr.mxu1 %v2827_v31  ;;  %3721 = vmatpush1.msra.mxu0 %v1900_v48  ;;  %v1852_v31 = vld [vmem:[#allocation5 + $0xb0] sm:$0xff]  ;;  %v2778_v48 = vld [vmem:[#allocation5 + $0x1da0] sm:$0xff] }
 0x263   :  { %3674 = vmatpush2.msra.mxu1 %v2826_v55  ;;  %3722 = vmatprep.subr.mxu0 %v1893_v21  ;;  %v1845_v55 = vld [vmem:[#allocation5 + $0x78] sm:$0xff]  ;;  %v2771_v21 = vld [vmem:[#allocation5 + $0x1d68] sm:$0xff] }
 0x264   :  { %3675 = vmatprep.subr.mxu1 %v2819_v30  ;;  %3723 = vmatpush1.msra.mxu0 %v1892_v59  ;;  %v1844_v30 = vld [vmem:[#allocation5 + $0x70] sm:$0xff]  ;;  %v2770_v59 = vld [vmem:[#allocation5 + $0x1d60] sm:$0xff] }
 0x265   :  { %3676 = vmatpush2.msra.mxu1 %v2818_v24  ;;  %3724 = vmatprep.subr.mxu0 %v1885_v41  ;;  %v1837_v24 = vld [vmem:[#allocation5 + $0x38] sm:$0xff]  ;;  %v2763_v41 = vld [vmem:[#allocation5 + $0x1d28] sm:$0xff] }
 0x266   :  { %3677 = vmatprep.subr.mxu1 %v2811_v58  ;;  %3725 = vmatpush1.msra.mxu0 %v1884_v49  ;;  %v1836_v58 = vld [vmem:[#allocation5 + $0x30] sm:$0xff]  ;;  %v2762_v49 = vld [vmem:[#allocation5 + $0x1d20] sm:$0xff] }
 0x267   :  { %3678 = vmatpush2.msra.mxu1 %v2810_v14  ;;  %3726 = vmatprep.subr.mxu0 %v1877_v20  ;;  %v2085_v14 = vld [vmem:[#allocation5 + $0x7f8] sm:$0xff]  ;;  %v2755_v20 = vld [vmem:[#allocation5 + $0x1ce8] sm:$0xff] }
 0x268   :  { %3679 = vmatprep.subr.mxu1 %v2803_v25  ;;  %3727 = vmatpush1.msra.mxu0 %v1876_v43  ;;  %v2084_v25 = vld [vmem:[#allocation5 + $0x7f0] sm:$0xff]  ;;  %v2754_v43 = vld [vmem:[#allocation5 + $0x1ce0] sm:$0xff] }
 0x269   :  { %3680 = vmatpush2.msra.mxu1 %v2802_v40  ;;  %3728 = vmatprep.subr.mxu0 %v1869_v0  ;;  %v2077_v40 = vld [vmem:[#allocation5 + $0x7b8] sm:$0xff]  ;;  %v2747_v0 = vld [vmem:[#allocation5 + $0x1ca8] sm:$0xff] }
 0x26a   :  { %3681 = vmatprep.subr.mxu1 %v2795_v44  ;;  %3729 = vmatpush1.msra.mxu0 %v1868_v13  ;;  %v2076_v44 = vld [vmem:[#allocation5 + $0x7b0] sm:$0xff]  ;;  %v2746_v13 = vld [vmem:[#allocation5 + $0x1ca0] sm:$0xff] }
 0x26b   :  { %3682 = vmatpush2.msra.mxu1 %v2794_v52  ;;  %3730 = vmatprep.subr.mxu0 %v1861_v23  ;;  %v2069_v52 = vld [vmem:[#allocation5 + $0x778] sm:$0xff]  ;;  %v2739_v23 = vld [vmem:[#allocation5 + $0x1c68] sm:$0xff] }
 0x26c   :  { %3683 = vmatprep.subr.mxu1 %v2787_v57  ;;  %3731 = vmatpush1.msra.mxu0 %v1860_v8  ;;  %v2068_v57 = vld [vmem:[#allocation5 + $0x770] sm:$0xff]  ;;  %v2738_v8 = vld [vmem:[#allocation5 + $0x1c60] sm:$0xff] }
 0x26d   :  { %3684 = vmatpush2.msra.mxu1 %v2786_v39  ;;  %3732 = vmatprep.subr.mxu0 %v1853_v33  ;;  %v2061_v39 = vld [vmem:[#allocation5 + $0x738] sm:$0xff]  ;;  %v2731_v33 = vld [vmem:[#allocation5 + $0x1c28] sm:$0xff] }
 0x26e   :  { %3685 = vmatprep.subr.mxu1 %v2779_v61  ;;  %3733 = vmatpush1.msra.mxu0 %v1852_v31  ;;  %v2060_v61 = vld [vmem:[#allocation5 + $0x730] sm:$0xff]  ;;  %v2730_v31 = vld [vmem:[#allocation5 + $0x1c20] sm:$0xff] }
 0x26f   :  { %3686 = vmatpush2.msra.mxu1 %v2778_v48  ;;  %3734 = vmatprep.subr.mxu0 %v1845_v55  ;;  %v2053_v48 = vld [vmem:[#allocation5 + $0x6f8] sm:$0xff] }
 0x270   :  { %3687 = vmatprep.subr.mxu1 %v2771_v21  ;;  %3735 = vmatpush1.msra.mxu0 %v1844_v30  ;;  %v2213_v55 = vld [vmem:[#allocation5 + $0xbf8] sm:$0xff]  ;;  %v2212_v21 = vld [vmem:[#allocation5 + $0xbf0] sm:$0xff] }
 0x271   :  { %3688 = vmatpush2.msra.mxu1 %v2770_v59  ;;  %3736 = vmatprep.subr.mxu0 %v1837_v24  ;;  %v2052_v30 = vld [vmem:[#allocation5 + $0x6f0] sm:$0xff]  ;;  %v2205_v59 = vld [vmem:[#allocation5 + $0xbb8] sm:$0xff] }
 0x272   :  { %3689 = vmatprep.subr.mxu1 %v2763_v41  ;;  %3737 = vmatpush1.msra.mxu0 %v1836_v58  ;;  %v2045_v24 = vld [vmem:[#allocation5 + $0x6b8] sm:$0xff]  ;;  %v2204_v41 = vld [vmem:[#allocation5 + $0xbb0] sm:$0xff] }
 0x273   :  { %3690 = vmatpush2.msra.mxu1 %v2762_v49  ;;  %3738 = vmatprep.subr.mxu0 %v2085_v14  ;;  %v2044_v58 = vld [vmem:[#allocation5 + $0x6b0] sm:$0xff]  ;;  %v2197_v49 = vld [vmem:[#allocation5 + $0xb78] sm:$0xff] }
 0x274   :  { %3691 = vmatprep.subr.mxu1 %v2755_v20  ;;  %3739 = vmatpush2.msra.mxu0 %v2084_v25  ;;  %v2037_v14 = vld [vmem:[#allocation5 + $0x678] sm:$0xff]  ;;  %v2196_v20 = vld [vmem:[#allocation5 + $0xb70] sm:$0xff] }
 0x275   :  { %3692 = vmatpush2.msra.mxu1 %v2754_v43  ;;  %3740 = vmatprep.subr.mxu0 %v2077_v40  ;;  %v2036_v25 = vld [vmem:[#allocation5 + $0x670] sm:$0xff]  ;;  %v2189_v43 = vld [vmem:[#allocation5 + $0xb38] sm:$0xff] }
 0x276   :  { %3693 = vmatprep.subr.mxu1 %v2747_v0  ;;  %3741 = vmatpush2.msra.mxu0 %v2076_v44  ;;  %v2029_v40 = vld [vmem:[#allocation5 + $0x638] sm:$0xff]  ;;  %v2188_v0 = vld [vmem:[#allocation5 + $0xb30] sm:$0xff] }
 0x277   :  { %3694 = vmatpush2.msra.mxu1 %v2746_v13  ;;  %3742 = vmatprep.subr.mxu0 %v2069_v52  ;;  %v2028_v44 = vld [vmem:[#allocation5 + $0x630] sm:$0xff]  ;;  %v2181_v13 = vld [vmem:[#allocation5 + $0xaf8] sm:$0xff] }
 0x278   :  { %3695 = vmatprep.subr.mxu1 %v2739_v23  ;;  %3743 = vmatpush2.msra.mxu0 %v2068_v57  ;;  %v2021_v52 = vld [vmem:[#allocation5 + $0x5f8] sm:$0xff]  ;;  %v2180_v23 = vld [vmem:[#allocation5 + $0xaf0] sm:$0xff] }
 0x279   :  { %3696 = vmatpush2.msra.mxu1 %v2738_v8  ;;  %3744 = vmatprep.subr.mxu0 %v2061_v39  ;;  %v2020_v57 = vld [vmem:[#allocation5 + $0x5f0] sm:$0xff]  ;;  %v2173_v8 = vld [vmem:[#allocation5 + $0xab8] sm:$0xff] }
 0x27a   :  { %3697 = vmatprep.subr.mxu1 %v2731_v33  ;;  %3745 = vmatpush2.msra.mxu0 %v2060_v61  ;;  %v2013_v39 = vld [vmem:[#allocation5 + $0x5b8] sm:$0xff]  ;;  %v2172_v33 = vld [vmem:[#allocation5 + $0xab0] sm:$0xff] }
 0x27b   :  { %3698 = vmatpush2.msra.mxu1 %v2730_v31  ;;  %3746 = vmatprep.subr.mxu0 %v2053_v48  ;;  %v2012_v61 = vld [vmem:[#allocation5 + $0x5b0] sm:$0xff]  ;;  %v2165_v31 = vld [vmem:[#allocation5 + $0xa78] sm:$0xff] }
 0x27c   :  { %3777 = vmatprep.subr.mxu1 %v2213_v55  ;;  %3700 = vmatmul.mubr.f32.vlgmr.msra.gmra.mxu1 %v5315_v27  ;;  %v2005_v48 = vld [vmem:[#allocation5 + $0x578] sm:$0xff]  ;;  %v2164_v55 = vld [vmem:[#allocation5 + $0xa70] sm:$0xff] }
 0x27d   :  { %3778 = vmatpush1.msra.mxu1 %v2212_v21  ;;  %3747 = vmatpush2.msra.mxu0 %v2052_v30  ;;  %v2004_v21 = vld [vmem:[#allocation5 + $0x570] sm:$0xff]  ;;  %v1241_v30 = vand.u32 3, %v4885_v32  ;;  %v2141_v32 = vld [vmem:[#allocation5 + $0x9b8] sm:$0xff] }
 0x27e   :  { %3779 = vmatprep.subr.mxu1 %v2205_v59  ;;  %3748 = vmatprep.subr.mxu0 %v2045_v24  ;;  %v2157_v59 = vld [vmem:[#allocation5 + $0xa38] sm:$0xff] }
 0x27f   :  { %3780 = vmatpush1.msra.mxu1 %v2204_v41  ;;  %3749 = vmatpush2.msra.mxu0 %v2044_v58  ;;  %v1997_v24 = vld [vmem:[#allocation5 + $0x538] sm:$0xff]  ;;  %v2156_v41 = vld [vmem:[#allocation5 + $0xa30] sm:$0xff]  ;;  %vm1243_vm9 = vcmp.eq.s32.totalorder %v1241_v30, 0  ;;  %vm1246_vm10 = vcmp.eq.s32.totalorder %v1241_v30, 2  ;;  %vm1242_vm1 = vcmp.lt.s32.totalorder %v1241_v30, 2 }
 0x280   :  { %3781 = vmatprep.subr.mxu1 %v2197_v49  ;;  %3750 = vmatprep.subr.mxu0 %v2037_v14  ;;  %v1996_v58 = vld [vmem:[#allocation5 + $0x530] sm:$0xff]  ;;  %v1344_v49 = vand.u32 3, %v4632_v4  ;;  %v2149_v14 = vld [vmem:[#allocation5 + $0x9f8] sm:$0xff] }
 0x281   :  { %3782 = vmatpush1.msra.mxu1 %v2196_v20  ;;  %3751 = vmatpush2.msra.mxu0 %v2036_v25  ;;  %v1989_v20 = vld [vmem:[#allocation5 + $0x4f8] sm:$0xff]  ;;  %v2148_v25 = vld [vmem:[#allocation5 + $0x9f0] sm:$0xff] }
 0x282   :  { %3783 = vmatprep.subr.mxu1 %v2189_v43  ;;  %3752 = vmatprep.subr.mxu0 %v2029_v40  ;;  %v1988_v43 = vld [vmem:[#allocation5 + $0x4f0] sm:$0xff]  ;;  %v1981_v40 = vld [vmem:[#allocation5 + $0x4b8] sm:$0xff]  ;;  %vm1346_vm13 = vcmp.eq.s32.totalorder %v1344_v49, 0  ;;  %vm1349_vm14 = vcmp.eq.s32.totalorder %v1344_v49, 2  ;;  %vm1345_vm5 = vcmp.lt.s32.totalorder %v1344_v49, 2 }
 0x283   :  { %3784 = vmatpush1.msra.mxu1 %v2188_v0  ;;  %3753 = vmatpush2.msra.mxu0 %v2028_v44  ;;  %v2140_v0 = vld [vmem:[#allocation5 + $0x9b0] sm:$0xff]  ;;  %v2133_v4 = vld [vmem:[#allocation5 + $0x978] sm:$0xff] }
 0x284   :  { %3785 = vmatprep.subr.mxu1 %v2181_v13  ;;  %3754 = vmatprep.subr.mxu0 %v2021_v52  ;;  %v1980_v44 = vld [vmem:[#allocation5 + $0x4b0] sm:$0xff]  ;;  %v1973_v13 = vld [vmem:[#allocation5 + $0x478] sm:$0xff]  ;;  %v5498_v52 = vxor.u32 2147483648, %v4971_v6 }
 0x285   :  { %3786 = vmatpush1.msra.mxu1 %v2180_v23  ;;  %3755 = vmatpush2.msra.mxu0 %v2020_v57  ;;  %v5499_v57 = vxor.u32 2147483648, %v4965_v15  ;;  %v2469_v30 = vld [vmem:[#allocation5 + $0x13f8] sm:$0xff] }
 0x286   :  { %3787 = vmatprep.subr.mxu1 %v2173_v8  ;;  %3756 = vmatprep.subr.mxu0 %v2013_v39  ;;  %v1245_v23 = vsel %vm1243_vm9, %v4965_v15, %v5498_v52  ;;  %v2132_v39 = vld [vmem:[#allocation5 + $0x970] sm:$0xff]  ;;  %v2101_v49 = vld [vmem:[#allocation5 + $0x878] sm:$0xff] }
 0x287   :  { %3788 = vmatpush1.msra.mxu1 %v2172_v33  ;;  %3757 = vmatpush2.msra.mxu0 %v2012_v61  ;;  %v1248_v8 = vsel %vm1246_vm10, %v5499_v57, %v4971_v6  ;;  %v1972_v33 = vld [vmem:[#allocation5 + $0x470] sm:$0xff]  ;;  %v2125_v61 = vld [vmem:[#allocation5 + $0x938] sm:$0xff] }
 0x288   :  { %3789 = vmatprep.subr.mxu1 %v2165_v31  ;;  %3758 = vmatprep.subr.mxu0 %v2005_v48  ;;  %v1965_v31 = vld [vmem:[#allocation5 + $0x438] sm:$0xff]  ;;  %v5500_v48 = vxor.u32 2147483648, %v4749_v47  ;;  %v2124_v6 = vld [vmem:[#allocation5 + $0x930] sm:$0xff] }
 0x289   :  { %3790 = vmatpush1.msra.mxu1 %v2164_v55  ;;  %3759 = vmatpush2.msra.mxu0 %v2004_v21  ;;  %v5501_v21 = vxor.u32 2147483648, %v4745_v7  ;;  %v2340_v57 = vld [vmem:[#allocation5 + $0xff0] sm:$0xff] }
 0x28a   :  { %3791 = vmatprep.subr.mxu1 %v2157_v59  ;;  %3760 = vmatprep.subr.mxu0 %v1997_v24  ;;  %v1348_v55 = vsel %vm1346_vm13, %v4745_v7, %v5500_v48  ;;  %v1964_v59 = vld [vmem:[#allocation5 + $0x430] sm:$0xff]  ;;  %v1249_v24 = vsel %vm1242_vm1, %v1245_v23, %v1248_v8  ;;  %v2445_v8 = vld [vmem:[#allocation5 + $0x1338] sm:$0xff]  ;;  %vm4049_vm13 = vcmask 7168  }
 0x28b   :  { %3792 = vmatpush1.msra.mxu1 %v2156_v41  ;;  %3761 = vmatpush2.msra.mxu0 %v1996_v58  ;;  %v1351_v15 = vsel %vm1349_vm14, %v5501_v21, %v4749_v47  ;;  %v2117_v41 = vld [vmem:[#allocation5 + $0x8f8] sm:$0xff]  ;;  %v2116_v58 = vld [vmem:[#allocation5 + $0x8f0] sm:$0xff]  ;;  %v5388_v7 = vsel %vm410_vm0, nan, %v1249_v24 }
 0x28c   :  { %3793 = vmatprep.subr.mxu1 %v2149_v14  ;;  %3762 = vmatprep.subr.mxu0 %v1989_v20  ;;  %v1352_v14 = vsel %vm1345_vm5, %v1348_v55, %v1351_v15  ;;  %v2109_v20 = vld [vmem:[#allocation5 + $0x8b8] sm:$0xff]  ;;  %v2108_v47 = vld [vmem:[#allocation5 + $0x8b0] sm:$0xff] }
 0x28d   :  { %3794 = vmatpush1.msra.mxu1 %v2148_v25  ;;  %3763 = vmatpush2.msra.mxu0 %v1988_v43  ;;  %v2468_v25 = vld [vmem:[#allocation5 + $0x13f0] sm:$0xff]  ;;  %v5394_v43 = vsel %vm514_vm4, nan, %v1352_v14  ;;  %v2437_v48 = vld [vmem:[#allocation5 + $0x12f8] sm:$0xff]  ;;  %vm4008_vm4 = vcmp.lt.f32.partialorder %v5388_v7, 0.0 }
 0x28e   :  { %3795 = vmatprep.subr.mxu1 %v2141_v32  ;;  %3764 = vmatprep.subr.mxu0 %v1981_v40  ;;  %v2100_v32 = vld [vmem:[#allocation5 + $0x870] sm:$0xff]  ;;  %v1800_v40 = vand.u32 2147483647, %v5388_v7  ;;  %v1801_v52 = vand.u32 2147483647, %v5394_v43  ;;  %v2325_v21 = vld [vmem:[#allocation5 + $0xf78] sm:$0xff] }
 0x28f   :  { %3796 = vmatpush1.msra.mxu1 %v2140_v0  ;;  %3765 = vmatpush2.msra.mxu0 %v1980_v44  ;;  %v2093_v0 = vld [vmem:[#allocation5 + $0x838] sm:$0xff]  ;;  %v2460_v44 = vld [vmem:[#allocation5 + $0x13b0] sm:$0xff]  ;;  %vm4009_vm0 = vcmp.lt.f32.partialorder %v5394_v43, 0.0 }
 0x290   :  { %3797 = vmatprep.subr.mxu1 %v2133_v4  ;;  %3766 = vmatprep.subr.mxu0 %v1973_v13  ;;  %v2092_v4 = vld [vmem:[#allocation5 + $0x830] sm:$0xff]  ;;  %v2453_v13 = vld [vmem:[#allocation5 + $0x1378] sm:$0xff]  ;;  %v1809_v55 = vadd.f32 1e-06, %v1801_v52 }
 0x291   :  { %3798 = vmatpush1.msra.mxu1 %v2132_v39  ;;  %3767 = vmatpush2.msra.mxu0 %v1972_v33  ;;  %v2452_v23 = vld [vmem:[#allocation5 + $0x1370] sm:$0xff]  ;;  %v1808_v39 = vadd.f32 1e-06, %v1800_v40  ;;  %v2333_v33 = vld [vmem:[#allocation5 + $0xfb8] sm:$0xff] }
 0x292   :  { %3799 = vmatprep.subr.mxu1 %v2125_v61  ;;  %3768 = vmatprep.subr.mxu0 %v1965_v31  ;;  %v2444_v61 = vld [vmem:[#allocation5 + $0x1330] sm:$0xff]  ;;  %v2317_v24 = vld [vmem:[#allocation5 + $0xf38] sm:$0xff] }
 0x293   :  { %3800 = vmatpush1.msra.mxu1 %v2124_v6  ;;  %3769 = vmatpush2.msra.mxu0 %v1964_v59  ;;  %v2332_v31 = vld [vmem:[#allocation5 + $0xfb0] sm:$0xff]  ;;  %v2429_v59 = vld [vmem:[#allocation5 + $0x12b8] sm:$0xff]  ;;  %4271 = vlog2.f32 %v1808_v39 }
 0x294   :  { %3801 = vmatprep.subr.mxu1 %v2117_v41  ;;  %3770 = vmatprep.mubr.f32.mxu0 %v4809_v19  ;;  %v2436_v15 = vld [vmem:[#allocation5 + $0x12f0] sm:$0xff]  ;;  %v2421_v14 = vld [vmem:[#allocation5 + $0x1278] sm:$0xff]  ;;  %4273 = vlog2.f32 %v1809_v55 }
 0x295   :  { %3802 = vmatpush1.msra.mxu1 %v2116_v58  ;;  %3771 = vmatmul.mubr.f32.vlgmr.msra.gmra.mxu0 %v4946_v29  ;;  %v2324_v6 = vld [vmem:[#allocation5 + $0xf70] sm:$0xff]  ;;  %v2405_v40 = vld [vmem:[#allocation5 + $0x11f8] sm:$0xff] }
 0x296   :  { %3803 = vmatprep.subr.mxu1 %v2109_v20  ;;  %3841 = vmatprep.mubr.f32.mxu1 %v4848_v12  ;;  %v2428_v41 = vld [vmem:[#allocation5 + $0x12b0] sm:$0xff]  ;;  %v2309_v20 = vld [vmem:[#allocation5 + $0xef8] sm:$0xff] }
 0x297   :  { %3804 = vmatpush1.msra.mxu1 %v2108_v47  ;;  %3848 = vmatprep.subr.mxu0 %v2469_v30  ;;  %v2316_v58 = vld [vmem:[#allocation5 + $0xf30] sm:$0xff]  ;;  %v2285_v52 = vld [vmem:[#allocation5 + $0xe38] sm:$0xff] }
 0x298   :  { %3805 = vmatprep.subr.mxu1 %v2101_v49  ;;  %3849 = vmatpush1.msra.mxu0 %v2468_v25  ;;  %v2420_v47 = vld [vmem:[#allocation5 + $0x1270] sm:$0xff]  ;;  %v2413_v49 = vld [vmem:[#allocation5 + $0x1238] sm:$0xff] }
 0x299   :  { %3806 = vmatpush1.msra.mxu1 %v2100_v32  ;;  %3850 = vmatprep.subr.mxu0 %v2461_v46  ;;  %v2308_v30 = vld [vmem:[#allocation5 + $0xef0] sm:$0xff]  ;;  %v2301_v25 = vld [vmem:[#allocation5 + $0xeb8] sm:$0xff] }
 0x29a   :  { %3807 = vmatprep.subr.mxu1 %v2093_v0  ;;  %3851 = vmatpush1.msra.mxu0 %v2460_v44  ;;  %v2412_v32 = vld [vmem:[#allocation5 + $0x1230] sm:$0xff]  ;;  %v2293_v0 = vld [vmem:[#allocation5 + $0xe78] sm:$0xff] }
 0x29b   :  { %3808 = vmatpush1.msra.mxu1 %v2092_v4  ;;  %3852 = vmatprep.subr.mxu0 %v2453_v13  ;;  %v2300_v46 = vld [vmem:[#allocation5 + $0xeb0] sm:$0xff]  ;;  %v2397_v13 = vld [vmem:[#allocation5 + $0x11b8] sm:$0xff] }
 0x29c   :  { %3809 = vmatprep.subr.mxu1 %v2341_v22  ;;  %3853 = vmatpush1.msra.mxu0 %v2452_v23  ;;  %v2404_v44 = vld [vmem:[#allocation5 + $0x11f0] sm:$0xff]  ;;  %v2629_v43 = vld [vmem:[#allocation5 + $0x18f8] sm:$0xff] }
 0x29d   :  { %3810 = vmatpush2.msra.mxu1 %v2340_v57  ;;  %3854 = vmatprep.subr.mxu0 %v2445_v8  ;;  %v2292_v4 = vld [vmem:[#allocation5 + $0xe70] sm:$0xff]  ;;  %v2389_v57 = vld [vmem:[#allocation5 + $0x1178] sm:$0xff] }
 0x29e   :  { %3811 = vmatprep.subr.mxu1 %v2333_v33  ;;  %3855 = vmatpush1.msra.mxu0 %v2444_v61  ;;  %v2396_v22 = vld [vmem:[#allocation5 + $0x11b0] sm:$0xff]  ;;  %v2277_v8 = vld [vmem:[#allocation5 + $0xdf8] sm:$0xff] }
 0x29f   :  { %3812 = vmatpush2.msra.mxu1 %v2332_v31  ;;  %3856 = vmatprep.subr.mxu0 %v2437_v48  ;;  %v2284_v23 = vld [vmem:[#allocation5 + $0xe30] sm:$0xff]  ;;  %v2381_v61 = vld [vmem:[#allocation5 + $0x1138] sm:$0xff] }
 0x2a0   :  { %3813 = vmatprep.subr.mxu1 %v2325_v21  ;;  %3857 = vmatpush1.msra.mxu0 %v2436_v15  ;;  %v2388_v39 = vld [vmem:[#allocation5 + $0x1170] sm:$0xff]  ;;  %v2269_v31 = vld [vmem:[#allocation5 + $0xdb8] sm:$0xff]  ;;  %v4272_v55 = vpop.eup %4271 }
 0x2a1   :  { %3814 = vmatpush2.msra.mxu1 %v2324_v6  ;;  %3858 = vmatprep.subr.mxu0 %v2429_v59  ;;  %v2276_v33 = vld [vmem:[#allocation5 + $0xdf0] sm:$0xff]  ;;  %v2373_v15 = vld [vmem:[#allocation5 + $0x10f8] sm:$0xff] }
 0x2a2   :  { %3815 = vmatprep.subr.mxu1 %v2317_v24  ;;  %3859 = vmatpush1.msra.mxu0 %v2428_v41  ;;  %v2380_v48 = vld [vmem:[#allocation5 + $0x1130] sm:$0xff]  ;;  %v2261_v6 = vld [vmem:[#allocation5 + $0xd78] sm:$0xff]  ;;  %v4274_v24 = vpop.eup %4273  ;;  %v3204_v41 = vpop.f32.mrf.mxu0 }
 0x2a3   :  { %3816 = vmatpush2.msra.mxu1 %v2316_v58  ;;  %3860 = vmatprep.subr.mxu0 %v2421_v14  ;;  %v2268_v21 = vld [vmem:[#allocation5 + $0xdb0] sm:$0xff]  ;;  %v2365_v14 = vld [vmem:[#allocation5 + $0x10b8] sm:$0xff] }
 0x2a4   :  { %3817 = vmatprep.subr.mxu1 %v2309_v20  ;;  %3861 = vmatpush1.msra.mxu0 %v2420_v47  ;;  %v2372_v59 = vld [vmem:[#allocation5 + $0x10f0] sm:$0xff]  ;;  %v1819_v20 = vmul.f32 0.6931472, %v4272_v55  ;;  %v2253_v47 = vld [vmem:[#allocation5 + $0xd38] sm:$0xff] }
 0x2a5   :  { %3818 = vmatpush2.msra.mxu1 %v2308_v30  ;;  %3862 = vmatprep.subr.mxu0 %v2413_v49  ;;  %v2260_v58 = vld [vmem:[#allocation5 + $0xd70] sm:$0xff] }
 0x2a6   :  { %3819 = vmatprep.subr.mxu1 %v2301_v25  ;;  %3863 = vmatpush1.msra.mxu0 %v2412_v32  ;;  %v2364_v30 = vld [vmem:[#allocation5 + $0x10b0] sm:$0xff]  ;;  %v2357_v25 = vld [vmem:[#allocation5 + $0x1078] sm:$0xff]  ;;  %v1821_v32 = vmul.f32 0.6931472, %v4274_v24 }
 0x2a7   :  { %3820 = vmatpush2.msra.mxu1 %v2300_v46  ;;  %3864 = vmatprep.subr.mxu0 %v2405_v40  ;;  %v2252_v49 = vld [vmem:[#allocation5 + $0xd30] sm:$0xff]  ;;  %v2245_v46 = vld [vmem:[#allocation5 + $0xcf8] sm:$0xff] }
 0x2a8   :  { %3821 = vmatprep.subr.mxu1 %v2293_v0  ;;  %3865 = vmatpush1.msra.mxu0 %v2404_v44  ;;  %v2356_v40 = vld [vmem:[#allocation5 + $0x1070] sm:$0xff]  ;;  %v3275_v0 = vpop.f32.mrf.mxu1  ;;  %v3206_v44 = vpop.f32.mrf.mxu0 }
 0x2a9   :  { %3822 = vmatpush2.msra.mxu1 %v2292_v4  ;;  %3866 = vmatprep.subr.mxu0 %v2397_v13  ;;  %v2244_v4 = vld [vmem:[#allocation5 + $0xcf0] sm:$0xff]  ;;  %v2349_v13 = vld [vmem:[#allocation5 + $0x1038] sm:$0xff] }
 0x2aa   :  { %3823 = vmatprep.subr.mxu1 %v2285_v52  ;;  %3867 = vmatpush1.msra.mxu0 %v2396_v22  ;;  %v3205_v52 = vadd.f32 %v3204_v41, %v1819_v20  ;;  %v2237_v22 = vld [vmem:[#allocation5 + $0xcb8] sm:$0xff]  ;;  %v2228_v55 = vld [vmem:[#allocation5 + $0xc70] sm:$0xff] }
 0x2ab   :  { %3824 = vmatpush2.msra.mxu1 %v2284_v23  ;;  %3868 = vmatprep.subr.mxu0 %v2389_v57  ;;  %v2348_v23 = vld [vmem:[#allocation5 + $0x1030] sm:$0xff] }
 0x2ac   :  { %3825 = vmatprep.subr.mxu1 %v2277_v8  ;;  %3869 = vmatpush1.msra.mxu0 %v2388_v39  ;;  %v2236_v57 = vld [vmem:[#allocation5 + $0xcb0] sm:$0xff]  ;;  %v3346_v8 = vpop.f32.mrf.mxu0  ;;  %v2597_v39 = vld [vmem:[#allocation5 + $0x17f8] sm:$0xff] }
 0x2ad   :  { %3826 = vmatpush2.msra.mxu1 %v2276_v33  ;;  %3870 = vmatprep.subr.mxu0 %v2381_v61  ;;  %v3207_v33 = vadd.f32 %v3206_v44, %v1821_v32  ;;  %v2229_v61 = vld [vmem:[#allocation5 + $0xc78] sm:$0xff]  ;;  %v2220_v24 = vld [vmem:[#allocation5 + $0xc30] sm:$0xff] }
 0x2ae   :  { %3827 = vmatprep.subr.mxu1 %v2269_v31  ;;  %3871 = vmatpush1.msra.mxu0 %v2380_v48  ;;  %v2596_v31 = vld [vmem:[#allocation5 + $0x17f0] sm:$0xff]  ;;  %v3277_v48 = vpop.f32.mrf.mxu1  ;;  %v3348_v41 = vpop.f32.mrf.mxu0  ;;  %v2717_v32 = vld [vmem:[#allocation5 + $0x1bb8] sm:$0xff] }
 0x2af   :  { %3828 = vmatpush2.msra.mxu1 %v2268_v21  ;;  %3872 = vmatprep.subr.mxu0 %v2373_v15  ;;  %v2589_v21 = vld [vmem:[#allocation5 + $0x17b8] sm:$0xff]  ;;  %v3276_v15 = vadd.f32 %v3275_v0, %v3205_v52  ;;  %v2716_v0 = vld [vmem:[#allocation5 + $0x1bb0] sm:$0xff] }
 0x2b0   :  { %3829 = vmatprep.subr.mxu1 %v2261_v6  ;;  %3873 = vmatpush1.msra.mxu0 %v2372_v59  ;;  %v2221_v6 = vld [vmem:[#allocation5 + $0xc38] sm:$0xff]  ;;  %v2588_v59 = vld [vmem:[#allocation5 + $0x17b0] sm:$0xff] }
 0x2b1   :  { %3830 = vmatpush2.msra.mxu1 %v2260_v58  ;;  %3874 = vmatprep.subr.mxu0 %v2365_v14  ;;  %v2581_v58 = vld [vmem:[#allocation5 + $0x1778] sm:$0xff]  ;;  %v3278_v14 = vadd.f32 %v3277_v48, %v3207_v33  ;;  %v3347_v20 = vadd.f32 %v3346_v8, %v3276_v15  ;;  %v2572_v44 = vld [vmem:[#allocation5 + $0x1730] sm:$0xff] }
 0x2b2   :  { %3831 = vmatprep.subr.mxu1 %v2253_v47  ;;  %3875 = vmatpush1.msra.mxu0 %v2364_v30  ;;  %v2725_v47 = vld [vmem:[#allocation5 + $0x1bf8] sm:$0xff]  ;;  %v2724_v30 = vld [vmem:[#allocation5 + $0x1bf0] sm:$0xff] }
 0x2b3   :  { %3832 = vmatpush2.msra.mxu1 %v2252_v49  ;;  %3876 = vmatprep.subr.mxu0 %v2357_v25  ;;  %v2580_v49 = vld [vmem:[#allocation5 + $0x1770] sm:$0xff]  ;;  %v3349_v25 = vadd.f32 %v3348_v41, %v3278_v14  ;;  %v2565_v52 = vld [vmem:[#allocation5 + $0x16f8] sm:$0xff] }
 0x2b4   :  { %3833 = vmatprep.subr.mxu1 %v2245_v46  ;;  %3877 = vmatpush1.msra.mxu0 %v2356_v40  ;;  %v2573_v46 = vld [vmem:[#allocation5 + $0x1738] sm:$0xff]  ;;  %v2700_v48 = vld [vmem:[#allocation5 + $0x1b30] sm:$0xff] }
 0x2b5   :  { %3834 = vmatpush2.msra.mxu1 %v2244_v4  ;;  %3878 = vmatprep.subr.mxu0 %v2349_v13  ;;  %v2709_v13 = vld [vmem:[#allocation5 + $0x1b78] sm:$0xff]  ;;  %v2540_v14 = vld [vmem:[#allocation5 + $0x1630] sm:$0xff] }
 0x2b6   :  { %3835 = vmatprep.subr.mxu1 %v2237_v22  ;;  %3879 = vmatpush1.msra.mxu0 %v2348_v23  ;;  %v2708_v23 = vld [vmem:[#allocation5 + $0x1b70] sm:$0xff]  ;;  %v2701_v33 = vld [vmem:[#allocation5 + $0x1b38] sm:$0xff] }
 0x2b7   :  { %3836 = vmatpush2.msra.mxu1 %v2236_v57  ;;  %3880 = vmatprep.subr.mxu0 %v2597_v39  ;;  %v2564_v57 = vld [vmem:[#allocation5 + $0x16f0] sm:$0xff]  ;;  %v2693_v15 = vld [vmem:[#allocation5 + $0x1af8] sm:$0xff] }
 0x2b8   :  { %3837 = vmatprep.subr.mxu1 %v2229_v61  ;;  %3881 = vmatpush2.msra.mxu0 %v2596_v31  ;;  %v2557_v61 = vld [vmem:[#allocation5 + $0x16b8] sm:$0xff]  ;;  %v4038_v31 = vadd.f32 %v4809_v19, %v4946_v29  ;;  %v2684_v29 = vld [vmem:[#allocation5 + $0x1ab0] sm:$0xff] }
 0x2b9   :  { %3838 = vmatpush2.msra.mxu1 %v2228_v55  ;;  %3882 = vmatprep.subr.mxu0 %v2589_v21  ;;  %v2556_v55 = vld [vmem:[#allocation5 + $0x16b0] sm:$0xff]  ;;  %v2685_v41 = vld [vmem:[#allocation5 + $0x1ab8] sm:$0xff] }
 0x2ba   :  { %3839 = vmatprep.subr.mxu1 %v2221_v6  ;;  %3883 = vmatpush2.msra.mxu0 %v2588_v59  ;;  %v2549_v6 = vld [vmem:[#allocation5 + $0x1678] sm:$0xff]  ;;  %v2692_v59 = vld [vmem:[#allocation5 + $0x1af0] sm:$0xff]  ;;  %v4039_v19 = vadd.f32 %v4038_v31, %v5072_v51 }
 0x2bb   :  { %3840 = vmatpush2.msra.mxu1 %v2220_v24  ;;  %3884 = vmatprep.subr.mxu0 %v2581_v58  ;;  %v2548_v24 = vld [vmem:[#allocation5 + $0x1670] sm:$0xff]  ;;  %v2541_v58 = vld [vmem:[#allocation5 + $0x1638] sm:$0xff] }
 0x2bc   :  { %3919 = vmatprep.subr.mxu1 %v2725_v47  ;;  %v3417_v40 = vpop.f32.mrf.mxu1  ;;  %3842 = vmatmul.mubr.f32.vlgmr.msra.gmra.mxu1 %v5072_v51  ;;  %v2533_v47 = vld [vmem:[#allocation5 + $0x15f8] sm:$0xff]  ;;  %v2668_v51 = vld [vmem:[#allocation5 + $0x1a30] sm:$0xff] }
 0x2bd   :  { %v3418_v4 = vadd.f32 %v3417_v40, %v3347_v20  ;;  %3920 = vmatpush1.msra.mxu1 %v2724_v30  ;;  %3885 = vmatpush2.msra.mxu0 %v2580_v49  ;;  %v2677_v20 = vld [vmem:[#allocation5 + $0x1a78] sm:$0xff]  ;;  %v2676_v30 = vld [vmem:[#allocation5 + $0x1a70] sm:$0xff] }
 0x2be   :  { %3921 = vmatprep.subr.mxu1 %v2717_v32  ;;  %v3419_v22 = vpop.f32.mrf.mxu1  ;;  %3886 = vmatprep.subr.mxu0 %v2573_v46  ;;  %v2532_v49 = vld [vmem:[#allocation5 + $0x15f0] sm:$0xff]  ;;  %v2525_v32 = vld [vmem:[#allocation5 + $0x15b8] sm:$0xff]  ;;  %v4040_v46 = vadd.f32 %v4039_v19, %v4848_v12 }
 0x2bf   :  { %v3994_v8 = vmul.f32 1.442695, %v3418_v4  ;;  %v3420_v39 = vadd.f32 %v3419_v22, %v3349_v25  ;;  %3922 = vmatpush1.msra.mxu1 %v2716_v0  ;;  %3887 = vmatpush2.msra.mxu0 %v2572_v44  ;;  %v2669_v25 = vld [vmem:[#allocation5 + $0x1a38] sm:$0xff]  ;;  %v2524_v40 = vld [vmem:[#allocation5 + $0x15b0] sm:$0xff] }
 0x2c0   :  { %3923 = vmatprep.subr.mxu1 %v2709_v13  ;;  %3888 = vmatprep.subr.mxu0 %v2565_v52  ;;  %v2661_v0 = vld [vmem:[#allocation5 + $0x19f8] sm:$0xff]  ;;  %v2660_v4 = vld [vmem:[#allocation5 + $0x19f0] sm:$0xff]  ;;  %v4041_v22 = vadd.f32 %v4040_v46, %v5253_v36 }
 0x2c1   :  { %4275 = vpow2.f32 %v3994_v8  ;;  %v3996_v21 = vmul.f32 1.442695, %v3420_v39  ;;  %3924 = vmatpush1.msra.mxu1 %v2708_v23  ;;  %3889 = vmatpush2.msra.mxu0 %v2564_v57  ;;  %v2517_v44 = vld [vmem:[#allocation5 + $0x1578] sm:$0xff]  ;;  %v2516_v13 = vld [vmem:[#allocation5 + $0x1570] sm:$0xff]  ;;  %v4016_v23 = vsel %vm4008_vm4, -1.0, %v4373_v53 }
 0x2c2   :  { %3925 = vmatprep.subr.mxu1 %v2701_v33  ;;  %3890 = vmatprep.subr.mxu0 %v2557_v61  ;;  %v2653_v52 = vld [vmem:[#allocation5 + $0x19b8] sm:$0xff]  ;;  %v2652_v7 = vld [vmem:[#allocation5 + $0x19b0] sm:$0xff]  ;;  %v4017_v61 = vsel %vm4009_vm0, -1.0, %v4373_v53 }
 0x2c3   :  { %4277 = vpow2.f32 %v3996_v21  ;;  %3926 = vmatpush1.msra.mxu1 %v2700_v48  ;;  %3891 = vmatpush2.msra.mxu0 %v2556_v55  ;;  %v2509_v12 = vld [vmem:[#allocation5 + $0x1538] sm:$0xff]  ;;  %v2508_v57 = vld [vmem:[#allocation5 + $0x1530] sm:$0xff] }
 0x2c4   :  { %3927 = vmatprep.subr.mxu1 %v2693_v15  ;;  %3892 = vmatprep.subr.mxu0 %v2549_v6  ;;  %v2645_v8 = vld [vmem:[#allocation5 + $0x1978] sm:$0xff]  ;;  %v2644_v31 = vld [vmem:[#allocation5 + $0x1970] sm:$0xff]  ;;  %v4042_v6 = vadd.f32 %v4041_v22, %v5220_v16 }
 0x2c5   :  { %3928 = vmatpush1.msra.mxu1 %v2692_v59  ;;  %3893 = vmatpush2.msra.mxu0 %v2548_v24  ;;  %v2501_v39 = vld [vmem:[#allocation5 + $0x14f8] sm:$0xff]  ;;  %v2500_v48 = vld [vmem:[#allocation5 + $0x14f0] sm:$0xff] }
 0x2c6   :  { %3929 = vmatprep.subr.mxu1 %v2685_v41  ;;  %3894 = vmatprep.subr.mxu0 %v2541_v58  ;;  %v2637_v21 = vld [vmem:[#allocation5 + $0x1938] sm:$0xff]  ;;  %v2636_v24 = vld [vmem:[#allocation5 + $0x1930] sm:$0xff] }
 0x2c7   :  { %3930 = vmatpush1.msra.mxu1 %v2684_v29  ;;  %3895 = vmatpush2.msra.mxu0 %v2540_v14  ;;  %v2493_v15 = vld [vmem:[#allocation5 + $0x14b8] sm:$0xff]  ;;  %v2492_v41 = vld [vmem:[#allocation5 + $0x14b0] sm:$0xff] }
 0x2c8   :  { %3931 = vmatprep.subr.mxu1 %v2677_v20  ;;  %3896 = vmatprep.subr.mxu0 %v2533_v47  ;;  %v2485_v19 = vld [vmem:[#allocation5 + $0x1478] sm:$0xff]  ;;  %v2628_v29 = vld [vmem:[#allocation5 + $0x18f0] sm:$0xff] }
 0x2c9   :  { %3932 = vmatpush1.msra.mxu1 %v2676_v30  ;;  %3897 = vmatpush2.msra.mxu0 %v2532_v49  ;;  %v2484_v14 = vld [vmem:[#allocation5 + $0x1470] sm:$0xff]  ;;  %v2621_v20 = vld [vmem:[#allocation5 + $0x18b8] sm:$0xff]  ;;  %v4043_v30 = vadd.f32 %v4042_v6, %v5315_v27 }
 0x2ca   :  { %3933 = vmatprep.subr.mxu1 %v2669_v25  ;;  %3898 = vmatprep.subr.mxu0 %v2525_v32  ;;  %v2477_v47 = vld [vmem:[#allocation5 + $0x1438] sm:$0xff]  ;;  %v2620_v49 = vld [vmem:[#allocation5 + $0x18b0] sm:$0xff] }
 0x2cb   :  { %3934 = vmatpush1.msra.mxu1 %v2668_v51  ;;  %3899 = vmatpush2.msra.mxu0 %v2524_v40  ;;  %v2476_v25 = vld [vmem:[#allocation5 + $0x1430] sm:$0xff]  ;;  %v2613_v32 = vld [vmem:[#allocation5 + $0x1878] sm:$0xff]  ;;  %v4044_v40 = vadd.f32 %v4043_v30, %v5297_v50  ;;  %v1447_v30 = vand.u32 3, %v5126_v28 }
 0x2cc   :  { %3935 = vmatprep.subr.mxu1 %v2661_v0  ;;  %3900 = vmatprep.subr.mxu0 %v2517_v44  ;;  %v2612_v46 = vld [vmem:[#allocation5 + $0x1870] sm:$0xff]  ;;  %v2605_v51 = vld [vmem:[#allocation5 + $0x1838] sm:$0xff] }
 0x2cd   :  { %3936 = vmatpush1.msra.mxu1 %v2660_v4  ;;  %3901 = vmatpush2.msra.mxu0 %v2516_v13  ;;  %v2604_v0 = vld [vmem:[#allocation5 + $0x1830] sm:$0xff]  ;;  %v2853_v44 = vld [vmem:[#allocation5 + $0x1ff8] sm:$0xff]  ;;  %vm1449_vm6 = vcmp.eq.s32.totalorder %v1447_v30, 0  ;;  %vm1452_vm8 = vcmp.eq.s32.totalorder %v1447_v30, 2  ;;  %vm1448_vm9 = vcmp.lt.s32.totalorder %v1447_v30, 2 }
 0x2ce   :  { %v4276_v33 = vpop.eup %4275  ;;  %3937 = vmatprep.subr.mxu1 %v2653_v52  ;;  %3902 = vmatprep.subr.mxu0 %v2509_v12  ;;  %v2852_v4 = vld [vmem:[#allocation5 + $0x1ff0] sm:$0xff]  ;;  %v2845_v13 = vld [vmem:[#allocation5 + $0x1fb8] sm:$0xff] }
 0x2cf   :  { %v4024_v55 = vmul.f32 %v4276_v33, %v4016_v23  ;;  %3938 = vmatpush1.msra.mxu1 %v2652_v7  ;;  %3903 = vmatpush2.msra.mxu0 %v2508_v57  ;;  %v2844_v52 = vld [vmem:[#allocation5 + $0x1fb0] sm:$0xff]  ;;  %v2837_v12 = vld [vmem:[#allocation5 + $0x1f78] sm:$0xff] }
 0x2d0   :  { %v4278_v59 = vpop.eup %4277  ;;  %3939 = vmatprep.subr.mxu1 %v2645_v8  ;;  %3904 = vmatprep.subr.mxu0 %v2501_v39  ;;  %v2836_v22 = vld [vmem:[#allocation5 + $0x1f70] sm:$0xff]  ;;  %v2829_v23 = vld [vmem:[#allocation5 + $0x1f38] sm:$0xff] }
 0x2d1   :  { %4032 = vst [vmem:[#allocation7 + $0x10] sm:$0xff] %v4024_v55  ;;  %v4025_v58 = vmul.f32 %v4278_v59, %v4017_v61  ;;  %3940 = vmatpush1.msra.mxu1 %v2644_v31  ;;  %3905 = vmatpush2.msra.mxu0 %v2500_v48  ;;  %v2821_v7 = vld [vmem:[#allocation5 + $0x1ef8] sm:$0xff]  ;;  %v2804_v39 = vld [vmem:[#allocation5 + $0x1e70] sm:$0xff] }
 0x2d2   :  { %3941 = vmatprep.subr.mxu1 %v2637_v21  ;;  %3906 = vmatprep.subr.mxu0 %v2493_v15  ;;  %v2813_v57 = vld [vmem:[#allocation5 + $0x1eb8] sm:$0xff]  ;;  %v2796_v61 = vld [vmem:[#allocation5 + $0x1e30] sm:$0xff] }
 0x2d3   :  { %4033 = vst [vmem:[#allocation7 + $0x18] sm:$0xff] %v4025_v58  ;;  %3942 = vmatpush1.msra.mxu1 %v2636_v24  ;;  %3907 = vmatpush2.msra.mxu0 %v2492_v41  ;;  %v2805_v8 = vld [vmem:[#allocation5 + $0x1e78] sm:$0xff]  ;;  %v2788_v48 = vld [vmem:[#allocation5 + $0x1df0] sm:$0xff] }
 0x2d4   :  { %3943 = vmatprep.subr.mxu1 %v2629_v43  ;;  %3908 = vmatprep.subr.mxu0 %v2485_v19  ;;  %v2797_v33 = vld [vmem:[#allocation5 + $0x1e38] sm:$0xff]  ;;  %v2780_v21 = vld [vmem:[#allocation5 + $0x1db0] sm:$0xff] }
 0x2d5   :  { %3944 = vmatpush1.msra.mxu1 %v2628_v29  ;;  %3909 = vmatpush2.msra.mxu0 %v2484_v14  ;;  %v2789_v31 = vld [vmem:[#allocation5 + $0x1df8] sm:$0xff]  ;;  %v2772_v6 = vld [vmem:[#allocation5 + $0x1d70] sm:$0xff] }
 0x2d6   :  { %3945 = vmatprep.subr.mxu1 %v2621_v20  ;;  %3910 = vmatprep.subr.mxu0 %v2477_v47  ;;  %v2781_v55 = vld [vmem:[#allocation5 + $0x1db8] sm:$0xff]  ;;  %v2764_v24 = vld [vmem:[#allocation5 + $0x1d30] sm:$0xff] }
 0x2d7   :  { %3946 = vmatpush1.msra.mxu1 %v2620_v49  ;;  %3911 = vmatpush2.msra.mxu0 %v2476_v25  ;;  %v2773_v15 = vld [vmem:[#allocation5 + $0x1d78] sm:$0xff]  ;;  %v2756_v58 = vld [vmem:[#allocation5 + $0x1cf0] sm:$0xff]  ;;  %v1550_v49 = vand.u32 3, %v4969_v56  ;;  %v1451_v25 = vsel %vm1449_vm6, %v5187_v2, %v623_v11  ;;  %v5503_v56 = vxor.u32 2147483648, %v5070_v42 }
 0x2d8   :  { %3947 = vmatprep.subr.mxu1 %v2613_v32  ;;  %3912 = vmatprep.mubr.f32.mxu0 %v5220_v16  ;;  %v2828_v16 = vld [vmem:[#allocation5 + $0x1f30] sm:$0xff]  ;;  %v2765_v59 = vld [vmem:[#allocation5 + $0x1d38] sm:$0xff]  ;;  %v1454_v32 = vsel %vm1452_vm8, %v626_v1, %v5195_v54 }
 0x2d9   :  { %3948 = vmatpush1.msra.mxu1 %v2612_v46  ;;  %3983 = vmatprep.mubr.f32.mxu1 %v5297_v50  ;;  %v2820_v50 = vld [vmem:[#allocation5 + $0x1ef0] sm:$0xff]  ;;  %v2757_v41 = vld [vmem:[#allocation5 + $0x1cf8] sm:$0xff]  ;;  %vm1552_vm12 = vcmp.eq.s32.totalorder %v1550_v49, 0  ;;  %vm1555_vm3 = vcmp.eq.s32.totalorder %v1550_v49, 2  ;;  %vm1551_vm10 = vcmp.lt.s32.totalorder %v1550_v49, 2 }
 0x2da   :  { %3949 = vmatprep.subr.mxu1 %v2605_v51  ;;  %3913 = vmatmul.mubr.f32.vlgmr.msra.gmra.mxu0 %v5253_v36  ;;  %v2812_v36 = vld [vmem:[#allocation5 + $0x1eb0] sm:$0xff]  ;;  %v2749_v43 = vld [vmem:[#allocation5 + $0x1cb8] sm:$0xff]  ;;  %v1557_v46 = vsel %vm1555_vm3, %v5503_v56, %v5077_v34  ;;  %v1455_v51 = vsel %vm1448_vm9, %v1451_v25, %v1454_v32 }
 0x2db   :  { %3950 = vmatpush1.msra.mxu1 %v2604_v0  ;;  %4045 = vadd.xlane.f32.xlu0 %v4044_v40  ;;  %v2748_v19 = vld [vmem:[#allocation5 + $0x1cb0] sm:$0xff]  ;;  %v2741_v29 = vld [vmem:[#allocation5 + $0x1c78] sm:$0xff]  ;;  %v1456_v0 = vsel %vm618_vm7, nan, %v1455_v51 }
 0x2dc   :  { %3951 = vmatprep.subr.mxu1 %v2853_v44  ;;  %v2740_v14 = vld [vmem:[#allocation5 + $0x1c70] sm:$0xff]  ;;  %v2733_v20 = vld [vmem:[#allocation5 + $0x1c38] sm:$0xff]  ;;  %v1802_v44 = vand.u32 2147483647, %v1456_v0 }
 0x2dd   :  { %3952 = vmatpush2.msra.mxu1 %v2852_v4  ;;  %v2732_v47 = vld [vmem:[#allocation5 + $0x1c30] sm:$0xff] }
 0x2de   :  { %3953 = vmatprep.subr.mxu1 %v2845_v13  ;;  %v1810_v54 = vadd.f32 1e-06, %v1802_v44 }
 0x2df   :  { %3954 = vmatpush2.msra.mxu1 %v2844_v52  ;;  %v3488_v52 = vpop.f32.mrf.mxu0 }
 0x2e0   :  { %3955 = vmatprep.subr.mxu1 %v2837_v12  ;;  %4279 = vlog2.f32 %v1810_v54 }
 0x2e1   :  { %3956 = vmatpush2.msra.mxu1 %v2836_v22  ;;  %v3490_v22 = vpop.f32.mrf.mxu0 }
 0x2e2   :  { %3957 = vmatprep.subr.mxu1 %v2829_v23 }
 0x2e3   :  { %3958 = vmatpush2.msra.mxu1 %v2828_v16 }
 0x2e4   :  { %3959 = vmatprep.subr.mxu1 %v2821_v7 }
 0x2e5   :  { %3960 = vmatpush2.msra.mxu1 %v2820_v50 }
 0x2e6   :  { %3961 = vmatprep.subr.mxu1 %v2813_v57 }
 0x2e7   :  { %3962 = vmatpush2.msra.mxu1 %v2812_v36 }
 0x2e8   :  { %3963 = vmatprep.subr.mxu1 %v2805_v8 }
 0x2e9   :  { %3964 = vmatpush2.msra.mxu1 %v2804_v39 }
 0x2ea   :  { %3965 = vmatprep.subr.mxu1 %v2797_v33 }
 0x2eb   :  { %3966 = vmatpush2.msra.mxu1 %v2796_v61 }
 0x2ec   :  { %3967 = vmatprep.subr.mxu1 %v2789_v31 }
 0x2ed   :  { %3968 = vmatpush2.msra.mxu1 %v2788_v48  ;;  %v4280_v4 = vpop.eup %4279 }
 0x2ee   :  { %3969 = vmatprep.subr.mxu1 %v2781_v55  ;;  %v1823_v12 = vmul.f32 0.6931472, %v4280_v4 }
 0x2ef   :  { %3970 = vmatpush2.msra.mxu1 %v2780_v21 }
 0x2f0   :  { %3971 = vmatprep.subr.mxu1 %v2773_v15  ;;  %v3489_v23 = vadd.f32 %v3488_v52, %v1823_v12 }
 0x2f1   :  { %3972 = vmatpush2.msra.mxu1 %v2772_v6 }
 0x2f2   :  { %3973 = vmatprep.subr.mxu1 %v2765_v59 }
 0x2f3   :  { %3974 = vmatpush2.msra.mxu1 %v2764_v24 }
 0x2f4   :  { %3975 = vmatprep.subr.mxu1 %v2757_v41 }
 0x2f5   :  { %3976 = vmatpush2.msra.mxu1 %v2756_v58 }
 0x2f6   :  { %3977 = vmatprep.subr.mxu1 %v2749_v43 }
 0x2f7   :  { %3978 = vmatpush2.msra.mxu1 %v2748_v19 }
 0x2f8   :  { %3979 = vmatprep.subr.mxu1 %v2741_v29  ;;  %v1653_v29 = vand.u32 3, %v5294_v63 }
 0x2f9   :  { %3980 = vmatpush2.msra.mxu1 %v2740_v14  ;;  %v1756_v14 = vand.u32 3, %v5247_v37 }
 0x2fa   :  { %3981 = vmatprep.subr.mxu1 %v2733_v20  ;;  %vm1655_vm14 = vcmp.eq.s32.totalorder %v1653_v29, 0  ;;  %vm1658_vm1 = vcmp.eq.s32.totalorder %v1653_v29, 2  ;;  %vm1654_vm0 = vcmp.lt.s32.totalorder %v1653_v29, 2 }
 0x2fb   :  { %3982 = vmatpush2.msra.mxu1 %v2732_v47  ;;  %vm1758_vm5 = vcmp.eq.s32.totalorder %v1756_v14, 0  ;;  %vm1761_vm4 = vcmp.eq.s32.totalorder %v1756_v14, 2  ;;  %v1657_v20 = vsel %vm1655_vm14, %v5299_v5, %v831_v45  ;;  %v1660_v47 = vsel %vm1658_vm1, %v834_v10, %v5302_v9 }
 0x2fc   :  { %3984 = vmatmul.mubr.f32.vlgmr.msra.gmra.mxu1 %v5315_v27  ;;  %v5502_v27 = vxor.u32 2147483648, %v5077_v34  ;;  %v3559_v34 = vpop.f32.mrf.mxu1  ;;  %vm1757_vm6 = vcmp.lt.s32.totalorder %v1756_v14, 2  ;;  %v1760_v63 = vsel %vm1758_vm5, %v5257_v3, %v935_v35  ;;  %v1763_v37 = vsel %vm1761_vm4, %v938_v18, %v5259_v38 }
 0x2fd   :  { %v3560_v50 = vadd.f32 %v3559_v34, %v3489_v23  ;;  %v1661_v30 = vsel %vm1654_vm0, %v1657_v20, %v1660_v47  ;;  %v1764_v49 = vsel %vm1757_vm6, %v1760_v63, %v1763_v37 }
 0x2fe   :  { %v1554_v28 = vsel %vm1552_vm12, %v5070_v42, %v5502_v27  ;;  %v3561_v7 = vpop.f32.mrf.mxu1  ;;  %v1662_v25 = vsel %vm826_vm11, nan, %v1661_v30  ;;  %v1765_v45 = vsel %vm930_vm2, nan, %v1764_v49 }
 0x2ff   :  { %v1558_v40 = vsel %vm1551_vm10, %v1554_v28, %v1557_v46  ;;  %v1804_v32 = vand.u32 2147483647, %v1662_v25  ;;  %v1805_v5 = vand.u32 2147483647, %v1765_v45  ;;  %vm4012_vm2 = vcmp.lt.f32.partialorder %v1662_v25, 0.0 }
 0x300   :  { %v1559_v11 = vsel %vm722_vm15, nan, %v1558_v40  ;;  %vm4010_vm15 = vcmp.lt.f32.partialorder %v1456_v0, 0.0  ;;  %vm4013_vm11 = vcmp.lt.f32.partialorder %v1765_v45, 0.0 }
 0x301   :  { %v1803_v2 = vand.u32 2147483647, %v1559_v11  ;;  %vm4011_vm7 = vcmp.lt.f32.partialorder %v1559_v11, 0.0  ;;  %v4018_v21 = vsel %vm4010_vm15, -1.0, %v4373_v53  ;;  %v1812_v9 = vadd.f32 1e-06, %v1804_v32 }
 0x302   :  { %v4019_v6 = vsel %vm4011_vm7, -1.0, %v4373_v53  ;;  %v1813_v10 = vadd.f32 1e-06, %v1805_v5 }
 0x303   :  { %v1811_v1 = vadd.f32 1e-06, %v1803_v2 }
 0x305   :  { %4281 = vlog2.f32 %v1811_v1 }
 0x311   :  { %v3630_v16 = vpop.f32.mrf.mxu0 }
 0x312   :  { %v4282_v13 = vpop.eup %4281  ;;  %v3631_v36 = vadd.f32 %v3630_v16, %v3560_v50 }
 0x313   :  { %v1825_v42 = vmul.f32 0.6931472, %v4282_v13  ;;  %v3632_v62 = vpop.f32.mrf.mxu0 }
 0x315   :  { %v3491_v17 = vadd.f32 %v3490_v22, %v1825_v42  ;;  %v4020_v42 = vsel %vm4012_vm2, -1.0, %v4373_v53  ;;  %v4021_v22 = vsel %vm4013_vm11, -1.0, %v4373_v53 }
 0x317   :  { %v3562_v57 = vadd.f32 %v3561_v7, %v3491_v17 }
 0x319   :  { %v3633_v8 = vadd.f32 %v3632_v62, %v3562_v57 }
 0x33c   :  { %v3701_v39 = vpop.f32.mrf.mxu1 }
 0x33d   :  { %v3702_v33 = vadd.f32 %v3701_v39, %v3631_v36 }
 0x33e   :  { %v3703_v61 = vpop.f32.mrf.mxu1 }
 0x33f   :  { %v3998_v31 = vmul.f32 1.442695, %v3702_v33  ;;  %v3704_v48 = vadd.f32 %v3703_v61, %v3633_v8 }
 0x341   :  { %4283 = vpow2.f32 %v3998_v31  ;;  %v4000_v55 = vmul.f32 1.442695, %v3704_v48 }
 0x343   :  { %4285 = vpow2.f32 %v4000_v55 }
 0x34e   :  { %v4284_v15 = vpop.eup %4283 }
 0x34f   :  { %v4026_v59 = vmul.f32 %v4284_v15, %v4018_v21 }
 0x350   :  { %v4286_v24 = vpop.eup %4285 }
 0x351   :  { %4034 = vst [vmem:[#allocation7 + $0x20] sm:$0xff] %v4026_v59  ;;  %v4027_v41 = vmul.f32 %v4286_v24, %v4019_v6 }
 0x353   :  { %4035 = vst [vmem:[#allocation7 + $0x28] sm:$0xff] %v4027_v41 }
 0x355   :  { %v3772_v28 = vpop.f32.mrf.mxu0 }
 0x357   :  { %v3774_v18 = vpop.f32.mrf.mxu0 }
 0x364   :  { %v4046_v58 = vpop.xlane.xlu0 %4045 }
 0x365   :  { %v4047_v43 = vmul.f32 1.442695, %v4046_v58 }
 0x367   :  { %4287 = vpow2.f32 %v4047_v43 }
 0x368   :  { %4289 = vlog2.f32 %v1812_v9 }
 0x369   :  { %4291 = vlog2.f32 %v1813_v10 }
 0x374   :  { %v4288_v19 = vpop.eup %4287 }
 0x375   :  { %4050 = vst.msk [vmem:[#allocation7 + $0x40] sm:$0xff] %vm4049_vm13, %v4288_v19  ;;  %v4290_v27 = vpop.eup %4289 }
 0x376   :  { %v4292_v35 = vpop.eup %4291  ;;  %v1827_v56 = vmul.f32 0.6931472, %v4290_v27 }
 0x377   :  { %v1829_v3 = vmul.f32 0.6931472, %v4292_v35 }
 0x378   :  { %v3773_v46 = vadd.f32 %v3772_v28, %v1827_v56 }
 0x379   :  { %v3775_v60 = vadd.f32 %v3774_v18, %v1829_v3 }
 0x37c   :  { %v3843_v38 = vpop.f32.mrf.mxu1 }
 0x37d   :  { %v3844_v0 = vadd.f32 %v3843_v38, %v3773_v46 }
 0x37e   :  { %v3845_v40 = vpop.f32.mrf.mxu1 }
 0x37f   :  { %v3846_v11 = vadd.f32 %v3845_v40, %v3775_v60 }
 0x39a   :  { %v3914_v51 = vpop.f32.mrf.mxu0 }
 0x39b   :  { %v3915_v44 = vadd.f32 %v3914_v51, %v3844_v0 }
 0x39c   :  { %v3916_v26 = vpop.f32.mrf.mxu0 }
 0x39d   :  { %v3917_v2 = vadd.f32 %v3916_v26, %v3846_v11 }
 0x3bc   :  { %v3985_v54 = vpop.f32.mrf.mxu1 }
 0x3bd   :  { %v3986_v1 = vadd.f32 %v3985_v54, %v3915_v44 }
 0x3be   :  { %v3987_v4 = vpop.f32.mrf.mxu1 }
 0x3bf   :  { %v4002_v13 = vmul.f32 1.442695, %v3986_v1  ;;  %v3988_v52 = vadd.f32 %v3987_v4, %v3917_v2 }
 0x3c1   :  { %4293 = vpow2.f32 %v4002_v13  ;;  %v4004_v12 = vmul.f32 1.442695, %v3988_v52 }
 0x3c3   :  { %4295 = vpow2.f32 %v4004_v12 }
 0x3ce   :  { %v4294_v34 = vpop.eup %4293 }
 0x3cf   :  { %v4028_v23 = vmul.f32 %v4294_v34, %v4020_v42 }
 0x3d0   :  { %v4296_v16 = vpop.eup %4295 }
 0x3d1   :  { %4036 = vst [vmem:[#allocation7 + $0x30] sm:$0xff] %v4028_v23  ;;  %v4029_v17 = vmul.f32 %v4296_v16, %v4021_v22 }
 0x3d3   :  { %4037 = vst [vmem:[#allocation7 + $0x38] sm:$0xff] %v4029_v17 }
 0x3d4   :  { %4348 = shalt.err (!%p4345_p0)
}
 0x3d5   :  { %4060 = dma.vmem_to_hbm [thread:$0]  %s4058_s1, 1152, %s5463_s2, [#allocation4]  }
 0x3d6   :  { %4361 = dma.done.wait [#allocation4], 1152  }
 0x3d7   :  { %4362 = vsyncadd [#allocation4], 4294966144 }
 0x3d8   :  { %4064 = vsyncpa [#allocation3], 1 }
 0x3d9   :  { %4065 = vsyncpa [#allocation6], 1 }
 0x3da   :  { %4066 = vsyncpa [#allocation4], 1 }

</bundles_post_ra>
